<compile_context>
chip_gen: v7x
topology: tpu7x:2x2x1
jax: 0.10.0
libtpu: 0.0.40
codegen_flags: <defaults>
</compile_context>

<pallas_src>
import functools

import jax
import jax.numpy as jnp
import numpy as np
from jax.experimental import pallas as pl
from jax.experimental.pallas import tpu as pltpu


# ---------------------------------------------------------------------------
# Pallas kernel: fused bidirectional LSTM recurrence (both directions at once)
# ---------------------------------------------------------------------------
def _bilstm_kernel(x_ref,     # [T*Bp, 2E]   (fwd features | time-reversed features)
                   wih_ref,   # [2E, 8Hp]    block-diagonal over directions
                   whh_ref,   # [2Hp, 8Hp]   block-diagonal over directions
                   b_ref,     # [1, 8Hp]     b_ih + b_hh, packed gate columns
                   lo_ref,    # [Bp, 2Hp]    int32 lower validity bound (per state col)
                   hi_ref,    # [Bp, 2Hp]    int32 upper validity bound
                   out_ref,   # [T, Bp, 2Hp] per-step hidden (fwd | reversed bwd)
                   h_ref,     # [Bp, 2Hp]    final hidden state
                   gi_ref,    # VMEM [T*Bp, 8Hp] f32 (hoisted input projections)
                   h_sc,      # VMEM [Bp, 2Hp] f32
                   c_sc):     # VMEM [Bp, 2Hp] f32
    T = out_ref.shape[0]
    Bp = out_ref.shape[1]
    H2 = out_ref.shape[2]          # 2 * Hp  (fwd half | bwd half)

    # ---- hoisted input projection: one big MXU matmul for the whole sequence ----
    gi_ref[...] = jax.lax.dot_general(
        x_ref[...], wih_ref[...], (((1,), (0,)), ((), ())),
        preferred_element_type=jnp.float32) + b_ref[...]

    # ---- loop-invariant loads hoisted out of the recurrence ----
    whh = whh_ref[...]
    lo = lo_ref[...]
    hi = hi_ref[...]

    h_sc[...] = jnp.zeros_like(h_sc)
    c_sc[...] = jnp.zeros_like(c_sc)

    def step(t, carry):
        h_prev = h_sc[...]
        c_prev = c_sc[...]

        # Single fused recurrent matmul: both directions, all 4 gates.
        gh = jax.lax.dot_general(
            h_prev.astype(whh.dtype), whh, (((1,), (0,)), ((), ())),
            preferred_element_type=jnp.float32)            # [Bp, 8Hp]

        row = pl.multiple_of(t * Bp, Bp)
        gates = gi_ref[pl.ds(row, Bp), :] + gh              # [Bp, 8Hp]

        # Gate column layout: [i_f i_b | f_f f_b | g_f g_b | o_f o_b], each Hp wide,
        # so every slice below is a contiguous, 128-aligned 2Hp block.
        i = jax.nn.sigmoid(gates[:, 0 * H2:1 * H2])
        f = jax.nn.sigmoid(gates[:, 1 * H2:2 * H2])
        g = jnp.tanh(gates[:, 2 * H2:3 * H2])
        o = jax.nn.sigmoid(gates[:, 3 * H2:4 * H2])

        c_new = f * c_prev + i * g
        h_new = o * jnp.tanh(c_new)

        # Packed-sequence masking: only commit where lo <= t < hi.
        valid = (t >= lo) & (t < hi)                        # [Bp, 2Hp]
        h_sc[...] = jnp.where(valid, h_new, h_prev)
        c_sc[...] = jnp.where(valid, c_new, c_prev)
        out_ref[t] = jnp.where(valid, h_new, 0.0)           # lane-dense [Bp, 2Hp] store
        return carry

    if T <= 16:
        unroll = T
    elif T % 4 == 0:
        unroll = 4
    elif T % 2 == 0:
        unroll = 2
    else:
        unroll = 1
    jax.lax.fori_loop(0, T, step, 0, unroll=unroll)

    h_ref[...] = h_sc[...]


def _bilstm_pallas(x2d, wih, whh, b, lo, hi, T):
    TB, E2 = x2d.shape
    Bp = TB // T
    G8 = wih.shape[1]
    H2 = G8 // 4

    grid_spec = pltpu.PrefetchScalarGridSpec(
        num_scalar_prefetch=0,
        grid=(1,),
        in_specs=[
            pl.BlockSpec((TB, E2), lambda i: (0, 0)),
            pl.BlockSpec((E2, G8), lambda i: (0, 0)),
            pl.BlockSpec((H2, G8), lambda i: (0, 0)),
            pl.BlockSpec((1, G8), lambda i: (0, 0)),
            pl.BlockSpec((Bp, H2), lambda i: (0, 0)),
            pl.BlockSpec((Bp, H2), lambda i: (0, 0)),
        ],
        out_specs=[
            pl.BlockSpec((T, Bp, H2), lambda i: (0, 0, 0)),
            pl.BlockSpec((Bp, H2), lambda i: (0, 0)),
        ],
        scratch_shapes=[
            pltpu.VMEM((TB, G8), jnp.float32),   # hoisted input projections
            pltpu.VMEM((Bp, H2), jnp.float32),   # h state
            pltpu.VMEM((Bp, H2), jnp.float32),   # c state
        ],
    )
    return pl.pallas_call(
        _bilstm_kernel,
        grid_spec=grid_spec,
        out_shape=(
            jax.ShapeDtypeStruct((T, Bp, H2), jnp.float32),
            jax.ShapeDtypeStruct((Bp, H2), jnp.float32),
        ),
        compiler_params=pltpu.CompilerParams(
            dimension_semantics=("arbitrary",)),
    )(x2d, wih, whh, b, lo, hi)


# ---------------------------------------------------------------------------
# PackLSTM forward (embedding gather + weight packing is JAX glue)
# ---------------------------------------------------------------------------
def _round_up(v, m):
    return ((v + m - 1) // m) * m


@functools.partial(jax.jit, static_argnames=("compute_dtype",))
def pack_lstm_forward(tokens, in_len, embed_tbl, w_ih, w_hh, b_ih, b_hh,
                      compute_dtype=jnp.float32):
    """PackLSTM.forward (eval mode: Dropout(0.2) is identity).

    tokens: [B, T] int32; in_len: [B] int32 (sorted descending, max == T).
    w_ih: [2, 4H, E], w_hh: [2, 4H, H], b_ih/b_hh: [2, 4H]  -- PyTorch nn.LSTM
    per-direction layouts, gate order (i, f, g, o), index 0 = fwd, 1 = bwd.
    Returns out [B, T, 2H] (zeros at padded steps) and h [2, B, H].
    """
    B, T = tokens.shape
    E = embed_tbl.shape[1]
    H = w_hh.shape[2]
    Hp = _round_up(max(H, 128), 128)     # lane-dense hidden width
    Bp = _round_up(max(B, 8), 8)         # sublane-dense batch rows

    # Embedding lookup (gather) + eval-mode dropout (identity) = JAX glue.
    emb = embed_tbl[tokens].astype(jnp.float32)            # [B, T, E]
    x = jnp.transpose(emb, (1, 0, 2))                      # [T, B, E]  time-major
    # Merge directions on the feature axis: [fwd | time-reversed].
    x_big = jnp.concatenate([x, x[::-1]], axis=-1)         # [T, B, 2E]
    x_big = jnp.pad(x_big, ((0, 0), (0, Bp - B), (0, 0)))
    x2d = x_big.reshape(T * Bp, 2 * E).astype(compute_dtype)

    # Pack weights: column block (2*gate + dir) of width Hp, pre-transposed to
    # [in, out], block-diagonal over directions, b_ih + b_hh combined.
    wih_big = jnp.zeros((2 * E, 8 * Hp), jnp.float32)
    whh_big = jnp.zeros((2 * Hp, 8 * Hp), jnp.float32)
    b_big = jnp.zeros((1, 8 * Hp), jnp.float32)
    for d in range(2):
        for k in range(4):
            c0 = (2 * k + d) * Hp
            wih_big = wih_big.at[d * E:(d + 1) * E, c0:c0 + H].set(
                w_ih[d, k * H:(k + 1) * H, :].T)
            whh_big = whh_big.at[d * Hp:d * Hp + H, c0:c0 + H].set(
                w_hh[d, k * H:(k + 1) * H, :].T)
            b_big = b_big.at[0, c0:c0 + H].set(
                b_ih[d, k * H:(k + 1) * H] + b_hh[d, k * H:(k + 1) * H])
    wih_big = wih_big.astype(compute_dtype)
    whh_big = whh_big.astype(compute_dtype)

    # Per-row validity bounds (packed-sequence semantics): valid iff lo <= t < hi.
    # Forward half: [0, len);  reversed-backward half: [T - len, T).
    lens = jnp.pad(in_len.astype(jnp.int32), (0, Bp - B))
    lo = jnp.concatenate(
        [jnp.zeros((Bp, Hp), jnp.int32),
         jnp.broadcast_to((T - lens)[:, None], (Bp, Hp))], axis=1)
    hi = jnp.concatenate(
        [jnp.broadcast_to(lens[:, None], (Bp, Hp)),
         jnp.full((Bp, Hp), T, jnp.int32)], axis=1)

    out_pad, h_pad = _bilstm_pallas(x2d, wih_big, whh_big, b_big, lo, hi, T)

    # Reassemble PyTorch semantics.
    out_f = out_pad[:, :B, :H]                             # [T, B, H]
    out_b = out_pad[::-1, :B, Hp:Hp + H]                   # undo time reversal
    out = jnp.transpose(jnp.concatenate([out_f, out_b], axis=-1), (1, 0, 2))
    h = jnp.stack([h_pad[:B, :H], h_pad[:B, Hp:Hp + H]], axis=0)
    return out, h


# ---------------------------------------------------------------------------
# Pure-JAX reference (torch.nn.LSTM math + pack/pad_packed semantics)
# ---------------------------------------------------------------------------
def _ref_lstm_direction(x_tbe, lens, w_ih, w_hh, b_ih, b_hh, reverse):
    T, B, _ = x_tbe.shape
    H = w_hh.shape[1]
    xs = x_tbe[::-1] if reverse else x_tbe

    def step(carry, inp):
        h, c = carry
        x_t, t = inp
        gates = x_t @ w_ih.T + b_ih + h @ w_hh.T + b_hh     # [B, 4H]
        i = jax.nn.sigmoid(gates[:, 0:H])
        f = jax.nn.sigmoid(gates[:, H:2 * H])
        g = jnp.tanh(gates[:, 2 * H:3 * H])
        o = jax.nn.sigmoid(gates[:, 3 * H:4 * H])
        c_new = f * c + i * g
        h_new = o * jnp.tanh(c_new)
        valid = ((t >= T - lens) if reverse else (t < lens))[:, None]
        h2 = jnp.where(valid, h_new, h)
        c2 = jnp.where(valid, c_new, c)
        return (h2, c2), jnp.where(valid, h_new, 0.0)

    init = (jnp.zeros((B, H), jnp.float32), jnp.zeros((B, H), jnp.float32))
    (hN, _), outs = jax.lax.scan(step, init, (xs, jnp.arange(T)))
    if reverse:
        outs = outs[::-1]
    return outs, hN


def pack_lstm_reference(tokens, in_len, embed_tbl, w_ih, w_hh, b_ih, b_hh):
    emb = embed_tbl[tokens].astype(jnp.float32)
    x = jnp.transpose(emb, (1, 0, 2))
    lens = in_len.astype(jnp.int32)
    of, hf = _ref_lstm_direction(x, lens, w_ih[0], w_hh[0], b_ih[0], b_hh[0], False)
    ob, hb = _ref_lstm_direction(x, lens, w_ih[1], w_hh[1], b_ih[1], b_hh[1], True)
    out = jnp.transpose(jnp.concatenate([of, ob], axis=-1), (1, 0, 2))
    h = jnp.stack([hf, hb], axis=0)
    return out, h


# ---------------------------------------------------------------------------
if __name__ == "__main__":
    vocab_size, embed_size, hidden_size = 50, 32, 32
    B, T = 2, 8
    E, H = embed_size, hidden_size

    key = jax.random.PRNGKey(0)
    k_emb, k_wih, k_whh, k_bih, k_bhh, k_tok = jax.random.split(key, 6)

    embed_tbl = jax.random.normal(k_emb, (vocab_size, E), jnp.float32)
    bound = 1.0 / np.sqrt(H)
    # PyTorch nn.LSTM per-direction parameter shapes, gate order (i, f, g, o).
    w_ih = jax.random.uniform(k_wih, (2, 4 * H, E), jnp.float32, -bound, bound)
    w_hh = jax.random.uniform(k_whh, (2, 4 * H, H), jnp.float32, -bound, bound)
    b_ih = jax.random.uniform(k_bih, (2, 4 * H), jnp.float32, -bound, bound)
    b_hh = jax.random.uniform(k_bhh, (2, 4 * H), jnp.float32, -bound, bound)

    tokens = jax.random.randint(k_tok, (B, T), 0, vocab_size, jnp.int32)
    in_len = jnp.array([T, 5], jnp.int32)   # sorted descending, max == T

    # f32 path
    out, h = pack_lstm_forward(tokens, in_len, embed_tbl, w_ih, w_hh, b_ih, b_hh)
    jax.block_until_ready((out, h))

    out_ref, h_ref = pack_lstm_reference(tokens, in_len, embed_tbl,
                                         w_ih, w_hh, b_ih, b_hh)
    np.testing.assert_allclose(np.asarray(out), np.asarray(out_ref),
                               rtol=1e-4, atol=1e-4)
    np.testing.assert_allclose(np.asarray(h), np.asarray(h_ref),
                               rtol=1e-4, atol=1e-4)
    assert out.shape == (B, T, 2 * H)
    assert h.shape == (2, B, H)

    # bf16 MXU path (f32 accumulation, f32 gate math / state): sanity check.
    out_bf, h_bf = pack_lstm_forward(tokens, in_len, embed_tbl, w_ih, w_hh,
                                     b_ih, b_hh, compute_dtype=jnp.bfloat16)
    jax.block_until_ready((out_bf, h_bf))
    np.testing.assert_allclose(np.asarray(out_bf), np.asarray(out_ref),
                               rtol=1e-1, atol=1e-1)
    np.testing.assert_allclose(np.asarray(h_bf), np.asarray(h_ref),
                               rtol=1e-1, atol=1e-1)

    print("KERNEL_OK")
</pallas_src>

<mosaic_0001>
module attributes {stable_mosaic.version = 11 : i64} {
  func.func @_bilstm_kernel(%arg0: i32, %arg1: memref<64x64xf32, #tpu.memory_space<vmem>>, %arg2: memref<64x1024xf32, #tpu.memory_space<vmem>>, %arg3: memref<256x1024xf32, #tpu.memory_space<vmem>>, %arg4: memref<1x1024xf32, #tpu.memory_space<vmem>>, %arg5: memref<8x256xi32, #tpu.memory_space<vmem>>, %arg6: memref<8x256xi32, #tpu.memory_space<vmem>>, %arg7: memref<8x8x256xf32, #tpu.memory_space<vmem>>, %arg8: memref<8x256xf32, #tpu.memory_space<vmem>>, %arg9: memref<64x1024xf32, #tpu.memory_space<vmem>>, %arg10: memref<8x256xf32, #tpu.memory_space<vmem>>, %arg11: memref<8x256xf32, #tpu.memory_space<vmem>>) attributes {dimension_semantics = [#tpu.dimension_semantics<arbitrary>], iteration_bounds = array<i64: 1>, scalar_prefetch = 0 : i64, scratch_operands = 3 : i64, tpu.core_type = #tpu.core_type<tc>, window_params = [{pipeline_mode = #tpu.pipeline_mode<synchronous>, transform_indices = @transform_0, window_bounds = array<i64: 64, 64>}, {pipeline_mode = #tpu.pipeline_mode<synchronous>, transform_indices = @transform_1, window_bounds = array<i64: 64, 1024>}, {pipeline_mode = #tpu.pipeline_mode<synchronous>, transform_indices = @transform_2, window_bounds = array<i64: 256, 1024>}, {pipeline_mode = #tpu.pipeline_mode<synchronous>, transform_indices = @transform_3, window_bounds = array<i64: 1, 1024>}, {pipeline_mode = #tpu.pipeline_mode<synchronous>, transform_indices = @transform_4, window_bounds = array<i64: 8, 256>}, {pipeline_mode = #tpu.pipeline_mode<synchronous>, transform_indices = @transform_5, window_bounds = array<i64: 8, 256>}, {pipeline_mode = #tpu.pipeline_mode<synchronous>, transform_indices = @transform_6, window_bounds = array<i64: 8, 8, 256>}, {pipeline_mode = #tpu.pipeline_mode<synchronous>, transform_indices = @transform_7, window_bounds = array<i64: 8, 256>}]} {
    %c0 = arith.constant 0 : index
    %c0_0 = arith.constant 0 : index
    %0 = vector.load %arg1[%c0, %c0_0] : memref<64x64xf32, #tpu.memory_space<vmem>>, vector<64x64xf32>
    %c0_1 = arith.constant 0 : index
    %c0_2 = arith.constant 0 : index
    %1 = vector.load %arg2[%c0_1, %c0_2] : memref<64x1024xf32, #tpu.memory_space<vmem>>, vector<64x1024xf32>
    %cst = arith.constant dense<0.000000e+00> : vector<64x1024xf32>
    %2 = tpu.matmul %0, %1, %cst {dimension_numbers = #tpu.dot_dimension_numbers<[1], [0], [0], [1], [0, 0, 1, 1], [], []>} : vector<64x64xf32>, vector<64x1024xf32>, vector<64x1024xf32> -> vector<64x1024xf32>
    %c0_3 = arith.constant 0 : index
    %c0_4 = arith.constant 0 : index
    %3 = vector.load %arg4[%c0_3, %c0_4] : memref<1x1024xf32, #tpu.memory_space<vmem>>, vector<1x1024xf32>
    %4 = vector.broadcast %3 : vector<1x1024xf32> to vector<64x1024xf32>
    %5 = arith.addf %2, %4 : vector<64x1024xf32>
    %c0_5 = arith.constant 0 : index
    %c0_6 = arith.constant 0 : index
    %6 = vector.load %arg9[%c0_5, %c0_6] : memref<64x1024xf32, #tpu.memory_space<vmem>>, vector<64x1024xf32>
    tpu.vector_store %arg9[%c0_5, %c0_6], %5 {strides = array<i32>} : memref<64x1024xf32, #tpu.memory_space<vmem>>, vector<64x1024xf32>,
    %c0_7 = arith.constant 0 : index
    %c0_8 = arith.constant 0 : index
    %7 = vector.load %arg3[%c0_7, %c0_8] : memref<256x1024xf32, #tpu.memory_space<vmem>>, vector<256x1024xf32>
    %c0_9 = arith.constant 0 : index
    %c0_10 = arith.constant 0 : index
    %8 = vector.load %arg5[%c0_9, %c0_10] : memref<8x256xi32, #tpu.memory_space<vmem>>, vector<8x256xi32>
    %c0_11 = arith.constant 0 : index
    %c0_12 = arith.constant 0 : index
    %9 = vector.load %arg6[%c0_11, %c0_12] : memref<8x256xi32, #tpu.memory_space<vmem>>, vector<8x256xi32>
    %cst_13 = arith.constant 0.000000e+00 : f32
    %10 = vector.broadcast %cst_13 : f32 to vector<8x256xf32>
    %c0_14 = arith.constant 0 : index
    %c0_15 = arith.constant 0 : index
    %11 = vector.load %arg10[%c0_14, %c0_15] : memref<8x256xf32, #tpu.memory_space<vmem>>, vector<8x256xf32>
    tpu.vector_store %arg10[%c0_14, %c0_15], %10 {strides = array<i32>} : memref<8x256xf32, #tpu.memory_space<vmem>>, vector<8x256xf32>,
    %cst_16 = arith.constant 0.000000e+00 : f32
    %12 = vector.broadcast %cst_16 : f32 to vector<8x256xf32>
    %c0_17 = arith.constant 0 : index
    %c0_18 = arith.constant 0 : index
    %13 = vector.load %arg11[%c0_17, %c0_18] : memref<8x256xf32, #tpu.memory_space<vmem>>, vector<8x256xf32>
    tpu.vector_store %arg11[%c0_17, %c0_18], %12 {strides = array<i32>} : memref<8x256xf32, #tpu.memory_space<vmem>>, vector<8x256xf32>,
    %c0_i32 = arith.constant 0 : i32
    %c0_19 = arith.constant 0 : index
    %c0_20 = arith.constant 0 : index
    %14 = vector.load %arg10[%c0_19, %c0_20] : memref<8x256xf32, #tpu.memory_space<vmem>>, vector<8x256xf32>
    %c0_21 = arith.constant 0 : index
    %c0_22 = arith.constant 0 : index
    %15 = vector.load %arg11[%c0_21, %c0_22] : memref<8x256xf32, #tpu.memory_space<vmem>>, vector<8x256xf32>
    %cst_23 = arith.constant dense<0.000000e+00> : vector<8x1024xf32>
    %16 = tpu.matmul %14, %7, %cst_23 {dimension_numbers = #tpu.dot_dimension_numbers<[1], [0], [0], [1], [0, 0, 1, 1], [], []>} : vector<8x256xf32>, vector<256x1024xf32>, vector<8x1024xf32> -> vector<8x1024xf32>
    %c8_i32 = arith.constant 8 : i32
    %17 = arith.muli %c0_i32, %c8_i32 : i32
    %18 = tpu.assume_multiple %17, 8 : i32
    %19 = arith.index_cast %18 : i32 to index
    %c0_24 = arith.constant 0 : index
    %20 = vector.load %arg9[%19, %c0_24] : memref<64x1024xf32, #tpu.memory_space<vmem>>, vector<8x1024xf32>
    %21 = arith.addf %20, %16 : vector<8x1024xf32>
    %22 = vector.extract_strided_slice %21 {offsets = [0, 0], sizes = [8, 256], strides = [1, 1]} : vector<8x1024xf32> to vector<8x256xf32>
    %23 = arith.negf %22 : vector<8x256xf32>
    %24 = math.exp %23 : vector<8x256xf32>
    %cst_25 = arith.constant 1.000000e+00 : f32
    %25 = vector.broadcast %cst_25 : f32 to vector<8x256xf32>
    %26 = arith.addf %25, %24 : vector<8x256xf32>
    %27 = arith.divf %25, %26 : vector<8x256xf32>
    %28 = vector.extract_strided_slice %21 {offsets = [0, 256], sizes = [8, 256], strides = [1, 1]} : vector<8x1024xf32> to vector<8x256xf32>
    %29 = arith.negf %28 : vector<8x256xf32>
    %30 = math.exp %29 : vector<8x256xf32>
    %cst_26 = arith.constant 1.000000e+00 : f32
    %31 = vector.broadcast %cst_26 : f32 to vector<8x256xf32>
    %32 = arith.addf %31, %30 : vector<8x256xf32>
    %33 = arith.divf %31, %32 : vector<8x256xf32>
    %34 = vector.extract_strided_slice %21 {offsets = [0, 512], sizes = [8, 256], strides = [1, 1]} : vector<8x1024xf32> to vector<8x256xf32>
    %35 = math.tanh %34 : vector<8x256xf32>
    %36 = vector.extract_strided_slice %21 {offsets = [0, 768], sizes = [8, 256], strides = [1, 1]} : vector<8x1024xf32> to vector<8x256xf32>
    %37 = arith.negf %36 : vector<8x256xf32>
    %38 = math.exp %37 : vector<8x256xf32>
    %cst_27 = arith.constant 1.000000e+00 : f32
    %39 = vector.broadcast %cst_27 : f32 to vector<8x256xf32>
    %40 = arith.addf %39, %38 : vector<8x256xf32>
    %41 = arith.divf %39, %40 : vector<8x256xf32>
    %42 = arith.mulf %33, %15 : vector<8x256xf32>
    %43 = arith.mulf %27, %35 : vector<8x256xf32>
    %44 = arith.addf %42, %43 : vector<8x256xf32>
    %45 = math.tanh %44 : vector<8x256xf32>
    %46 = arith.mulf %41, %45 : vector<8x256xf32>
    %47 = vector.broadcast %c0_i32 : i32 to vector<8x256xi32>
    %48 = arith.cmpi sge, %47, %8 : vector<8x256xi32>
    %49 = vector.broadcast %c0_i32 : i32 to vector<8x256xi32>
    %50 = arith.cmpi slt, %49, %9 : vector<8x256xi32>
    %51 = arith.andi %48, %50 : vector<8x256xi1>
    %52 = arith.select %51, %46, %14 : vector<8x256xi1>, vector<8x256xf32>
    %c0_28 = arith.constant 0 : index
    %c0_29 = arith.constant 0 : index
    %53 = vector.load %arg10[%c0_28, %c0_29] : memref<8x256xf32, #tpu.memory_space<vmem>>, vector<8x256xf32>
    tpu.vector_store %arg10[%c0_28, %c0_29], %52 {strides = array<i32>} : memref<8x256xf32, #tpu.memory_space<vmem>>, vector<8x256xf32>,
    %54 = arith.select %51, %44, %15 : vector<8x256xi1>, vector<8x256xf32>
    %c0_30 = arith.constant 0 : index
    %c0_31 = arith.constant 0 : index
    %55 = vector.load %arg11[%c0_30, %c0_31] : memref<8x256xf32, #tpu.memory_space<vmem>>, vector<8x256xf32>
    tpu.vector_store %arg11[%c0_30, %c0_31], %54 {strides = array<i32>} : memref<8x256xf32, #tpu.memory_space<vmem>>, vector<8x256xf32>,
    %cst_32 = arith.constant 0.000000e+00 : f32
    %56 = vector.broadcast %cst_32 : f32 to vector<8x256xf32>
    %57 = arith.select %51, %46, %56 : vector<8x256xi1>, vector<8x256xf32>
    %58 = arith.index_cast %c0_i32 : i32 to index
    %c0_33 = arith.constant 0 : index
    %c0_34 = arith.constant 0 : index
    %59 = vector.load %arg7[%58, %c0_33, %c0_34] : memref<8x8x256xf32, #tpu.memory_space<vmem>>, vector<1x8x256xf32>
    %60 = vector.shape_cast %59 : vector<1x8x256xf32> to vector<8x256xf32>
    %61 = vector.shape_cast %57 : vector<8x256xf32> to vector<1x8x256xf32>
    tpu.vector_store %arg7[%58, %c0_33, %c0_34], %61 {strides = array<i32>} : memref<8x8x256xf32, #tpu.memory_space<vmem>>, vector<1x8x256xf32>,
    %c1_i32 = arith.constant 1 : i32
    %c0_35 = arith.constant 0 : index
    %c0_36 = arith.constant 0 : index
    %62 = vector.load %arg10[%c0_35, %c0_36] : memref<8x256xf32, #tpu.memory_space<vmem>>, vector<8x256xf32>
    %c0_37 = arith.constant 0 : index
    %c0_38 = arith.constant 0 : index
    %63 = vector.load %arg11[%c0_37, %c0_38] : memref<8x256xf32, #tpu.memory_space<vmem>>, vector<8x256xf32>
    %cst_39 = arith.constant dense<0.000000e+00> : vector<8x1024xf32>
    %64 = tpu.matmul %62, %7, %cst_39 {dimension_numbers = #tpu.dot_dimension_numbers<[1], [0], [0], [1], [0, 0, 1, 1], [], []>} : vector<8x256xf32>, vector<256x1024xf32>, vector<8x1024xf32> -> vector<8x1024xf32>
    %c8_i32_40 = arith.constant 8 : i32
    %65 = arith.muli %c1_i32, %c8_i32_40 : i32
    %66 = tpu.assume_multiple %65, 8 : i32
    %67 = arith.index_cast %66 : i32 to index
    %c0_41 = arith.constant 0 : index
    %68 = vector.load %arg9[%67, %c0_41] : memref<64x1024xf32, #tpu.memory_space<vmem>>, vector<8x1024xf32>
    %69 = arith.addf %68, %64 : vector<8x1024xf32>
    %70 = vector.extract_strided_slice %69 {offsets = [0, 0], sizes = [8, 256], strides = [1, 1]} : vector<8x1024xf32> to vector<8x256xf32>
    %71 = arith.negf %70 : vector<8x256xf32>
    %72 = math.exp %71 : vector<8x256xf32>
    %cst_42 = arith.constant 1.000000e+00 : f32
    %73 = vector.broadcast %cst_42 : f32 to vector<8x256xf32>
    %74 = arith.addf %73, %72 : vector<8x256xf32>
    %75 = arith.divf %73, %74 : vector<8x256xf32>
    %76 = vector.extract_strided_slice %69 {offsets = [0, 256], sizes = [8, 256], strides = [1, 1]} : vector<8x1024xf32> to vector<8x256xf32>
    %77 = arith.negf %76 : vector<8x256xf32>
    %78 = math.exp %77 : vector<8x256xf32>
    %cst_43 = arith.constant 1.000000e+00 : f32
    %79 = vector.broadcast %cst_43 : f32 to vector<8x256xf32>
    %80 = arith.addf %79, %78 : vector<8x256xf32>
    %81 = arith.divf %79, %80 : vector<8x256xf32>
    %82 = vector.extract_strided_slice %69 {offsets = [0, 512], sizes = [8, 256], strides = [1, 1]} : vector<8x1024xf32> to vector<8x256xf32>
    %83 = math.tanh %82 : vector<8x256xf32>
    %84 = vector.extract_strided_slice %69 {offsets = [0, 768], sizes = [8, 256], strides = [1, 1]} : vector<8x1024xf32> to vector<8x256xf32>
    %85 = arith.negf %84 : vector<8x256xf32>
    %86 = math.exp %85 : vector<8x256xf32>
    %cst_44 = arith.constant 1.000000e+00 : f32
    %87 = vector.broadcast %cst_44 : f32 to vector<8x256xf32>
    %88 = arith.addf %87, %86 : vector<8x256xf32>
    %89 = arith.divf %87, %88 : vector<8x256xf32>
    %90 = arith.mulf %81, %63 : vector<8x256xf32>
    %91 = arith.mulf %75, %83 : vector<8x256xf32>
    %92 = arith.addf %90, %91 : vector<8x256xf32>
    %93 = math.tanh %92 : vector<8x256xf32>
    %94 = arith.mulf %89, %93 : vector<8x256xf32>
    %95 = vector.broadcast %c1_i32 : i32 to vector<8x256xi32>
    %96 = arith.cmpi sge, %95, %8 : vector<8x256xi32>
    %97 = vector.broadcast %c1_i32 : i32 to vector<8x256xi32>
    %98 = arith.cmpi slt, %97, %9 : vector<8x256xi32>
    %99 = arith.andi %96, %98 : vector<8x256xi1>
    %100 = arith.select %99, %94, %62 : vector<8x256xi1>, vector<8x256xf32>
    %c0_45 = arith.constant 0 : index
    %c0_46 = arith.constant 0 : index
    %101 = vector.load %arg10[%c0_45, %c0_46] : memref<8x256xf32, #tpu.memory_space<vmem>>, vector<8x256xf32>
    tpu.vector_store %arg10[%c0_45, %c0_46], %100 {strides = array<i32>} : memref<8x256xf32, #tpu.memory_space<vmem>>, vector<8x256xf32>,
    %102 = arith.select %99, %92, %63 : vector<8x256xi1>, vector<8x256xf32>
    %c0_47 = arith.constant 0 : index
    %c0_48 = arith.constant 0 : index
    %103 = vector.load %arg11[%c0_47, %c0_48] : memref<8x256xf32, #tpu.memory_space<vmem>>, vector<8x256xf32>
    tpu.vector_store %arg11[%c0_47, %c0_48], %102 {strides = array<i32>} : memref<8x256xf32, #tpu.memory_space<vmem>>, vector<8x256xf32>,
    %cst_49 = arith.constant 0.000000e+00 : f32
    %104 = vector.broadcast %cst_49 : f32 to vector<8x256xf32>
    %105 = arith.select %99, %94, %104 : vector<8x256xi1>, vector<8x256xf32>
    %106 = arith.index_cast %c1_i32 : i32 to index
    %c0_50 = arith.constant 0 : index
    %c0_51 = arith.constant 0 : index
    %107 = vector.load %arg7[%106, %c0_50, %c0_51] : memref<8x8x256xf32, #tpu.memory_space<vmem>>, vector<1x8x256xf32>
    %108 = vector.shape_cast %107 : vector<1x8x256xf32> to vector<8x256xf32>
    %109 = vector.shape_cast %105 : vector<8x256xf32> to vector<1x8x256xf32>
    tpu.vector_store %arg7[%106, %c0_50, %c0_51], %109 {strides = array<i32>} : memref<8x8x256xf32, #tpu.memory_space<vmem>>, vector<1x8x256xf32>,
    %c2_i32 = arith.constant 2 : i32
    %c0_52 = arith.constant 0 : index
    %c0_53 = arith.constant 0 : index
    %110 = vector.load %arg10[%c0_52, %c0_53] : memref<8x256xf32, #tpu.memory_space<vmem>>, vector<8x256xf32>
    %c0_54 = arith.constant 0 : index
    %c0_55 = arith.constant 0 : index
    %111 = vector.load %arg11[%c0_54, %c0_55] : memref<8x256xf32, #tpu.memory_space<vmem>>, vector<8x256xf32>
    %cst_56 = arith.constant dense<0.000000e+00> : vector<8x1024xf32>
    %112 = tpu.matmul %110, %7, %cst_56 {dimension_numbers = #tpu.dot_dimension_numbers<[1], [0], [0], [1], [0, 0, 1, 1], [], []>} : vector<8x256xf32>, vector<256x1024xf32>, vector<8x1024xf32> -> vector<8x1024xf32>
    %c8_i32_57 = arith.constant 8 : i32
    %113 = arith.muli %c2_i32, %c8_i32_57 : i32
    %114 = tpu.assume_multiple %113, 8 : i32
    %115 = arith.index_cast %114 : i32 to index
    %c0_58 = arith.constant 0 : index
    %116 = vector.load %arg9[%115, %c0_58] : memref<64x1024xf32, #tpu.memory_space<vmem>>, vector<8x1024xf32>
    %117 = arith.addf %116, %112 : vector<8x1024xf32>
    %118 = vector.extract_strided_slice %117 {offsets = [0, 0], sizes = [8, 256], strides = [1, 1]} : vector<8x1024xf32> to vector<8x256xf32>
    %119 = arith.negf %118 : vector<8x256xf32>
    %120 = math.exp %119 : vector<8x256xf32>
    %cst_59 = arith.constant 1.000000e+00 : f32
    %121 = vector.broadcast %cst_59 : f32 to vector<8x256xf32>
    %122 = arith.addf %121, %120 : vector<8x256xf32>
    %123 = arith.divf %121, %122 : vector<8x256xf32>
    %124 = vector.extract_strided_slice %117 {offsets = [0, 256], sizes = [8, 256], strides = [1, 1]} : vector<8x1024xf32> to vector<8x256xf32>
    %125 = arith.negf %124 : vector<8x256xf32>
    %126 = math.exp %125 : vector<8x256xf32>
    %cst_60 = arith.constant 1.000000e+00 : f32
    %127 = vector.broadcast %cst_60 : f32 to vector<8x256xf32>
    %128 = arith.addf %127, %126 : vector<8x256xf32>
    %129 = arith.divf %127, %128 : vector<8x256xf32>
    %130 = vector.extract_strided_slice %117 {offsets = [0, 512], sizes = [8, 256], strides = [1, 1]} : vector<8x1024xf32> to vector<8x256xf32>
    %131 = math.tanh %130 : vector<8x256xf32>
    %132 = vector.extract_strided_slice %117 {offsets = [0, 768], sizes = [8, 256], strides = [1, 1]} : vector<8x1024xf32> to vector<8x256xf32>
    %133 = arith.negf %132 : vector<8x256xf32>
    %134 = math.exp %133 : vector<8x256xf32>
    %cst_61 = arith.constant 1.000000e+00 : f32
    %135 = vector.broadcast %cst_61 : f32 to vector<8x256xf32>
    %136 = arith.addf %135, %134 : vector<8x256xf32>
    %137 = arith.divf %135, %136 : vector<8x256xf32>
    %138 = arith.mulf %129, %111 : vector<8x256xf32>
    %139 = arith.mulf %123, %131 : vector<8x256xf32>
    %140 = arith.addf %138, %139 : vector<8x256xf32>
    %141 = math.tanh %140 : vector<8x256xf32>
    %142 = arith.mulf %137, %141 : vector<8x256xf32>
    %143 = vector.broadcast %c2_i32 : i32 to vector<8x256xi32>
    %144 = arith.cmpi sge, %143, %8 : vector<8x256xi32>
    %145 = vector.broadcast %c2_i32 : i32 to vector<8x256xi32>
    %146 = arith.cmpi slt, %145, %9 : vector<8x256xi32>
    %147 = arith.andi %144, %146 : vector<8x256xi1>
    %148 = arith.select %147, %142, %110 : vector<8x256xi1>, vector<8x256xf32>
    %c0_62 = arith.constant 0 : index
    %c0_63 = arith.constant 0 : index
    %149 = vector.load %arg10[%c0_62, %c0_63] : memref<8x256xf32, #tpu.memory_space<vmem>>, vector<8x256xf32>
    tpu.vector_store %arg10[%c0_62, %c0_63], %148 {strides = array<i32>} : memref<8x256xf32, #tpu.memory_space<vmem>>, vector<8x256xf32>,
    %150 = arith.select %147, %140, %111 : vector<8x256xi1>, vector<8x256xf32>
    %c0_64 = arith.constant 0 : index
    %c0_65 = arith.constant 0 : index
    %151 = vector.load %arg11[%c0_64, %c0_65] : memref<8x256xf32, #tpu.memory_space<vmem>>, vector<8x256xf32>
    tpu.vector_store %arg11[%c0_64, %c0_65], %150 {strides = array<i32>} : memref<8x256xf32, #tpu.memory_space<vmem>>, vector<8x256xf32>,
    %cst_66 = arith.constant 0.000000e+00 : f32
    %152 = vector.broadcast %cst_66 : f32 to vector<8x256xf32>
    %153 = arith.select %147, %142, %152 : vector<8x256xi1>, vector<8x256xf32>
    %154 = arith.index_cast %c2_i32 : i32 to index
    %c0_67 = arith.constant 0 : index
    %c0_68 = arith.constant 0 : index
    %155 = vector.load %arg7[%154, %c0_67, %c0_68] : memref<8x8x256xf32, #tpu.memory_space<vmem>>, vector<1x8x256xf32>
    %156 = vector.shape_cast %155 : vector<1x8x256xf32> to vector<8x256xf32>
    %157 = vector.shape_cast %153 : vector<8x256xf32> to vector<1x8x256xf32>
    tpu.vector_store %arg7[%154, %c0_67, %c0_68], %157 {strides = array<i32>} : memref<8x8x256xf32, #tpu.memory_space<vmem>>, vector<1x8x256xf32>,
    %c3_i32 = arith.constant 3 : i32
    %c0_69 = arith.constant 0 : index
    %c0_70 = arith.constant 0 : index
    %158 = vector.load %arg10[%c0_69, %c0_70] : memref<8x256xf32, #tpu.memory_space<vmem>>, vector<8x256xf32>
    %c0_71 = arith.constant 0 : index
    %c0_72 = arith.constant 0 : index
    %159 = vector.load %arg11[%c0_71, %c0_72] : memref<8x256xf32, #tpu.memory_space<vmem>>, vector<8x256xf32>
    %cst_73 = arith.constant dense<0.000000e+00> : vector<8x1024xf32>
    %160 = tpu.matmul %158, %7, %cst_73 {dimension_numbers = #tpu.dot_dimension_numbers<[1], [0], [0], [1], [0, 0, 1, 1], [], []>} : vector<8x256xf32>, vector<256x1024xf32>, vector<8x1024xf32> -> vector<8x1024xf32>
    %c8_i32_74 = arith.constant 8 : i32
    %161 = arith.muli %c3_i32, %c8_i32_74 : i32
    %162 = tpu.assume_multiple %161, 8 : i32
    %163 = arith.index_cast %162 : i32 to index
    %c0_75 = arith.constant 0 : index
    %164 = vector.load %arg9[%163, %c0_75] : memref<64x1024xf32, #tpu.memory_space<vmem>>, vector<8x1024xf32>
    %165 = arith.addf %164, %160 : vector<8x1024xf32>
    %166 = vector.extract_strided_slice %165 {offsets = [0, 0], sizes = [8, 256], strides = [1, 1]} : vector<8x1024xf32> to vector<8x256xf32>
    %167 = arith.negf %166 : vector<8x256xf32>
    %168 = math.exp %167 : vector<8x256xf32>
    %cst_76 = arith.constant 1.000000e+00 : f32
    %169 = vector.broadcast %cst_76 : f32 to vector<8x256xf32>
    %170 = arith.addf %169, %168 : vector<8x256xf32>
    %171 = arith.divf %169, %170 : vector<8x256xf32>
    %172 = vector.extract_strided_slice %165 {offsets = [0, 256], sizes = [8, 256], strides = [1, 1]} : vector<8x1024xf32> to vector<8x256xf32>
    %173 = arith.negf %172 : vector<8x256xf32>
    %174 = math.exp %173 : vector<8x256xf32>
    %cst_77 = arith.constant 1.000000e+00 : f32
    %175 = vector.broadcast %cst_77 : f32 to vector<8x256xf32>
    %176 = arith.addf %175, %174 : vector<8x256xf32>
    %177 = arith.divf %175, %176 : vector<8x256xf32>
    %178 = vector.extract_strided_slice %165 {offsets = [0, 512], sizes = [8, 256], strides = [1, 1]} : vector<8x1024xf32> to vector<8x256xf32>
    %179 = math.tanh %178 : vector<8x256xf32>
    %180 = vector.extract_strided_slice %165 {offsets = [0, 768], sizes = [8, 256], strides = [1, 1]} : vector<8x1024xf32> to vector<8x256xf32>
    %181 = arith.negf %180 : vector<8x256xf32>
    %182 = math.exp %181 : vector<8x256xf32>
    %cst_78 = arith.constant 1.000000e+00 : f32
    %183 = vector.broadcast %cst_78 : f32 to vector<8x256xf32>
    %184 = arith.addf %183, %182 : vector<8x256xf32>
    %185 = arith.divf %183, %184 : vector<8x256xf32>
    %186 = arith.mulf %177, %159 : vector<8x256xf32>
    %187 = arith.mulf %171, %179 : vector<8x256xf32>
    %188 = arith.addf %186, %187 : vector<8x256xf32>
    %189 = math.tanh %188 : vector<8x256xf32>
    %190 = arith.mulf %185, %189 : vector<8x256xf32>
    %191 = vector.broadcast %c3_i32 : i32 to vector<8x256xi32>
    %192 = arith.cmpi sge, %191, %8 : vector<8x256xi32>
    %193 = vector.broadcast %c3_i32 : i32 to vector<8x256xi32>
    %194 = arith.cmpi slt, %193, %9 : vector<8x256xi32>
    %195 = arith.andi %192, %194 : vector<8x256xi1>
    %196 = arith.select %195, %190, %158 : vector<8x256xi1>, vector<8x256xf32>
    %c0_79 = arith.constant 0 : index
    %c0_80 = arith.constant 0 : index
    %197 = vector.load %arg10[%c0_79, %c0_80] : memref<8x256xf32, #tpu.memory_space<vmem>>, vector<8x256xf32>
    tpu.vector_store %arg10[%c0_79, %c0_80], %196 {strides = array<i32>} : memref<8x256xf32, #tpu.memory_space<vmem>>, vector<8x256xf32>,
    %198 = arith.select %195, %188, %159 : vector<8x256xi1>, vector<8x256xf32>
    %c0_81 = arith.constant 0 : index
    %c0_82 = arith.constant 0 : index
    %199 = vector.load %arg11[%c0_81, %c0_82] : memref<8x256xf32, #tpu.memory_space<vmem>>, vector<8x256xf32>
    tpu.vector_store %arg11[%c0_81, %c0_82], %198 {strides = array<i32>} : memref<8x256xf32, #tpu.memory_space<vmem>>, vector<8x256xf32>,
    %cst_83 = arith.constant 0.000000e+00 : f32
    %200 = vector.broadcast %cst_83 : f32 to vector<8x256xf32>
    %201 = arith.select %195, %190, %200 : vector<8x256xi1>, vector<8x256xf32>
    %202 = arith.index_cast %c3_i32 : i32 to index
    %c0_84 = arith.constant 0 : index
    %c0_85 = arith.constant 0 : index
    %203 = vector.load %arg7[%202, %c0_84, %c0_85] : memref<8x8x256xf32, #tpu.memory_space<vmem>>, vector<1x8x256xf32>
    %204 = vector.shape_cast %203 : vector<1x8x256xf32> to vector<8x256xf32>
    %205 = vector.shape_cast %201 : vector<8x256xf32> to vector<1x8x256xf32>
    tpu.vector_store %arg7[%202, %c0_84, %c0_85], %205 {strides = array<i32>} : memref<8x8x256xf32, #tpu.memory_space<vmem>>, vector<1x8x256xf32>,
    %c4_i32 = arith.constant 4 : i32
    %c0_86 = arith.constant 0 : index
    %c0_87 = arith.constant 0 : index
    %206 = vector.load %arg10[%c0_86, %c0_87] : memref<8x256xf32, #tpu.memory_space<vmem>>, vector<8x256xf32>
    %c0_88 = arith.constant 0 : index
    %c0_89 = arith.constant 0 : index
    %207 = vector.load %arg11[%c0_88, %c0_89] : memref<8x256xf32, #tpu.memory_space<vmem>>, vector<8x256xf32>
    %cst_90 = arith.constant dense<0.000000e+00> : vector<8x1024xf32>
    %208 = tpu.matmul %206, %7, %cst_90 {dimension_numbers = #tpu.dot_dimension_numbers<[1], [0], [0], [1], [0, 0, 1, 1], [], []>} : vector<8x256xf32>, vector<256x1024xf32>, vector<8x1024xf32> -> vector<8x1024xf32>
    %c8_i32_91 = arith.constant 8 : i32
    %209 = arith.muli %c4_i32, %c8_i32_91 : i32
    %210 = tpu.assume_multiple %209, 8 : i32
    %211 = arith.index_cast %210 : i32 to index
    %c0_92 = arith.constant 0 : index
    %212 = vector.load %arg9[%211, %c0_92] : memref<64x1024xf32, #tpu.memory_space<vmem>>, vector<8x1024xf32>
    %213 = arith.addf %212, %208 : vector<8x1024xf32>
    %214 = vector.extract_strided_slice %213 {offsets = [0, 0], sizes = [8, 256], strides = [1, 1]} : vector<8x1024xf32> to vector<8x256xf32>
    %215 = arith.negf %214 : vector<8x256xf32>
    %216 = math.exp %215 : vector<8x256xf32>
    %cst_93 = arith.constant 1.000000e+00 : f32
    %217 = vector.broadcast %cst_93 : f32 to vector<8x256xf32>
    %218 = arith.addf %217, %216 : vector<8x256xf32>
    %219 = arith.divf %217, %218 : vector<8x256xf32>
    %220 = vector.extract_strided_slice %213 {offsets = [0, 256], sizes = [8, 256], strides = [1, 1]} : vector<8x1024xf32> to vector<8x256xf32>
    %221 = arith.negf %220 : vector<8x256xf32>
    %222 = math.exp %221 : vector<8x256xf32>
    %cst_94 = arith.constant 1.000000e+00 : f32
    %223 = vector.broadcast %cst_94 : f32 to vector<8x256xf32>
    %224 = arith.addf %223, %222 : vector<8x256xf32>
    %225 = arith.divf %223, %224 : vector<8x256xf32>
    %226 = vector.extract_strided_slice %213 {offsets = [0, 512], sizes = [8, 256], strides = [1, 1]} : vector<8x1024xf32> to vector<8x256xf32>
    %227 = math.tanh %226 : vector<8x256xf32>
    %228 = vector.extract_strided_slice %213 {offsets = [0, 768], sizes = [8, 256], strides = [1, 1]} : vector<8x1024xf32> to vector<8x256xf32>
    %229 = arith.negf %228 : vector<8x256xf32>
    %230 = math.exp %229 : vector<8x256xf32>
    %cst_95 = arith.constant 1.000000e+00 : f32
    %231 = vector.broadcast %cst_95 : f32 to vector<8x256xf32>
    %232 = arith.addf %231, %230 : vector<8x256xf32>
    %233 = arith.divf %231, %232 : vector<8x256xf32>
    %234 = arith.mulf %225, %207 : vector<8x256xf32>
    %235 = arith.mulf %219, %227 : vector<8x256xf32>
    %236 = arith.addf %234, %235 : vector<8x256xf32>
    %237 = math.tanh %236 : vector<8x256xf32>
    %238 = arith.mulf %233, %237 : vector<8x256xf32>
    %239 = vector.broadcast %c4_i32 : i32 to vector<8x256xi32>
    %240 = arith.cmpi sge, %239, %8 : vector<8x256xi32>
    %241 = vector.broadcast %c4_i32 : i32 to vector<8x256xi32>
    %242 = arith.cmpi slt, %241, %9 : vector<8x256xi32>
    %243 = arith.andi %240, %242 : vector<8x256xi1>
    %244 = arith.select %243, %238, %206 : vector<8x256xi1>, vector<8x256xf32>
    %c0_96 = arith.constant 0 : index
    %c0_97 = arith.constant 0 : index
    %245 = vector.load %arg10[%c0_96, %c0_97] : memref<8x256xf32, #tpu.memory_space<vmem>>, vector<8x256xf32>
    tpu.vector_store %arg10[%c0_96, %c0_97], %244 {strides = array<i32>} : memref<8x256xf32, #tpu.memory_space<vmem>>, vector<8x256xf32>,
    %246 = arith.select %243, %236, %207 : vector<8x256xi1>, vector<8x256xf32>
    %c0_98 = arith.constant 0 : index
    %c0_99 = arith.constant 0 : index
    %247 = vector.load %arg11[%c0_98, %c0_99] : memref<8x256xf32, #tpu.memory_space<vmem>>, vector<8x256xf32>
    tpu.vector_store %arg11[%c0_98, %c0_99], %246 {strides = array<i32>} : memref<8x256xf32, #tpu.memory_space<vmem>>, vector<8x256xf32>,
    %cst_100 = arith.constant 0.000000e+00 : f32
    %248 = vector.broadcast %cst_100 : f32 to vector<8x256xf32>
    %249 = arith.select %243, %238, %248 : vector<8x256xi1>, vector<8x256xf32>
    %250 = arith.index_cast %c4_i32 : i32 to index
    %c0_101 = arith.constant 0 : index
    %c0_102 = arith.constant 0 : index
    %251 = vector.load %arg7[%250, %c0_101, %c0_102] : memref<8x8x256xf32, #tpu.memory_space<vmem>>, vector<1x8x256xf32>
    %252 = vector.shape_cast %251 : vector<1x8x256xf32> to vector<8x256xf32>
    %253 = vector.shape_cast %249 : vector<8x256xf32> to vector<1x8x256xf32>
    tpu.vector_store %arg7[%250, %c0_101, %c0_102], %253 {strides = array<i32>} : memref<8x8x256xf32, #tpu.memory_space<vmem>>, vector<1x8x256xf32>,
    %c5_i32 = arith.constant 5 : i32
    %c0_103 = arith.constant 0 : index
    %c0_104 = arith.constant 0 : index
    %254 = vector.load %arg10[%c0_103, %c0_104] : memref<8x256xf32, #tpu.memory_space<vmem>>, vector<8x256xf32>
    %c0_105 = arith.constant 0 : index
    %c0_106 = arith.constant 0 : index
    %255 = vector.load %arg11[%c0_105, %c0_106] : memref<8x256xf32, #tpu.memory_space<vmem>>, vector<8x256xf32>
    %cst_107 = arith.constant dense<0.000000e+00> : vector<8x1024xf32>
    %256 = tpu.matmul %254, %7, %cst_107 {dimension_numbers = #tpu.dot_dimension_numbers<[1], [0], [0], [1], [0, 0, 1, 1], [], []>} : vector<8x256xf32>, vector<256x1024xf32>, vector<8x1024xf32> -> vector<8x1024xf32>
    %c8_i32_108 = arith.constant 8 : i32
    %257 = arith.muli %c5_i32, %c8_i32_108 : i32
    %258 = tpu.assume_multiple %257, 8 : i32
    %259 = arith.index_cast %258 : i32 to index
    %c0_109 = arith.constant 0 : index
    %260 = vector.load %arg9[%259, %c0_109] : memref<64x1024xf32, #tpu.memory_space<vmem>>, vector<8x1024xf32>
    %261 = arith.addf %260, %256 : vector<8x1024xf32>
    %262 = vector.extract_strided_slice %261 {offsets = [0, 0], sizes = [8, 256], strides = [1, 1]} : vector<8x1024xf32> to vector<8x256xf32>
    %263 = arith.negf %262 : vector<8x256xf32>
    %264 = math.exp %263 : vector<8x256xf32>
    %cst_110 = arith.constant 1.000000e+00 : f32
    %265 = vector.broadcast %cst_110 : f32 to vector<8x256xf32>
    %266 = arith.addf %265, %264 : vector<8x256xf32>
    %267 = arith.divf %265, %266 : vector<8x256xf32>
    %268 = vector.extract_strided_slice %261 {offsets = [0, 256], sizes = [8, 256], strides = [1, 1]} : vector<8x1024xf32> to vector<8x256xf32>
    %269 = arith.negf %268 : vector<8x256xf32>
    %270 = math.exp %269 : vector<8x256xf32>
    %cst_111 = arith.constant 1.000000e+00 : f32
    %271 = vector.broadcast %cst_111 : f32 to vector<8x256xf32>
    %272 = arith.addf %271, %270 : vector<8x256xf32>
    %273 = arith.divf %271, %272 : vector<8x256xf32>
    %274 = vector.extract_strided_slice %261 {offsets = [0, 512], sizes = [8, 256], strides = [1, 1]} : vector<8x1024xf32> to vector<8x256xf32>
    %275 = math.tanh %274 : vector<8x256xf32>
    %276 = vector.extract_strided_slice %261 {offsets = [0, 768], sizes = [8, 256], strides = [1, 1]} : vector<8x1024xf32> to vector<8x256xf32>
    %277 = arith.negf %276 : vector<8x256xf32>
    %278 = math.exp %277 : vector<8x256xf32>
    %cst_112 = arith.constant 1.000000e+00 : f32
    %279 = vector.broadcast %cst_112 : f32 to vector<8x256xf32>
    %280 = arith.addf %279, %278 : vector<8x256xf32>
    %281 = arith.divf %279, %280 : vector<8x256xf32>
    %282 = arith.mulf %273, %255 : vector<8x256xf32>
    %283 = arith.mulf %267, %275 : vector<8x256xf32>
    %284 = arith.addf %282, %283 : vector<8x256xf32>
    %285 = math.tanh %284 : vector<8x256xf32>
    %286 = arith.mulf %281, %285 : vector<8x256xf32>
    %287 = vector.broadcast %c5_i32 : i32 to vector<8x256xi32>
    %288 = arith.cmpi sge, %287, %8 : vector<8x256xi32>
    %289 = vector.broadcast %c5_i32 : i32 to vector<8x256xi32>
    %290 = arith.cmpi slt, %289, %9 : vector<8x256xi32>
    %291 = arith.andi %288, %290 : vector<8x256xi1>
    %292 = arith.select %291, %286, %254 : vector<8x256xi1>, vector<8x256xf32>
    %c0_113 = arith.constant 0 : index
    %c0_114 = arith.constant 0 : index
    %293 = vector.load %arg10[%c0_113, %c0_114] : memref<8x256xf32, #tpu.memory_space<vmem>>, vector<8x256xf32>
    tpu.vector_store %arg10[%c0_113, %c0_114], %292 {strides = array<i32>} : memref<8x256xf32, #tpu.memory_space<vmem>>, vector<8x256xf32>,
    %294 = arith.select %291, %284, %255 : vector<8x256xi1>, vector<8x256xf32>
    %c0_115 = arith.constant 0 : index
    %c0_116 = arith.constant 0 : index
    %295 = vector.load %arg11[%c0_115, %c0_116] : memref<8x256xf32, #tpu.memory_space<vmem>>, vector<8x256xf32>
    tpu.vector_store %arg11[%c0_115, %c0_116], %294 {strides = array<i32>} : memref<8x256xf32, #tpu.memory_space<vmem>>, vector<8x256xf32>,
    %cst_117 = arith.constant 0.000000e+00 : f32
    %296 = vector.broadcast %cst_117 : f32 to vector<8x256xf32>
    %297 = arith.select %291, %286, %296 : vector<8x256xi1>, vector<8x256xf32>
    %298 = arith.index_cast %c5_i32 : i32 to index
    %c0_118 = arith.constant 0 : index
    %c0_119 = arith.constant 0 : index
    %299 = vector.load %arg7[%298, %c0_118, %c0_119] : memref<8x8x256xf32, #tpu.memory_space<vmem>>, vector<1x8x256xf32>
    %300 = vector.shape_cast %299 : vector<1x8x256xf32> to vector<8x256xf32>
    %301 = vector.shape_cast %297 : vector<8x256xf32> to vector<1x8x256xf32>
    tpu.vector_store %arg7[%298, %c0_118, %c0_119], %301 {strides = array<i32>} : memref<8x8x256xf32, #tpu.memory_space<vmem>>, vector<1x8x256xf32>,
    %c6_i32 = arith.constant 6 : i32
    %c0_120 = arith.constant 0 : index
    %c0_121 = arith.constant 0 : index
    %302 = vector.load %arg10[%c0_120, %c0_121] : memref<8x256xf32, #tpu.memory_space<vmem>>, vector<8x256xf32>
    %c0_122 = arith.constant 0 : index
    %c0_123 = arith.constant 0 : index
    %303 = vector.load %arg11[%c0_122, %c0_123] : memref<8x256xf32, #tpu.memory_space<vmem>>, vector<8x256xf32>
    %cst_124 = arith.constant dense<0.000000e+00> : vector<8x1024xf32>
    %304 = tpu.matmul %302, %7, %cst_124 {dimension_numbers = #tpu.dot_dimension_numbers<[1], [0], [0], [1], [0, 0, 1, 1], [], []>} : vector<8x256xf32>, vector<256x1024xf32>, vector<8x1024xf32> -> vector<8x1024xf32>
    %c8_i32_125 = arith.constant 8 : i32
    %305 = arith.muli %c6_i32, %c8_i32_125 : i32
    %306 = tpu.assume_multiple %305, 8 : i32
    %307 = arith.index_cast %306 : i32 to index
    %c0_126 = arith.constant 0 : index
    %308 = vector.load %arg9[%307, %c0_126] : memref<64x1024xf32, #tpu.memory_space<vmem>>, vector<8x1024xf32>
    %309 = arith.addf %308, %304 : vector<8x1024xf32>
    %310 = vector.extract_strided_slice %309 {offsets = [0, 0], sizes = [8, 256], strides = [1, 1]} : vector<8x1024xf32> to vector<8x256xf32>
    %311 = arith.negf %310 : vector<8x256xf32>
    %312 = math.exp %311 : vector<8x256xf32>
    %cst_127 = arith.constant 1.000000e+00 : f32
    %313 = vector.broadcast %cst_127 : f32 to vector<8x256xf32>
    %314 = arith.addf %313, %312 : vector<8x256xf32>
    %315 = arith.divf %313, %314 : vector<8x256xf32>
    %316 = vector.extract_strided_slice %309 {offsets = [0, 256], sizes = [8, 256], strides = [1, 1]} : vector<8x1024xf32> to vector<8x256xf32>
    %317 = arith.negf %316 : vector<8x256xf32>
    %318 = math.exp %317 : vector<8x256xf32>
    %cst_128 = arith.constant 1.000000e+00 : f32
    %319 = vector.broadcast %cst_128 : f32 to vector<8x256xf32>
    %320 = arith.addf %319, %318 : vector<8x256xf32>
    %321 = arith.divf %319, %320 : vector<8x256xf32>
    %322 = vector.extract_strided_slice %309 {offsets = [0, 512], sizes = [8, 256], strides = [1, 1]} : vector<8x1024xf32> to vector<8x256xf32>
    %323 = math.tanh %322 : vector<8x256xf32>
    %324 = vector.extract_strided_slice %309 {offsets = [0, 768], sizes = [8, 256], strides = [1, 1]} : vector<8x1024xf32> to vector<8x256xf32>
    %325 = arith.negf %324 : vector<8x256xf32>
    %326 = math.exp %325 : vector<8x256xf32>
    %cst_129 = arith.constant 1.000000e+00 : f32
    %327 = vector.broadcast %cst_129 : f32 to vector<8x256xf32>
    %328 = arith.addf %327, %326 : vector<8x256xf32>
    %329 = arith.divf %327, %328 : vector<8x256xf32>
    %330 = arith.mulf %321, %303 : vector<8x256xf32>
    %331 = arith.mulf %315, %323 : vector<8x256xf32>
    %332 = arith.addf %330, %331 : vector<8x256xf32>
    %333 = math.tanh %332 : vector<8x256xf32>
    %334 = arith.mulf %329, %333 : vector<8x256xf32>
    %335 = vector.broadcast %c6_i32 : i32 to vector<8x256xi32>
    %336 = arith.cmpi sge, %335, %8 : vector<8x256xi32>
    %337 = vector.broadcast %c6_i32 : i32 to vector<8x256xi32>
    %338 = arith.cmpi slt, %337, %9 : vector<8x256xi32>
    %339 = arith.andi %336, %338 : vector<8x256xi1>
    %340 = arith.select %339, %334, %302 : vector<8x256xi1>, vector<8x256xf32>
    %c0_130 = arith.constant 0 : index
    %c0_131 = arith.constant 0 : index
    %341 = vector.load %arg10[%c0_130, %c0_131] : memref<8x256xf32, #tpu.memory_space<vmem>>, vector<8x256xf32>
    tpu.vector_store %arg10[%c0_130, %c0_131], %340 {strides = array<i32>} : memref<8x256xf32, #tpu.memory_space<vmem>>, vector<8x256xf32>,
    %342 = arith.select %339, %332, %303 : vector<8x256xi1>, vector<8x256xf32>
    %c0_132 = arith.constant 0 : index
    %c0_133 = arith.constant 0 : index
    %343 = vector.load %arg11[%c0_132, %c0_133] : memref<8x256xf32, #tpu.memory_space<vmem>>, vector<8x256xf32>
    tpu.vector_store %arg11[%c0_132, %c0_133], %342 {strides = array<i32>} : memref<8x256xf32, #tpu.memory_space<vmem>>, vector<8x256xf32>,
    %cst_134 = arith.constant 0.000000e+00 : f32
    %344 = vector.broadcast %cst_134 : f32 to vector<8x256xf32>
    %345 = arith.select %339, %334, %344 : vector<8x256xi1>, vector<8x256xf32>
    %346 = arith.index_cast %c6_i32 : i32 to index
    %c0_135 = arith.constant 0 : index
    %c0_136 = arith.constant 0 : index
    %347 = vector.load %arg7[%346, %c0_135, %c0_136] : memref<8x8x256xf32, #tpu.memory_space<vmem>>, vector<1x8x256xf32>
    %348 = vector.shape_cast %347 : vector<1x8x256xf32> to vector<8x256xf32>
    %349 = vector.shape_cast %345 : vector<8x256xf32> to vector<1x8x256xf32>
    tpu.vector_store %arg7[%346, %c0_135, %c0_136], %349 {strides = array<i32>} : memref<8x8x256xf32, #tpu.memory_space<vmem>>, vector<1x8x256xf32>,
    %c7_i32 = arith.constant 7 : i32
    %c0_137 = arith.constant 0 : index
    %c0_138 = arith.constant 0 : index
    %350 = vector.load %arg10[%c0_137, %c0_138] : memref<8x256xf32, #tpu.memory_space<vmem>>, vector<8x256xf32>
    %c0_139 = arith.constant 0 : index
    %c0_140 = arith.constant 0 : index
    %351 = vector.load %arg11[%c0_139, %c0_140] : memref<8x256xf32, #tpu.memory_space<vmem>>, vector<8x256xf32>
    %cst_141 = arith.constant dense<0.000000e+00> : vector<8x1024xf32>
    %352 = tpu.matmul %350, %7, %cst_141 {dimension_numbers = #tpu.dot_dimension_numbers<[1], [0], [0], [1], [0, 0, 1, 1], [], []>} : vector<8x256xf32>, vector<256x1024xf32>, vector<8x1024xf32> -> vector<8x1024xf32>
    %c8_i32_142 = arith.constant 8 : i32
    %353 = arith.muli %c7_i32, %c8_i32_142 : i32
    %354 = tpu.assume_multiple %353, 8 : i32
    %355 = arith.index_cast %354 : i32 to index
    %c0_143 = arith.constant 0 : index
    %356 = vector.load %arg9[%355, %c0_143] : memref<64x1024xf32, #tpu.memory_space<vmem>>, vector<8x1024xf32>
    %357 = arith.addf %356, %352 : vector<8x1024xf32>
    %358 = vector.extract_strided_slice %357 {offsets = [0, 0], sizes = [8, 256], strides = [1, 1]} : vector<8x1024xf32> to vector<8x256xf32>
    %359 = arith.negf %358 : vector<8x256xf32>
    %360 = math.exp %359 : vector<8x256xf32>
    %cst_144 = arith.constant 1.000000e+00 : f32
    %361 = vector.broadcast %cst_144 : f32 to vector<8x256xf32>
    %362 = arith.addf %361, %360 : vector<8x256xf32>
    %363 = arith.divf %361, %362 : vector<8x256xf32>
    %364 = vector.extract_strided_slice %357 {offsets = [0, 256], sizes = [8, 256], strides = [1, 1]} : vector<8x1024xf32> to vector<8x256xf32>
    %365 = arith.negf %364 : vector<8x256xf32>
    %366 = math.exp %365 : vector<8x256xf32>
    %cst_145 = arith.constant 1.000000e+00 : f32
    %367 = vector.broadcast %cst_145 : f32 to vector<8x256xf32>
    %368 = arith.addf %367, %366 : vector<8x256xf32>
    %369 = arith.divf %367, %368 : vector<8x256xf32>
    %370 = vector.extract_strided_slice %357 {offsets = [0, 512], sizes = [8, 256], strides = [1, 1]} : vector<8x1024xf32> to vector<8x256xf32>
    %371 = math.tanh %370 : vector<8x256xf32>
    %372 = vector.extract_strided_slice %357 {offsets = [0, 768], sizes = [8, 256], strides = [1, 1]} : vector<8x1024xf32> to vector<8x256xf32>
    %373 = arith.negf %372 : vector<8x256xf32>
    %374 = math.exp %373 : vector<8x256xf32>
    %cst_146 = arith.constant 1.000000e+00 : f32
    %375 = vector.broadcast %cst_146 : f32 to vector<8x256xf32>
    %376 = arith.addf %375, %374 : vector<8x256xf32>
    %377 = arith.divf %375, %376 : vector<8x256xf32>
    %378 = arith.mulf %369, %351 : vector<8x256xf32>
    %379 = arith.mulf %363, %371 : vector<8x256xf32>
    %380 = arith.addf %378, %379 : vector<8x256xf32>
    %381 = math.tanh %380 : vector<8x256xf32>
    %382 = arith.mulf %377, %381 : vector<8x256xf32>
    %383 = vector.broadcast %c7_i32 : i32 to vector<8x256xi32>
    %384 = arith.cmpi sge, %383, %8 : vector<8x256xi32>
    %385 = vector.broadcast %c7_i32 : i32 to vector<8x256xi32>
    %386 = arith.cmpi slt, %385, %9 : vector<8x256xi32>
    %387 = arith.andi %384, %386 : vector<8x256xi1>
    %388 = arith.select %387, %382, %350 : vector<8x256xi1>, vector<8x256xf32>
    %c0_147 = arith.constant 0 : index
    %c0_148 = arith.constant 0 : index
    %389 = vector.load %arg10[%c0_147, %c0_148] : memref<8x256xf32, #tpu.memory_space<vmem>>, vector<8x256xf32>
    tpu.vector_store %arg10[%c0_147, %c0_148], %388 {strides = array<i32>} : memref<8x256xf32, #tpu.memory_space<vmem>>, vector<8x256xf32>,
    %390 = arith.select %387, %380, %351 : vector<8x256xi1>, vector<8x256xf32>
    %c0_149 = arith.constant 0 : index
    %c0_150 = arith.constant 0 : index
    %391 = vector.load %arg11[%c0_149, %c0_150] : memref<8x256xf32, #tpu.memory_space<vmem>>, vector<8x256xf32>
    tpu.vector_store %arg11[%c0_149, %c0_150], %390 {strides = array<i32>} : memref<8x256xf32, #tpu.memory_space<vmem>>, vector<8x256xf32>,
    %cst_151 = arith.constant 0.000000e+00 : f32
    %392 = vector.broadcast %cst_151 : f32 to vector<8x256xf32>
    %393 = arith.select %387, %382, %392 : vector<8x256xi1>, vector<8x256xf32>
    %394 = arith.index_cast %c7_i32 : i32 to index
    %c0_152 = arith.constant 0 : index
    %c0_153 = arith.constant 0 : index
    %395 = vector.load %arg7[%394, %c0_152, %c0_153] : memref<8x8x256xf32, #tpu.memory_space<vmem>>, vector<1x8x256xf32>
    %396 = vector.shape_cast %395 : vector<1x8x256xf32> to vector<8x256xf32>
    %397 = vector.shape_cast %393 : vector<8x256xf32> to vector<1x8x256xf32>
    tpu.vector_store %arg7[%394, %c0_152, %c0_153], %397 {strides = array<i32>} : memref<8x8x256xf32, #tpu.memory_space<vmem>>, vector<1x8x256xf32>,
    %c8_i32_154 = arith.constant 8 : i32
    %c0_155 = arith.constant 0 : index
    %c0_156 = arith.constant 0 : index
    %398 = vector.load %arg10[%c0_155, %c0_156] : memref<8x256xf32, #tpu.memory_space<vmem>>, vector<8x256xf32>
    %c0_157 = arith.constant 0 : index
    %c0_158 = arith.constant 0 : index
    %399 = vector.load %arg8[%c0_157, %c0_158] : memref<8x256xf32, #tpu.memory_space<vmem>>, vector<8x256xf32>
    tpu.vector_store %arg8[%c0_157, %c0_158], %398 {strides = array<i32>} : memref<8x256xf32, #tpu.memory_space<vmem>>, vector<8x256xf32>,
    return
  }
  func.func @transform_0(%arg0: i32) -> (i32, i32) {
    %c0_i32 = arith.constant 0 : i32
    %c0_i32_0 = arith.constant 0 : i32
    %c0_i32_1 = arith.constant 0 : i32
    return %c0_i32, %c0_i32_0 : i32, i32
  }
  func.func @transform_1(%arg0: i32) -> (i32, i32) {
    %c0_i32 = arith.constant 0 : i32
    %c0_i32_0 = arith.constant 0 : i32
    %c0_i32_1 = arith.constant 0 : i32
    return %c0_i32, %c0_i32_0 : i32, i32
  }
  func.func @transform_2(%arg0: i32) -> (i32, i32) {
    %c0_i32 = arith.constant 0 : i32
    %c0_i32_0 = arith.constant 0 : i32
    %c0_i32_1 = arith.constant 0 : i32
    return %c0_i32, %c0_i32_0 : i32, i32
  }
  func.func @transform_3(%arg0: i32) -> (i32, i32) {
    %c0_i32 = arith.constant 0 : i32
    %c0_i32_0 = arith.constant 0 : i32
    %c0_i32_1 = arith.constant 0 : i32
    return %c0_i32, %c0_i32_0 : i32, i32
  }
  func.func @transform_4(%arg0: i32) -> (i32, i32) {
    %c0_i32 = arith.constant 0 : i32
    %c0_i32_0 = arith.constant 0 : i32
    %c0_i32_1 = arith.constant 0 : i32
    return %c0_i32, %c0_i32_0 : i32, i32
  }
  func.func @transform_5(%arg0: i32) -> (i32, i32) {
    %c0_i32 = arith.constant 0 : i32
    %c0_i32_0 = arith.constant 0 : i32
    %c0_i32_1 = arith.constant 0 : i32
    return %c0_i32, %c0_i32_0 : i32, i32
  }
  func.func @transform_6(%arg0: i32) -> (i32, i32, i32) {
    %c0_i32 = arith.constant 0 : i32
    %c0_i32_0 = arith.constant 0 : i32
    %c0_i32_1 = arith.constant 0 : i32
    %c0_i32_2 = arith.constant 0 : i32
    return %c0_i32, %c0_i32_0, %c0_i32_1 : i32, i32, i32
  }
  func.func @transform_7(%arg0: i32) -> (i32, i32) {
    %c0_i32 = arith.constant 0 : i32
    %c0_i32_0 = arith.constant 0 : i32
    %c0_i32_1 = arith.constant 0 : i32
    return %c0_i32, %c0_i32_0 : i32, i32
  }
}

</mosaic_0001>

<bundles_post_ra>
// kernel: pack_lstm_forward.1
= control target key start
LH: loop header
LB: loop body
LE: loop exit
PB: predicated region body
PF: predicated region fallthrough
CT: control target
= control target key end

     0   :  { %v9540_v3 = vmov 0.0   ;;  %vm139_vm0 = vcmask 523264   ;;  %s9532_s1 = inlined_call_operand.vmem [shape: f32[64,1024], index: 1, kind: input, shape index: {}]   ;;  %s9533_s0 = inlined_call_operand.vmem [shape: f32[64,64], index: 0, kind: input, shape index: {}]   ;;  %s9534_s2 = inlined_call_operand.vmem [shape: f32[256,1024], index: 2, kind: input, shape index: {}]   ;;  %s9535_s3 = inlined_call_operand.vmem [shape: f32[1,1024], index: 3, kind: input, shape index: {}]   ;;  %s9536_s4 = inlined_call_operand.vmem [shape: s32[8,256], index: 4, kind: input, shape index: {}]   ;;  %s9537_s5 = inlined_call_operand.vmem [shape: s32[8,256], index: 5, kind: input, shape index: {}]   ;;  %s9538_s6 = inlined_call_operand.vmem [shape: f32[8,8,256], index: 6, kind: output, shape index: {0}]   ;;  %s9539_s7 = inlined_call_operand.vmem [shape: f32[8,256], index: 7, kind: output, shape index: {1}]  }
   0x1   :  { %v34_v0 = vld [vmem:[%s9532_s1 + $0x8] sm:$0xff]  ;;  %v36_v2 = vld [vmem:[%s9532_s1 + $0x18] sm:$0xff]  ;;  %228 = vmatprep.mubr.f32.mxu0 %v9540_v3  ;;  %341 = vmatprep.mubr.f32.mxu1 %v9540_v3  ;;  %v33_v6 = vld [vmem:[%s9532_s1] sm:$0xff] }
   0x2   :  { %v42_v1 = vld [vmem:[%s9532_s1 + $0x48] sm:$0xff]  ;;  %v44_v5 = vld [vmem:[%s9532_s1 + $0x58] sm:$0xff]  ;;  %v41_v7 = vld [vmem:[%s9532_s1 + $0x40] sm:$0xff] }
   0x3   :  { %v4056_v4 = vpack.c.bf16 %v42_v1, %v34_v0  ;;  %v4072_v8 = vpack.c.bf16 %v44_v5, %v36_v2  ;;  %v4058_v9 = vpack.c.bf16 %v41_v7, %v33_v6  ;;  %v35_v10 = vld [vmem:[%s9532_s1 + $0x10] sm:$0xff]  ;;  %v50_v12 = vld [vmem:[%s9532_s1 + $0x88] sm:$0xff]  ;;  %v52_v15 = vld [vmem:[%s9532_s1 + $0x98] sm:$0xff] }
   0x4   :  { %v43_v11 = vld [vmem:[%s9532_s1 + $0x50] sm:$0xff]  ;;  %v58_v14 = vld [vmem:[%s9532_s1 + $0xc8] sm:$0xff]  ;;  %v60_v16 = vld [vmem:[%s9532_s1 + $0xd8] sm:$0xff] }
   0x5   :  { %4057 = vmatprep.subr.bf16.mxu0 %v4056_v4  ;;  %v4074_v13 = vpack.c.bf16 %v43_v11, %v35_v10  ;;  %4073 = vmatprep.subr.bf16.mxu1 %v4072_v8  ;;  %v4060_v17 = vpack.c.bf16 %v58_v14, %v50_v12  ;;  %v4076_v18 = vpack.c.bf16 %v60_v16, %v52_v15  ;;  %v49_v19 = vld [vmem:[%s9532_s1 + $0x80] sm:$0xff]  ;;  %v51_v21 = vld [vmem:[%s9532_s1 + $0x90] sm:$0xff]  ;;  %v66_v24 = vld [vmem:[%s9532_s1 + $0x108] sm:$0xff] }
   0x6   :  { %4059 = vmatpush1.bf16.msra.mxu0 %v4058_v9  ;;  %v57_v20 = vld [vmem:[%s9532_s1 + $0xc0] sm:$0xff]  ;;  %v59_v23 = vld [vmem:[%s9532_s1 + $0xd0] sm:$0xff]  ;;  %v74_v25 = vld [vmem:[%s9532_s1 + $0x148] sm:$0xff] }
   0x7   :  { %4075 = vmatpush1.bf16.msra.mxu1 %v4074_v13  ;;  %v4062_v22 = vpack.c.bf16 %v57_v20, %v49_v19  ;;  %4061 = vmatprep.subr.bf16.mxu0 %v4060_v17  ;;  %v4078_v26 = vpack.c.bf16 %v59_v23, %v51_v21  ;;  %v4064_v27 = vpack.c.bf16 %v74_v25, %v66_v24  ;;  %v68_v28 = vld [vmem:[%s9532_s1 + $0x118] sm:$0xff]  ;;  %v65_v30 = vld [vmem:[%s9532_s1 + $0x100] sm:$0xff]  ;;  %v67_v33 = vld [vmem:[%s9532_s1 + $0x110] sm:$0xff] }
   0x8   :  { %4077 = vmatprep.subr.bf16.mxu1 %v4076_v18  ;;  %v76_v29 = vld [vmem:[%s9532_s1 + $0x158] sm:$0xff]  ;;  %v73_v32 = vld [vmem:[%s9532_s1 + $0x140] sm:$0xff]  ;;  %v75_v34 = vld [vmem:[%s9532_s1 + $0x150] sm:$0xff] }
   0x9   :  { %v4080_v31 = vpack.c.bf16 %v76_v29, %v68_v28  ;;  %v4066_v35 = vpack.c.bf16 %v73_v32, %v65_v30  ;;  %v82_v36 = vld [vmem:[%s9532_s1 + $0x188] sm:$0xff]  ;;  %v84_v38 = vld [vmem:[%s9532_s1 + $0x198] sm:$0xff]  ;;  %v4082_v39 = vpack.c.bf16 %v75_v34, %v67_v33  ;;  %v81_v42 = vld [vmem:[%s9532_s1 + $0x180] sm:$0xff] }
   0xa   :  { %4063 = vmatpush1.bf16.msra.mxu0 %v4062_v22  ;;  %v90_v37 = vld [vmem:[%s9532_s1 + $0x1c8] sm:$0xff]  ;;  %v92_v41 = vld [vmem:[%s9532_s1 + $0x1d8] sm:$0xff]  ;;  %v89_v43 = vld [vmem:[%s9532_s1 + $0x1c0] sm:$0xff] }
   0xb   :  { %4079 = vmatpush1.bf16.msra.mxu1 %v4078_v26  ;;  %4065 = vmatprep.subr.bf16.mxu0 %v4064_v27  ;;  %v4068_v40 = vpack.c.bf16 %v90_v37, %v82_v36  ;;  %v4084_v44 = vpack.c.bf16 %v92_v41, %v84_v38  ;;  %v83_v45 = vld [vmem:[%s9532_s1 + $0x190] sm:$0xff]  ;;  %v38_v47 = vld [vmem:[%s9532_s1 + $0x28] sm:$0xff]  ;;  %v40_v49 = vld [vmem:[%s9532_s1 + $0x38] sm:$0xff]  ;;  %v4070_v50 = vpack.c.bf16 %v89_v43, %v81_v42 }
   0xc   :  { %4081 = vmatprep.subr.bf16.mxu1 %v4080_v31  ;;  %v91_v46 = vld [vmem:[%s9532_s1 + $0x1d0] sm:$0xff]  ;;  %v46_v48 = vld [vmem:[%s9532_s1 + $0x68] sm:$0xff]  ;;  %v48_v51 = vld [vmem:[%s9532_s1 + $0x78] sm:$0xff] }
   0xd   :  { %v4086_v52 = vpack.c.bf16 %v91_v46, %v83_v45  ;;  %v4088_v53 = vpack.c.bf16 %v46_v48, %v38_v47  ;;  %v37_v54 = vld [vmem:[%s9532_s1 + $0x20] sm:$0xff]  ;;  %v4104_v56 = vpack.c.bf16 %v48_v51, %v40_v49  ;;  %v39_v57 = vld [vmem:[%s9532_s1 + $0x30] sm:$0xff]  ;;  %v54_v59 = vld [vmem:[%s9532_s1 + $0xa8] sm:$0xff] }
   0xe   :  { %4067 = vmatpush1.bf16.msra.mxu0 %v4066_v35  ;;  %v45_v55 = vld [vmem:[%s9532_s1 + $0x60] sm:$0xff]  ;;  %v47_v58 = vld [vmem:[%s9532_s1 + $0x70] sm:$0xff]  ;;  %v62_v60 = vld [vmem:[%s9532_s1 + $0xe8] sm:$0xff] }
   0xf   :  { %4083 = vmatpush1.bf16.msra.mxu1 %v4082_v39  ;;  %4069 = vmatprep.subr.bf16.mxu0 %v4068_v40  ;;  %v6733_v61 = vld [vmem:[%s9533_s0] sm:$0xff]  ;;  %v4090_v62 = vpack.c.bf16 %v45_v55, %v37_v54  ;;  %v56_v63 = vld [vmem:[%s9532_s1 + $0xb8] sm:$0xff]  ;;  %v4106_v1 = vpack.c.bf16 %v47_v58, %v39_v57  ;;  %v4092_v2 = vpack.c.bf16 %v62_v60, %v54_v59  ;;  %v55_v6 = vld [vmem:[%s9532_s1 + $0xb0] sm:$0xff] }
  0x10   :  { %4085 = vmatprep.subr.bf16.mxu1 %v4084_v44  ;;  %v64_v0 = vld [vmem:[%s9532_s1 + $0xf8] sm:$0xff]  ;;  %v53_v4 = vld [vmem:[%s9532_s1 + $0xa0] sm:$0xff]  ;;  %v63_v8 = vld [vmem:[%s9532_s1 + $0xf0] sm:$0xff] }
  0x11   :  { %v61_v5 = vld [vmem:[%s9532_s1 + $0xe0] sm:$0xff]  ;;  %v4108_v7 = vpack.c.bf16 %v64_v0, %v56_v63  ;;  %v70_v9 = vld [vmem:[%s9532_s1 + $0x128] sm:$0xff]  ;;  %v72_v12 = vld [vmem:[%s9532_s1 + $0x138] sm:$0xff]  ;;  %v4110_v15 = vpack.c.bf16 %v63_v8, %v55_v6 }
  0x12   :  { %4071 = vmatpush1.bf16.msra.mxu0 %v4070_v50  ;;  %v78_v10 = vld [vmem:[%s9532_s1 + $0x168] sm:$0xff]  ;;  %v80_v13 = vld [vmem:[%s9532_s1 + $0x178] sm:$0xff]  ;;  %v4094_v14 = vpack.c.bf16 %v61_v5, %v53_v4  ;;  %v69_v17 = vld [vmem:[%s9532_s1 + $0x120] sm:$0xff] }
  0x13   :  { %4087 = vmatpush1.bf16.msra.mxu1 %v4086_v52  ;;  %4089 = vmatprep.subr.bf16.mxu0 %v4088_v53  ;;  %v6766_v11 = vld [vmem:[%s9533_s0 + $0x8] sm:$0xff]  ;;  %v4096_v16 = vpack.c.bf16 %v78_v10, %v70_v9  ;;  %v77_v18 = vld [vmem:[%s9532_s1 + $0x160] sm:$0xff]  ;;  %v71_v19 = vld [vmem:[%s9532_s1 + $0x130] sm:$0xff]  ;;  %v4112_v20 = vpack.c.bf16 %v80_v13, %v72_v12 }
  0x14   :  { %4105 = vmatprep.subr.bf16.mxu1 %v4104_v56  ;;  %v79_v21 = vld [vmem:[%s9532_s1 + $0x170] sm:$0xff]  ;;  %v86_v22 = vld [vmem:[%s9532_s1 + $0x1a8] sm:$0xff]  ;;  %v88_v25 = vld [vmem:[%s9532_s1 + $0x1b8] sm:$0xff]  ;;  %v4098_v27 = vpack.c.bf16 %v77_v18, %v69_v17 }
  0x15   :  { %3954 = vmatmul.mubr.msk.f32.vlgmr.msra.gmra.mrb[0].mxu0 %vm139_vm0, %v6733_v61  ;;  %v94_v23 = vld [vmem:[%s9532_s1 + $0x1e8] sm:$0xff]  ;;  %v6802_v24 = vld [vmem:[%s9533_s0 + $0x10] sm:$0xff]  ;;  %v96_v26 = vld [vmem:[%s9532_s1 + $0x1f8] sm:$0xff]  ;;  %v4114_v28 = vpack.c.bf16 %v79_v21, %v71_v19 }
  0x16   :  { %3962 = vmatmul.mubr.msk.f32.vlgmr.msra.gmra.mrb[0].mxu1 %vm139_vm0, %v6733_v61  ;;  %4091 = vmatpush1.bf16.msra.mxu0 %v4090_v62  ;;  %v4100_v29 = vpack.c.bf16 %v94_v23, %v86_v22  ;;  %v85_v30 = vld [vmem:[%s9532_s1 + $0x1a0] sm:$0xff]  ;;  %v87_v32 = vld [vmem:[%s9532_s1 + $0x1b0] sm:$0xff]  ;;  %v4116_v33 = vpack.c.bf16 %v96_v26, %v88_v25  ;;  %v681_v35 = vld [vmem:[%s9534_s2 + $0x8] sm:$0xff] }
  0x17   :  { %4107 = vmatpush1.bf16.msra.mxu1 %v4106_v1  ;;  %234 = vmatprep.mubr.f32.mxu0 %v9540_v3  ;;  %v93_v31 = vld [vmem:[%s9532_s1 + $0x1e0] sm:$0xff]  ;;  %v95_v34 = vld [vmem:[%s9532_s1 + $0x1f0] sm:$0xff]  ;;  %v689_v36 = vld [vmem:[%s9534_s2 + $0x48] sm:$0xff] }
  0x18   :  { %347 = vmatprep.mubr.f32.mxu1 %v9540_v3  ;;  %4093 = vmatprep.subr.bf16.mxu0 %v4092_v2  ;;  %v6837_v37 = vld [vmem:[%s9533_s0 + $0x18] sm:$0xff]  ;;  %v4102_v40 = vpack.c.bf16 %v93_v31, %v85_v30  ;;  %v4118_v41 = vpack.c.bf16 %v95_v34, %v87_v32  ;;  %v6846_v42 = vpack.c.bf16 %v689_v36, %v681_v35  ;;  %v6858_v44 = vld [vmem:[%s9533_s0 + $0x20] sm:$0xff]  ;;  %v6871_v45 = vld [vmem:[%s9533_s0 + $0x28] sm:$0xff] }
  0x19   :  { %3955 = vmatmul.mubr.msk.f32.gmra.mrb[2].mxu0 %vm139_vm0, %v6766_v11  ;;  %4109 = vmatprep.subr.bf16.mxu1 %v4108_v7  ;;  %v683_v38 = vld [vmem:[%s9534_s2 + $0x18] sm:$0xff]  ;;  %v6882_v46 = vld [vmem:[%s9533_s0 + $0x30] sm:$0xff]  ;;  %v680_v48 = vld [vmem:[%s9534_s2] sm:$0xff] }
  0x1a   :  { %3963 = vmatmul.mubr.msk.f32.gmra.mrb[2].mxu1 %vm139_vm0, %v6766_v11  ;;  %240 = vmatprep.mubr.f32.mxu0 %v9540_v3  ;;  %v691_v39 = vld [vmem:[%s9534_s2 + $0x58] sm:$0xff]  ;;  %9836 = vst [vmem:[#allocation5_spill] sm:$0xff] %v6846_v42  ;;  %v688_v49 = vld [vmem:[%s9534_s2 + $0x40] sm:$0xff]  ;;  %v682_v50 = vld [vmem:[%s9534_s2 + $0x10] sm:$0xff] }
  0x1b   :  { %353 = vmatprep.mubr.f32.mxu1 %v9540_v3  ;;  %4095 = vmatpush1.bf16.msra.mxu0 %v4094_v14  ;;  %v6850_v43 = vpack.c.bf16 %v691_v39, %v683_v38  ;;  %v6893_v47 = vld [vmem:[%s9533_s0 + $0x38] sm:$0xff]  ;;  %v690_v51 = vld [vmem:[%s9534_s2 + $0x50] sm:$0xff]  ;;  %v697_v52 = vld [vmem:[%s9534_s2 + $0x88] sm:$0xff]  ;;  %v6925_v56 = vpack.c.bf16 %v688_v49, %v680_v48 }
  0x1c   :  { %4111 = vmatpush1.bf16.msra.mxu1 %v4110_v15  ;;  %4097 = vmatprep.subr.bf16.mxu0 %v4096_v16  ;;  %v705_v53 = vld [vmem:[%s9534_s2 + $0xc8] sm:$0xff]  ;;  %v699_v54 = vld [vmem:[%s9534_s2 + $0x98] sm:$0xff]  ;;  %v6928_v57 = vpack.c.bf16 %v690_v51, %v682_v50  ;;  %v696_v59 = vld [vmem:[%s9534_s2 + $0x80] sm:$0xff] }
  0x1d   :  { %3956 = vmatmul.mubr.msk.f32.gmra.mrb[4].mxu0 %vm139_vm0, %v6802_v24  ;;  %4113 = vmatprep.subr.bf16.mxu1 %v4112_v20  ;;  %9837 = vst [vmem:[#allocation6_spill] sm:$0xff] %v6850_v43  ;;  %v707_v55 = vld [vmem:[%s9534_s2 + $0xd8] sm:$0xff]  ;;  %9838 = vst [vmem:[#allocation7_spill] sm:$0xff] %v6925_v56  ;;  %v6930_v58 = vpack.c.bf16 %v705_v53, %v697_v52  ;;  %v704_v60 = vld [vmem:[%s9534_s2 + $0xc0] sm:$0xff] }
  0x1e   :  { %3964 = vmatmul.mubr.msk.f32.gmra.mrb[4].mxu1 %vm139_vm0, %v6802_v24  ;;  %246 = vmatprep.mubr.f32.mxu0 %v9540_v3  ;;  %9839 = vst [vmem:[#allocation8_spill] sm:$0xff] %v6928_v57  ;;  %v698_v62 = vld [vmem:[%s9534_s2 + $0x90] sm:$0xff]  ;;  %v6941_v63 = vpack.c.bf16 %v707_v55, %v699_v54  ;;  %v713_v1 = vld [vmem:[%s9534_s2 + $0x108] sm:$0xff]  ;;  %v715_v4 = vld [vmem:[%s9534_s2 + $0x118] sm:$0xff]  ;;  %v6963_v6 = vpack.c.bf16 %v704_v60, %v696_v59 }
  0x1f   :  { %359 = vmatprep.mubr.f32.mxu1 %v9540_v3  ;;  %4099 = vmatpush1.bf16.msra.mxu0 %v4098_v27  ;;  %9840 = vst [vmem:[#allocation9_spill] sm:$0xff] %v6930_v58  ;;  %v706_v0 = vld [vmem:[%s9534_s2 + $0xd0] sm:$0xff]  ;;  %v721_v2 = vld [vmem:[%s9534_s2 + $0x148] sm:$0xff]  ;;  %v723_v5 = vld [vmem:[%s9534_s2 + $0x158] sm:$0xff] }
  0x20   :  { %4115 = vmatpush1.bf16.msra.mxu1 %v4114_v28  ;;  %4101 = vmatprep.subr.bf16.mxu0 %v4100_v29  ;;  %9841 = vst [vmem:[#allocation10_spill] sm:$0xff] %v6941_v63  ;;  %9842 = vst [vmem:[#allocation11_spill] sm:$0xff] %v6963_v6  ;;  %v6967_v7 = vpack.c.bf16 %v706_v0, %v698_v62  ;;  %v6969_v8 = vpack.c.bf16 %v721_v2, %v713_v1  ;;  %v712_v9 = vld [vmem:[%s9534_s2 + $0x100] sm:$0xff]  ;;  %v714_v10 = vld [vmem:[%s9534_s2 + $0x110] sm:$0xff] }
  0x21   :  { %3957 = vmatmul.mubr.msk.f32.gmra.mrb[6].mxu0 %vm139_vm0, %v6837_v37  ;;  %4117 = vmatprep.subr.bf16.mxu1 %v4116_v33  ;;  %v6981_v12 = vpack.c.bf16 %v723_v5, %v715_v4  ;;  %v722_v13 = vld [vmem:[%s9534_s2 + $0x150] sm:$0xff]  ;;  %v729_v14 = vld [vmem:[%s9534_s2 + $0x188] sm:$0xff]  ;;  %v731_v16 = vld [vmem:[%s9534_s2 + $0x198] sm:$0xff] }
  0x22   :  { %3965 = vmatmul.mubr.msk.f32.gmra.mrb[6].mxu1 %vm139_vm0, %v6837_v37  ;;  %252 = vmatprep.mubr.f32.mxu0 %v9540_v3  ;;  %9843 = vst [vmem:[#allocation12_spill] sm:$0xff] %v6967_v7  ;;  %9844 = vst [vmem:[#allocation13_spill] sm:$0xff] %v6969_v8  ;;  %v737_v15 = vld [vmem:[%s9534_s2 + $0x1c8] sm:$0xff]  ;;  %v739_v17 = vld [vmem:[%s9534_s2 + $0x1d8] sm:$0xff]  ;;  %v7009_v19 = vpack.c.bf16 %v722_v13, %v714_v10 }
  0x23   :  { %365 = vmatprep.mubr.f32.mxu1 %v9540_v3  ;;  %4103 = vmatpush1.bf16.msra.mxu0 %v4102_v40  ;;  %9845 = vst [vmem:[#allocation14_spill] sm:$0xff] %v6981_v12  ;;  %v7011_v20 = vpack.c.bf16 %v737_v15, %v729_v14  ;;  %v728_v21 = vld [vmem:[%s9534_s2 + $0x180] sm:$0xff]  ;;  %v7023_v23 = vpack.c.bf16 %v739_v17, %v731_v16  ;;  %v738_v25 = vld [vmem:[%s9534_s2 + $0x1d0] sm:$0xff]  ;;  %v745_v26 = vld [vmem:[%s9534_s2 + $0x208] sm:$0xff] }
  0x24   :  { %4119 = vmatpush1.bf16.msra.mxu1 %v4118_v41  ;;  %4121 = vmatprep.subr.bf16.mxu0 %v6846_v42  ;;  %9847 = vst [vmem:[#allocation16_spill] sm:$0xff] %v7009_v19  ;;  %v736_v22 = vld [vmem:[%s9534_s2 + $0x1c0] sm:$0xff]  ;;  %v753_v27 = vld [vmem:[%s9534_s2 + $0x248] sm:$0xff]  ;;  %v747_v28 = vld [vmem:[%s9534_s2 + $0x218] sm:$0xff] }
  0x25   :  { %3958 = vmatmul.mubr.msk.f32.gmra.mrb[8].mxu0 %vm139_vm0, %v6858_v44  ;;  %4185 = vmatprep.subr.bf16.mxu1 %v6850_v43  ;;  %9848 = vst [vmem:[#allocation17_spill] sm:$0xff] %v7011_v20  ;;  %9849 = vst [vmem:[#allocation18_spill] sm:$0xff] %v7023_v23  ;;  %v755_v29 = vld [vmem:[%s9534_s2 + $0x258] sm:$0xff]  ;;  %v7045_v30 = vpack.c.bf16 %v736_v22, %v728_v21  ;;  %v7053_v32 = vpack.c.bf16 %v753_v27, %v745_v26  ;;  %v744_v33 = vld [vmem:[%s9534_s2 + $0x200] sm:$0xff] }
  0x26   :  { %3966 = vmatmul.mubr.msk.f32.gmra.mrb[8].mxu1 %vm139_vm0, %v6858_v44  ;;  %258 = vmatprep.mubr.f32.mxu0 %v9540_v3  ;;  %v752_v34 = vld [vmem:[%s9534_s2 + $0x240] sm:$0xff]  ;;  %v7065_v35 = vpack.c.bf16 %v755_v29, %v747_v28  ;;  %v754_v36 = vld [vmem:[%s9534_s2 + $0x250] sm:$0xff]  ;;  %v761_v38 = vld [vmem:[%s9534_s2 + $0x288] sm:$0xff] }
  0x27   :  { %371 = vmatprep.mubr.f32.mxu1 %v9540_v3  ;;  %9850 = vst [vmem:[#allocation19_spill] sm:$0xff] %v7045_v30  ;;  %9852 = vst [vmem:[#allocation21_spill] sm:$0xff] %v7053_v32  ;;  %v769_v39 = vld [vmem:[%s9534_s2 + $0x2c8] sm:$0xff]  ;;  %v763_v40 = vld [vmem:[%s9534_s2 + $0x298] sm:$0xff]  ;;  %v7087_v48 = vpack.c.bf16 %v752_v34, %v744_v33 }
  0x28   :  { %9853 = vst [vmem:[#allocation22_spill] sm:$0xff] %v7065_v35  ;;  %v771_v41 = vld [vmem:[%s9534_s2 + $0x2d8] sm:$0xff]  ;;  %v7095_v50 = vpack.c.bf16 %v769_v39, %v761_v38  ;;  %v760_v51 = vld [vmem:[%s9534_s2 + $0x280] sm:$0xff]  ;;  %v770_v54 = vld [vmem:[%s9534_s2 + $0x2d0] sm:$0xff] }
  0x29   :  { %3959 = vmatmul.mubr.msk.f32.gmra.mrb[10].mxu0 %vm139_vm0, %v6871_v45  ;;  %9854 = vst [vmem:[#allocation23_spill] sm:$0xff] %v7087_v48  ;;  %v768_v52 = vld [vmem:[%s9534_s2 + $0x2c0] sm:$0xff]  ;;  %v7107_v53 = vpack.c.bf16 %v771_v41, %v763_v40  ;;  %v777_v55 = vld [vmem:[%s9534_s2 + $0x308] sm:$0xff]  ;;  %v779_v60 = vld [vmem:[%s9534_s2 + $0x318] sm:$0xff] }
  0x2a   :  { %3967 = vmatmul.mubr.msk.f32.gmra.mrb[10].mxu1 %vm139_vm0, %v6871_v45  ;;  %264 = vmatprep.mubr.f32.mxu0 %v9540_v3  ;;  %9856 = vst [vmem:[#allocation25_spill] sm:$0xff] %v7095_v50  ;;  %v785_v59 = vld [vmem:[%s9534_s2 + $0x348] sm:$0xff]  ;;  %v787_v62 = vld [vmem:[%s9534_s2 + $0x358] sm:$0xff]  ;;  %v7129_v0 = vpack.c.bf16 %v768_v52, %v760_v51  ;;  %v776_v4 = vld [vmem:[%s9534_s2 + $0x300] sm:$0xff] }
  0x2b   :  { %377 = vmatprep.mubr.f32.mxu1 %v9540_v3  ;;  %9857 = vst [vmem:[#allocation26_spill] sm:$0xff] %v7107_v53  ;;  %v7137_v2 = vpack.c.bf16 %v785_v59, %v777_v55  ;;  %v784_v5 = vld [vmem:[%s9534_s2 + $0x340] sm:$0xff]  ;;  %v793_v10 = vld [vmem:[%s9534_s2 + $0x388] sm:$0xff]  ;;  %v795_v14 = vld [vmem:[%s9534_s2 + $0x398] sm:$0xff] }
  0x2c   :  { %9858 = vst [vmem:[#allocation27_spill] sm:$0xff] %v7129_v0  ;;  %v801_v13 = vld [vmem:[%s9534_s2 + $0x3c8] sm:$0xff]  ;;  %v803_v15 = vld [vmem:[%s9534_s2 + $0x3d8] sm:$0xff]  ;;  %v7171_v16 = vpack.c.bf16 %v784_v5, %v776_v4  ;;  %v792_v22 = vld [vmem:[%s9534_s2 + $0x380] sm:$0xff] }
  0x2d   :  { %3960 = vmatmul.mubr.msk.f32.gmra.mrb[12].mxu0 %vm139_vm0, %v6882_v46  ;;  %9860 = vst [vmem:[#allocation29_spill] sm:$0xff] %v7137_v2  ;;  %v7179_v21 = vpack.c.bf16 %v801_v13, %v793_v10  ;;  %v802_v26 = vld [vmem:[%s9534_s2 + $0x3d0] sm:$0xff]  ;;  %v809_v27 = vld [vmem:[%s9534_s2 + $0x408] sm:$0xff]  ;;  %v811_v29 = vld [vmem:[%s9534_s2 + $0x418] sm:$0xff] }
  0x2e   :  { %3968 = vmatmul.mubr.msk.f32.gmra.mrb[12].mxu1 %vm139_vm0, %v6882_v46  ;;  %270 = vmatprep.mubr.f32.mxu0 %v9540_v3  ;;  %9862 = vst [vmem:[#allocation31_spill] sm:$0xff] %v7171_v16  ;;  %v817_v28 = vld [vmem:[%s9534_s2 + $0x448] sm:$0xff]  ;;  %v819_v33 = vld [vmem:[%s9534_s2 + $0x458] sm:$0xff]  ;;  %v808_v38 = vld [vmem:[%s9534_s2 + $0x400] sm:$0xff] }
  0x2f   :  { %383 = vmatprep.mubr.f32.mxu1 %v9540_v3  ;;  %9864 = vst [vmem:[#allocation33_spill] sm:$0xff] %v7179_v21  ;;  %v816_v39 = vld [vmem:[%s9534_s2 + $0x440] sm:$0xff]  ;;  %v7233_v40 = vpack.c.bf16 %v819_v33, %v811_v29  ;;  %v818_v41 = vld [vmem:[%s9534_s2 + $0x450] sm:$0xff]  ;;  %v825_v51 = vld [vmem:[%s9534_s2 + $0x488] sm:$0xff] }
  0x30   :  { %v833_v52 = vld [vmem:[%s9534_s2 + $0x4c8] sm:$0xff]  ;;  %v7255_v55 = vpack.c.bf16 %v816_v39, %v808_v38  ;;  %v832_v4 = vld [vmem:[%s9534_s2 + $0x4c0] sm:$0xff]  ;;  %v843_v13 = vld [vmem:[%s9534_s2 + $0x518] sm:$0xff] }
  0x31   :  { %3961 = vmatmul.mubr.msk.f32.gmra.mrb[14].mxu0 %vm139_vm0, %v6893_v47  ;;  %9869 = vst [vmem:[#allocation38_spill] sm:$0xff] %v7233_v40  ;;  %v849_v10 = vld [vmem:[%s9534_s2 + $0x548] sm:$0xff]  ;;  %v850_v29 = vld [vmem:[%s9534_s2 + $0x550] sm:$0xff]  ;;  %v859_v39 = vld [vmem:[%s9534_s2 + $0x598] sm:$0xff] }
  0x32   :  { %3969 = vmatmul.mubr.msk.f32.gmra.mrb[14].mxu1 %vm139_vm0, %v6893_v47  ;;  %454 = vmatprep.mubr.f32.mxu0 %v9540_v3  ;;  %9870 = vst [vmem:[#allocation39_spill] sm:$0xff] %v7255_v55  ;;  %v857_v33 = vld [vmem:[%s9534_s2 + $0x588] sm:$0xff] }
  0x33   :  { %567 = vmatprep.mubr.f32.mxu1 %v9540_v3  ;;  %v865_v38 = vld [vmem:[%s9534_s2 + $0x5c8] sm:$0xff] }
  0x35   :  { %3970 = vmatmul.mubr.msk.f32.vlgmr.msra.gmra.mrb[16].mxu0 %vm139_vm0, %v6733_v61 }
  0x36   :  { %3978 = vmatmul.mubr.msk.f32.vlgmr.msra.gmra.mrb[16].mxu1 %vm139_vm0, %v6733_v61  ;;  %4123 = vmatpush1.bf16.msra.mxu0 %v6925_v56  ;;  %v720_v61 = vld [vmem:[%s9534_s2 + $0x140] sm:$0xff] }
  0x37   :  { %4187 = vmatpush1.bf16.msra.mxu1 %v6928_v57  ;;  %4125 = vmatprep.subr.bf16.mxu0 %v6930_v58  ;;  %v7003_v18 = vpack.c.bf16 %v720_v61, %v712_v9  ;;  %v7149_v9 = vpack.c.bf16 %v787_v62, %v779_v60  ;;  %v786_v61 = vld [vmem:[%s9534_s2 + $0x350] sm:$0xff]  ;;  %v7263_v60 = vpack.c.bf16 %v833_v52, %v825_v51  ;;  %v824_v62 = vld [vmem:[%s9534_s2 + $0x480] sm:$0xff] }
  0x38   :  { %4189 = vmatprep.subr.bf16.mxu1 %v6941_v63  ;;  %460 = vmatprep.mubr.f32.mxu0 %v9540_v3  ;;  %v7337_v52 = vpack.c.bf16 %v865_v38, %v857_v33  ;;  %v874_v33 = vld [vmem:[%s9534_s2 + $0x610] sm:$0xff] }
  0x39   :  { %573 = vmatprep.mubr.f32.mxu1 %v9540_v3  ;;  %3971 = vmatmul.mubr.msk.f32.gmra.mrb[18].mxu0 %vm139_vm0, %v6766_v11  ;;  %9846 = vst [vmem:[#allocation15_spill] sm:$0xff] %v7003_v18  ;;  %9861 = vst [vmem:[#allocation30_spill] sm:$0xff] %v7149_v9 }
  0x3a   :  { %4127 = vmatpush1.bf16.msra.mxu0 %v6963_v6  ;;  %3979 = vmatmul.mubr.msk.f32.gmra.mrb[18].mxu1 %vm139_vm0, %v6766_v11  ;;  %v730_v11 = vld [vmem:[%s9534_s2 + $0x190] sm:$0xff]  ;;  %9872 = vst [vmem:[#allocation41_spill] sm:$0xff] %v7263_v60  ;;  %9880 = vst [vmem:[#allocation49_spill] sm:$0xff] %v7337_v52 }
  0x3b   :  { %4191 = vmatpush1.bf16.msra.mxu1 %v6967_v7  ;;  %4129 = vmatprep.subr.bf16.mxu0 %v6969_v8  ;;  %v7051_v31 = vpack.c.bf16 %v738_v25, %v730_v11  ;;  %v800_v11 = vld [vmem:[%s9534_s2 + $0x3c0] sm:$0xff]  ;;  %v7191_v25 = vpack.c.bf16 %v803_v15, %v795_v14  ;;  %v851_v14 = vld [vmem:[%s9534_s2 + $0x558] sm:$0xff]  ;;  %v7295_v15 = vpack.c.bf16 %v832_v4, %v824_v62  ;;  %v858_v62 = vld [vmem:[%s9534_s2 + $0x590] sm:$0xff] }
  0x3c   :  { %4193 = vmatprep.subr.bf16.mxu1 %v6981_v12  ;;  %466 = vmatprep.mubr.f32.mxu0 %v9540_v3  ;;  %v7213_v34 = vpack.c.bf16 %v800_v11, %v792_v22 }
  0x3d   :  { %579 = vmatprep.mubr.f32.mxu1 %v9540_v3  ;;  %3972 = vmatmul.mubr.msk.f32.gmra.mrb[20].mxu0 %vm139_vm0, %v6802_v24  ;;  %9851 = vst [vmem:[#allocation20_spill] sm:$0xff] %v7051_v31  ;;  %9865 = vst [vmem:[#allocation34_spill] sm:$0xff] %v7191_v25 }
  0x3e   :  { %4131 = vmatpush1.bf16.msra.mxu0 %v7003_v18  ;;  %3980 = vmatmul.mubr.msk.f32.gmra.mrb[20].mxu1 %vm139_vm0, %v6802_v24  ;;  %v746_v24 = vld [vmem:[%s9534_s2 + $0x210] sm:$0xff]  ;;  %9866 = vst [vmem:[#allocation35_spill] sm:$0xff] %v7213_v34  ;;  %9874 = vst [vmem:[#allocation43_spill] sm:$0xff] %v7295_v15 }
  0x3f   :  { %4195 = vmatpush1.bf16.msra.mxu1 %v7009_v19  ;;  %4133 = vmatprep.subr.bf16.mxu0 %v7011_v20  ;;  %v7093_v49 = vpack.c.bf16 %v754_v36, %v746_v24  ;;  %v7221_v36 = vpack.c.bf16 %v817_v28, %v809_v27  ;;  %v842_v27 = vld [vmem:[%s9534_s2 + $0x510] sm:$0xff]  ;;  %v7313_v28 = vpack.c.bf16 %v851_v14, %v843_v13  ;;  %v883_v13 = vld [vmem:[%s9534_s2 + $0x658] sm:$0xff] }
  0x40   :  { %4197 = vmatprep.subr.bf16.mxu1 %v7023_v23  ;;  %472 = vmatprep.mubr.f32.mxu0 %v9540_v3  ;;  %v7335_v51 = vpack.c.bf16 %v850_v29, %v842_v27  ;;  %v872_v27 = vld [vmem:[%s9534_s2 + $0x600] sm:$0xff] }
  0x41   :  { %585 = vmatprep.mubr.f32.mxu1 %v9540_v3  ;;  %3973 = vmatmul.mubr.msk.f32.gmra.mrb[22].mxu0 %vm139_vm0, %v6837_v37  ;;  %9855 = vst [vmem:[#allocation24_spill] sm:$0xff] %v7093_v49  ;;  %9868 = vst [vmem:[#allocation37_spill] sm:$0xff] %v7221_v36  ;;  %v880_v29 = vld [vmem:[%s9534_s2 + $0x640] sm:$0xff] }
  0x42   :  { %4135 = vmatpush1.bf16.msra.mxu0 %v7045_v30  ;;  %3981 = vmatmul.mubr.msk.f32.gmra.mrb[22].mxu1 %vm139_vm0, %v6837_v37  ;;  %v762_v37 = vld [vmem:[%s9534_s2 + $0x290] sm:$0xff]  ;;  %9877 = vst [vmem:[#allocation46_spill] sm:$0xff] %v7313_v28  ;;  %9879 = vst [vmem:[#allocation48_spill] sm:$0xff] %v7335_v51 }
  0x43   :  { %4199 = vmatpush1.bf16.msra.mxu1 %v7051_v31  ;;  %4137 = vmatprep.subr.bf16.mxu0 %v7053_v32  ;;  %v7135_v1 = vpack.c.bf16 %v770_v54, %v762_v37  ;;  %v827_v37 = vld [vmem:[%s9534_s2 + $0x498] sm:$0xff] }
  0x44   :  { %4201 = vmatprep.subr.bf16.mxu1 %v7065_v35  ;;  %478 = vmatprep.mubr.f32.mxu0 %v9540_v3  ;;  %v835_v54 = vld [vmem:[%s9534_s2 + $0x4d8] sm:$0xff] }
  0x45   :  { %591 = vmatprep.mubr.f32.mxu1 %v9540_v3  ;;  %3974 = vmatmul.mubr.msk.f32.gmra.mrb[24].mxu0 %vm139_vm0, %v6858_v44  ;;  %9859 = vst [vmem:[#allocation28_spill] sm:$0xff] %v7135_v1  ;;  %v7275_v5 = vpack.c.bf16 %v835_v54, %v827_v37  ;;  %v856_v37 = vld [vmem:[%s9534_s2 + $0x580] sm:$0xff] }
  0x46   :  { %4139 = vmatpush1.bf16.msra.mxu0 %v7087_v48  ;;  %3982 = vmatmul.mubr.msk.f32.gmra.mrb[24].mxu1 %vm139_vm0, %v6858_v44  ;;  %v778_v44 = vld [vmem:[%s9534_s2 + $0x310] sm:$0xff]  ;;  %v864_v54 = vld [vmem:[%s9534_s2 + $0x5c0] sm:$0xff] }
  0x47   :  { %4203 = vmatpush1.bf16.msra.mxu1 %v7093_v49  ;;  %4141 = vmatprep.subr.bf16.mxu0 %v7095_v50  ;;  %v7177_v17 = vpack.c.bf16 %v786_v61, %v778_v44  ;;  %9873 = vst [vmem:[#allocation42_spill] sm:$0xff] %v7275_v5  ;;  %v834_v44 = vld [vmem:[%s9534_s2 + $0x4d0] sm:$0xff]  ;;  %v841_v61 = vld [vmem:[%s9534_s2 + $0x508] sm:$0xff]  ;;  %v7367_v14 = vpack.c.bf16 %v864_v54, %v856_v37  ;;  %v891_v54 = vld [vmem:[%s9534_s2 + $0x698] sm:$0xff] }
  0x48   :  { %4205 = vmatprep.subr.bf16.mxu1 %v7107_v53  ;;  %484 = vmatprep.mubr.f32.mxu0 %v9540_v3  ;;  %v7301_v11 = vpack.c.bf16 %v849_v10, %v841_v61  ;;  %v881_v61 = vld [vmem:[%s9534_s2 + $0x648] sm:$0xff]  ;;  %v875_v10 = vld [vmem:[%s9534_s2 + $0x618] sm:$0xff] }
  0x49   :  { %597 = vmatprep.mubr.f32.mxu1 %v9540_v3  ;;  %3975 = vmatmul.mubr.msk.f32.gmra.mrb[26].mxu0 %vm139_vm0, %v6871_v45  ;;  %9863 = vst [vmem:[#allocation32_spill] sm:$0xff] %v7177_v17  ;;  %9882 = vst [vmem:[#allocation51_spill] sm:$0xff] %v7367_v14  ;;  %v7385_v38 = vpack.c.bf16 %v883_v13, %v875_v10  ;;  %v897_v37 = vld [vmem:[%s9534_s2 + $0x6c8] sm:$0xff]  ;;  %v888_v10 = vld [vmem:[%s9534_s2 + $0x680] sm:$0xff] }
  0x4a   :  { %4143 = vmatpush1.bf16.msra.mxu0 %v7129_v0  ;;  %3983 = vmatmul.mubr.msk.f32.gmra.mrb[26].mxu1 %vm139_vm0, %v6871_v45  ;;  %v794_v45 = vld [vmem:[%s9534_s2 + $0x390] sm:$0xff]  ;;  %9876 = vst [vmem:[#allocation45_spill] sm:$0xff] %v7301_v11  ;;  %v896_v13 = vld [vmem:[%s9534_s2 + $0x6c0] sm:$0xff] }
  0x4b   :  { %4207 = vmatpush1.bf16.msra.mxu1 %v7135_v1  ;;  %4145 = vmatprep.subr.bf16.mxu0 %v7137_v2  ;;  %v7219_v24 = vpack.c.bf16 %v802_v26, %v794_v45  ;;  %v840_v45 = vld [vmem:[%s9534_s2 + $0x500] sm:$0xff]  ;;  %9885 = vst [vmem:[#allocation54_spill] sm:$0xff] %v7385_v38 }
  0x4c   :  { %4209 = vmatprep.subr.bf16.mxu1 %v7149_v9  ;;  %490 = vmatprep.mubr.f32.mxu0 %v9540_v3  ;;  %v848_v26 = vld [vmem:[%s9534_s2 + $0x540] sm:$0xff] }
  0x4d   :  { %603 = vmatprep.mubr.f32.mxu1 %v9540_v3  ;;  %3976 = vmatmul.mubr.msk.f32.gmra.mrb[28].mxu0 %vm139_vm0, %v6882_v46  ;;  %9867 = vst [vmem:[#allocation36_spill] sm:$0xff] %v7219_v24 }
  0x4e   :  { %4147 = vmatpush1.bf16.msra.mxu0 %v7171_v16  ;;  %3984 = vmatmul.mubr.msk.f32.gmra.mrb[28].mxu1 %vm139_vm0, %v6882_v46  ;;  %v810_v46 = vld [vmem:[%s9534_s2 + $0x410] sm:$0xff] }
  0x4f   :  { %4211 = vmatpush1.bf16.msra.mxu1 %v7177_v17  ;;  %4149 = vmatprep.subr.bf16.mxu0 %v7179_v21  ;;  %v7261_v59 = vpack.c.bf16 %v818_v41, %v810_v46  ;;  %v867_v46 = vld [vmem:[%s9534_s2 + $0x5d8] sm:$0xff]  ;;  %v7331_v41 = vpack.c.bf16 %v848_v26, %v840_v45 }
  0x50   :  { %4213 = vmatprep.subr.bf16.mxu1 %v7191_v25  ;;  %496 = vmatprep.mubr.f32.mxu0 %v9540_v3  ;;  %v7349_v4 = vpack.c.bf16 %v867_v46, %v859_v39  ;;  %v882_v39 = vld [vmem:[%s9534_s2 + $0x650] sm:$0xff]  ;;  %v889_v46 = vld [vmem:[%s9534_s2 + $0x688] sm:$0xff] }
  0x51   :  { %609 = vmatprep.mubr.f32.mxu1 %v9540_v3  ;;  %3977 = vmatmul.mubr.msk.f32.gmra.mrb[30].mxu0 %vm139_vm0, %v6893_v47  ;;  %9871 = vst [vmem:[#allocation40_spill] sm:$0xff] %v7261_v59  ;;  %9878 = vst [vmem:[#allocation47_spill] sm:$0xff] %v7331_v41 }
  0x52   :  { %4151 = vmatpush1.bf16.msra.mxu0 %v7213_v34  ;;  %3985 = vmatmul.mubr.msk.f32.gmra.mrb[30].mxu1 %vm139_vm0, %v6893_v47  ;;  %v826_v47 = vld [vmem:[%s9534_s2 + $0x490] sm:$0xff]  ;;  %9881 = vst [vmem:[#allocation50_spill] sm:$0xff] %v7349_v4 }
  0x53   :  { %4215 = vmatpush1.bf16.msra.mxu1 %v7219_v24  ;;  %4153 = vmatprep.subr.bf16.mxu0 %v7221_v36  ;;  %v7299_v22 = vpack.c.bf16 %v834_v44, %v826_v47  ;;  %v866_v47 = vld [vmem:[%s9534_s2 + $0x5d0] sm:$0xff]  ;;  %v873_v44 = vld [vmem:[%s9534_s2 + $0x608] sm:$0xff] }
  0x54   :  { %4217 = vmatprep.subr.bf16.mxu1 %v7233_v40  ;;  %1012 = vmatprep.mubr.f32.mxu0 %v9540_v3  ;;  %v7371_v45 = vpack.c.bf16 %v866_v47, %v858_v62  ;;  %v7373_v26 = vpack.c.bf16 %v881_v61, %v873_v44  ;;  %v899_v62 = vld [vmem:[%s9534_s2 + $0x6d8] sm:$0xff]  ;;  %v7403_v47 = vpack.c.bf16 %v880_v29, %v872_v27  ;;  %v890_v27 = vld [vmem:[%s9534_s2 + $0x690] sm:$0xff] }
  0x55   :  { %1083 = vmatprep.mubr.f32.mxu1 %v9540_v3  ;;  %9875 = vst [vmem:[#allocation44_spill] sm:$0xff] %v7299_v22  ;;  %v7407_v44 = vpack.c.bf16 %v882_v39, %v874_v33  ;;  %v7409_v61 = vpack.c.bf16 %v897_v37, %v889_v46  ;;  %v7421_v29 = vpack.c.bf16 %v899_v62, %v891_v54  ;;  %v898_v33 = vld [vmem:[%s9534_s2 + $0x6d0] sm:$0xff]  ;;  %v905_v39 = vld [vmem:[%s9534_s2 + $0x708] sm:$0xff]  ;;  %v907_v37 = vld [vmem:[%s9534_s2 + $0x718] sm:$0xff] }
  0x56   :  { %4155 = vmatpush1.bf16.msra.mxu0 %v7255_v55  ;;  %9883 = vst [vmem:[#allocation52_spill] sm:$0xff] %v7371_v45  ;;  %9884 = vst [vmem:[#allocation53_spill] sm:$0xff] %v7373_v26  ;;  %v913_v46 = vld [vmem:[%s9534_s2 + $0x748] sm:$0xff]  ;;  %v915_v54 = vld [vmem:[%s9534_s2 + $0x758] sm:$0xff]  ;;  %v7439_v62 = vpack.c.bf16 %v896_v13, %v888_v10  ;;  %v7443_v3 = vpack.c.bf16 %v898_v33, %v890_v27 }
  0x57   :  { %4219 = vmatpush1.bf16.msra.mxu1 %v7261_v59  ;;  %4157 = vmatprep.subr.bf16.mxu0 %v7263_v60  ;;  %9886 = vst [vmem:[#allocation55_spill] sm:$0xff] %v7403_v47  ;;  %9887 = vst [vmem:[#allocation56_spill] sm:$0xff] %v7407_v44  ;;  %v906_v10 = vld [vmem:[%s9534_s2 + $0x710] sm:$0xff]  ;;  %v7457_v13 = vpack.c.bf16 %v915_v54, %v907_v37  ;;  %v921_v33 = vld [vmem:[%s9534_s2 + $0x788] sm:$0xff] }
  0x58   :  { %4221 = vmatprep.subr.bf16.mxu1 %v7275_v5  ;;  %9888 = vst [vmem:[#allocation57_spill] sm:$0xff] %v7409_v61  ;;  %9889 = vst [vmem:[#allocation58_spill] sm:$0xff] %v7421_v29  ;;  %v914_v27 = vld [vmem:[%s9534_s2 + $0x750] sm:$0xff]  ;;  %v931_v37 = vld [vmem:[%s9534_s2 + $0x7d8] sm:$0xff] }
  0x59   :  { %9890 = vst [vmem:[#allocation59_spill] sm:$0xff] %v7439_v62  ;;  %9891 = vst [vmem:[#allocation60_spill] sm:$0xff] %v7443_v3 }
  0x5a   :  { %4159 = vmatpush1.bf16.msra.mxu0 %v7295_v15  ;;  %9893 = vst [vmem:[#allocation62_spill] sm:$0xff] %v7457_v13 }
  0x5b   :  { %4223 = vmatpush1.bf16.msra.mxu1 %v7299_v22  ;;  %4161 = vmatprep.subr.bf16.mxu0 %v7301_v11 }
  0x5c   :  { %4225 = vmatprep.subr.bf16.mxu1 %v7313_v28 }
  0x5e   :  { %4163 = vmatpush1.bf16.msra.mxu0 %v7331_v41 }
  0x5f   :  { %4227 = vmatpush1.bf16.msra.mxu1 %v7335_v51  ;;  %4165 = vmatprep.subr.bf16.mxu0 %v7337_v52 }
  0x60   :  { %4229 = vmatprep.subr.bf16.mxu1 %v7349_v4 }
  0x62   :  { %4167 = vmatpush1.bf16.msra.mxu0 %v7367_v14  ;;  %v724_v14 = vld [vmem:[%s9534_s2 + $0x160] sm:$0xff] }
  0x63   :  { %4231 = vmatpush1.bf16.msra.mxu1 %v7371_v45  ;;  %4169 = vmatprep.subr.bf16.mxu0 %v7373_v26  ;;  %v904_v26 = vld [vmem:[%s9534_s2 + $0x700] sm:$0xff] }
  0x64   :  { %4233 = vmatprep.subr.bf16.mxu1 %v7385_v38  ;;  %v7445_v38 = vpack.c.bf16 %v913_v46, %v905_v39  ;;  %v912_v45 = vld [vmem:[%s9534_s2 + $0x740] sm:$0xff]  ;;  %v929_v39 = vld [vmem:[%s9534_s2 + $0x7c8] sm:$0xff]  ;;  %v923_v46 = vld [vmem:[%s9534_s2 + $0x798] sm:$0xff] }
  0x65   :  { %v7475_v54 = vpack.c.bf16 %v912_v45, %v904_v26  ;;  %v922_v45 = vld [vmem:[%s9534_s2 + $0x790] sm:$0xff]  ;;  %v7493_v26 = vpack.c.bf16 %v931_v37, %v923_v46  ;;  %v695_v46 = vld [vmem:[%s9534_s2 + $0x78] sm:$0xff] }
  0x66   :  { %4171 = vmatpush1.bf16.msra.mxu0 %v7403_v47  ;;  %9892 = vst [vmem:[#allocation61_spill] sm:$0xff] %v7445_v38  ;;  %v928_v47 = vld [vmem:[%s9534_s2 + $0x7c0] sm:$0xff] }
  0x67   :  { %4235 = vmatpush1.bf16.msra.mxu1 %v7407_v44  ;;  %4173 = vmatprep.subr.bf16.mxu0 %v7409_v61  ;;  %9894 = vst [vmem:[#allocation63_spill] sm:$0xff] %v7475_v54  ;;  %v7481_v61 = vpack.c.bf16 %v929_v39, %v921_v33  ;;  %v920_v44 = vld [vmem:[%s9534_s2 + $0x780] sm:$0xff]  ;;  %9897 = vst [vmem:[#allocation66_spill] sm:$0xff] %v7493_v26  ;;  %v693_v33 = vld [vmem:[%s9534_s2 + $0x68] sm:$0xff] }
  0x68   :  { %4237 = vmatprep.subr.bf16.mxu1 %v7421_v29  ;;  %v7479_v29 = vpack.c.bf16 %v914_v27, %v906_v10  ;;  %v930_v10 = vld [vmem:[%s9534_s2 + $0x7d0] sm:$0xff]  ;;  %v685_v27 = vld [vmem:[%s9534_s2 + $0x28] sm:$0xff]  ;;  %v687_v39 = vld [vmem:[%s9534_s2 + $0x38] sm:$0xff]  ;;  %v7511_v37 = vpack.c.bf16 %v928_v47, %v920_v44 }
  0x69   :  { %9896 = vst [vmem:[#allocation65_spill] sm:$0xff] %v7481_v61  ;;  %v686_v47 = vld [vmem:[%s9534_s2 + $0x30] sm:$0xff]  ;;  %v7529_v44 = vpack.c.bf16 %v695_v46, %v687_v39  ;;  %v711_v39 = vld [vmem:[%s9534_s2 + $0xf8] sm:$0xff] }
  0x6a   :  { %4175 = vmatpush1.bf16.msra.mxu0 %v7439_v62  ;;  %9895 = vst [vmem:[#allocation64_spill] sm:$0xff] %v7479_v29  ;;  %9898 = vst [vmem:[#allocation67_spill] sm:$0xff] %v7511_v37  ;;  %v692_v62 = vld [vmem:[%s9534_s2 + $0x60] sm:$0xff] }
  0x6b   :  { %4239 = vmatpush1.bf16.msra.mxu1 %v7443_v3  ;;  %4177 = vmatprep.subr.bf16.mxu0 %v7445_v38  ;;  %v7517_v38 = vpack.c.bf16 %v693_v33, %v685_v27  ;;  %v684_v3 = vld [vmem:[%s9534_s2 + $0x20] sm:$0xff]  ;;  %9901 = vst [vmem:[#allocation70_spill] sm:$0xff] %v7529_v44  ;;  %v709_v27 = vld [vmem:[%s9534_s2 + $0xe8] sm:$0xff]  ;;  %v703_v33 = vld [vmem:[%s9534_s2 + $0xb8] sm:$0xff] }
  0x6c   :  { %4241 = vmatprep.subr.bf16.mxu1 %v7457_v13  ;;  %v7515_v13 = vpack.c.bf16 %v930_v10, %v922_v45  ;;  %v694_v45 = vld [vmem:[%s9534_s2 + $0x70] sm:$0xff]  ;;  %v701_v10 = vld [vmem:[%s9534_s2 + $0xa8] sm:$0xff]  ;;  %v7547_v46 = vpack.c.bf16 %v692_v62, %v684_v3  ;;  %v7565_v62 = vpack.c.bf16 %v711_v39, %v703_v33  ;;  %v727_v33 = vld [vmem:[%s9534_s2 + $0x178] sm:$0xff] }
  0x6d   :  { %9900 = vst [vmem:[#allocation69_spill] sm:$0xff] %v7517_v38  ;;  %v702_v3 = vld [vmem:[%s9534_s2 + $0xb0] sm:$0xff] }
  0x6e   :  { %4179 = vmatpush1.bf16.msra.mxu0 %v7475_v54  ;;  %9899 = vst [vmem:[#allocation68_spill] sm:$0xff] %v7515_v13  ;;  %9902 = vst [vmem:[#allocation71_spill] sm:$0xff] %v7547_v46  ;;  %v708_v54 = vld [vmem:[%s9534_s2 + $0xe0] sm:$0xff] }
  0x6f   :  { %4243 = vmatpush1.bf16.msra.mxu1 %v7479_v29  ;;  %4181 = vmatprep.subr.bf16.mxu0 %v7481_v61  ;;  %v7553_v61 = vpack.c.bf16 %v709_v27, %v701_v10  ;;  %v700_v29 = vld [vmem:[%s9534_s2 + $0xa0] sm:$0xff]  ;;  %9905 = vst [vmem:[#allocation74_spill] sm:$0xff] %v7565_v62  ;;  %v725_v10 = vld [vmem:[%s9534_s2 + $0x168] sm:$0xff]  ;;  %v9906_v27 = vmov 0.0  }
  0x70   :  { %4245 = vmatprep.subr.bf16.mxu1 %v7493_v26  ;;  %v7551_v26 = vpack.c.bf16 %v694_v45, %v686_v47  ;;  %v710_v47 = vld [vmem:[%s9534_s2 + $0xf0] sm:$0xff]  ;;  %v717_v45 = vld [vmem:[%s9534_s2 + $0x128] sm:$0xff]  ;;  %v7585_v39 = vpack.c.bf16 %v708_v54, %v700_v29 }
  0x71   :  { %9904 = vst [vmem:[#allocation73_spill] sm:$0xff] %v7553_v61  ;;  %v718_v29 = vld [vmem:[%s9534_s2 + $0x130] sm:$0xff] }
  0x72   :  { %4183 = vmatpush1.bf16.msra.mxu0 %v7511_v37  ;;  %9903 = vst [vmem:[#allocation72_spill] sm:$0xff] %v7551_v26  ;;  %9907 = vst [vmem:[#allocation75_spill] sm:$0xff] %v7585_v39  ;;  %v716_v37 = vld [vmem:[%s9534_s2 + $0x120] sm:$0xff] }
  0x73   :  { %4247 = vmatpush1.bf16.msra.mxu1 %v7515_v13  ;;  %4249 = vmatprep.subr.bf16.mxu0 %v7517_v38  ;;  %v7589_v38 = vpack.c.bf16 %v710_v47, %v702_v3  ;;  %v7591_v13 = vpack.c.bf16 %v725_v10, %v717_v45  ;;  %v726_v3 = vld [vmem:[%s9534_s2 + $0x170] sm:$0xff]  ;;  %v733_v47 = vld [vmem:[%s9534_s2 + $0x1a8] sm:$0xff]  ;;  %v735_v10 = vld [vmem:[%s9534_s2 + $0x1b8] sm:$0xff] }
  0x74   :  { %4313 = vmatprep.subr.bf16.mxu1 %v7529_v44  ;;  %v719_v44 = vld [vmem:[%s9534_s2 + $0x138] sm:$0xff]  ;;  %v741_v45 = vld [vmem:[%s9534_s2 + $0x1e8] sm:$0xff] }
  0x75   :  { %1013 = vmatmul.mubr.f32.vlgmr.msra.gmra.mrb[0].mxu0 %v9906_v27  ;;  %9908 = vst [vmem:[#allocation76_spill] sm:$0xff] %v7589_v38  ;;  %9909 = vst [vmem:[#allocation77_spill] sm:$0xff] %v7591_v13  ;;  %v7603_v54 = vpack.c.bf16 %v727_v33, %v719_v44  ;;  %v743_v44 = vld [vmem:[%s9534_s2 + $0x1f8] sm:$0xff]  ;;  %v7623_v33 = vpack.c.bf16 %v724_v14, %v716_v37  ;;  %v734_v14 = vld [vmem:[%s9534_s2 + $0x1b0] sm:$0xff] }
  0x76   :  { %1084 = vmatmul.mubr.f32.vlgmr.msra.gmra.mrb[0].mxu1 %v9906_v27  ;;  %4251 = vmatpush1.bf16.msra.mxu0 %v7547_v46  ;;  %v740_v46 = vld [vmem:[%s9534_s2 + $0x1e0] sm:$0xff]  ;;  %v7641_v37 = vpack.c.bf16 %v743_v44, %v735_v10  ;;  %v759_v10 = vld [vmem:[%s9534_s2 + $0x278] sm:$0xff] }
  0x77   :  { %4315 = vmatpush1.bf16.msra.mxu1 %v7551_v26  ;;  %4253 = vmatprep.subr.bf16.mxu0 %v7553_v61  ;;  %9910 = vst [vmem:[#allocation78_spill] sm:$0xff] %v7603_v54  ;;  %9911 = vst [vmem:[#allocation79_spill] sm:$0xff] %v7623_v33  ;;  %v7629_v61 = vpack.c.bf16 %v741_v45, %v733_v47  ;;  %v732_v26 = vld [vmem:[%s9534_s2 + $0x1a0] sm:$0xff]  ;;  %v757_v47 = vld [vmem:[%s9534_s2 + $0x268] sm:$0xff] }
  0x78   :  { %4317 = vmatprep.subr.bf16.mxu1 %v7565_v62  ;;  %1154 = vmatprep.mubr.f32.mxu0 %v9906_v27  ;;  %v7627_v62 = vpack.c.bf16 %v726_v3, %v718_v29  ;;  %9914 = vst [vmem:[#allocation82_spill] sm:$0xff] %v7641_v37  ;;  %v742_v29 = vld [vmem:[%s9534_s2 + $0x1f0] sm:$0xff]  ;;  %v749_v3 = vld [vmem:[%s9534_s2 + $0x228] sm:$0xff]  ;;  %v751_v45 = vld [vmem:[%s9534_s2 + $0x238] sm:$0xff]  ;;  %v7659_v44 = vpack.c.bf16 %v740_v46, %v732_v26 }
  0x79   :  { %1225 = vmatprep.mubr.f32.mxu1 %v9906_v27  ;;  %9913 = vst [vmem:[#allocation81_spill] sm:$0xff] %v7629_v61  ;;  %v750_v26 = vld [vmem:[%s9534_s2 + $0x230] sm:$0xff]  ;;  %v7677_v46 = vpack.c.bf16 %v759_v10, %v751_v45  ;;  %v775_v45 = vld [vmem:[%s9534_s2 + $0x2f8] sm:$0xff] }
  0x7a   :  { %4255 = vmatpush1.bf16.msra.mxu0 %v7585_v39  ;;  %9912 = vst [vmem:[#allocation80_spill] sm:$0xff] %v7627_v62  ;;  %9915 = vst [vmem:[#allocation83_spill] sm:$0xff] %v7659_v44  ;;  %v756_v39 = vld [vmem:[%s9534_s2 + $0x260] sm:$0xff] }
  0x7b   :  { %4319 = vmatpush1.bf16.msra.mxu1 %v7589_v38  ;;  %4257 = vmatprep.subr.bf16.mxu0 %v7591_v13  ;;  %v7665_v13 = vpack.c.bf16 %v757_v47, %v749_v3  ;;  %v748_v38 = vld [vmem:[%s9534_s2 + $0x220] sm:$0xff]  ;;  %9918 = vst [vmem:[#allocation86_spill] sm:$0xff] %v7677_v46  ;;  %v773_v3 = vld [vmem:[%s9534_s2 + $0x2e8] sm:$0xff]  ;;  %v767_v47 = vld [vmem:[%s9534_s2 + $0x2b8] sm:$0xff] }
  0x7c   :  { %4321 = vmatprep.subr.bf16.mxu1 %v7603_v54  ;;  %v7663_v54 = vpack.c.bf16 %v742_v29, %v734_v14  ;;  %v758_v14 = vld [vmem:[%s9534_s2 + $0x270] sm:$0xff]  ;;  %v765_v29 = vld [vmem:[%s9534_s2 + $0x2a8] sm:$0xff]  ;;  %v7695_v10 = vpack.c.bf16 %v756_v39, %v748_v38  ;;  %v7713_v39 = vpack.c.bf16 %v775_v45, %v767_v47  ;;  %v791_v47 = vld [vmem:[%s9534_s2 + $0x378] sm:$0xff] }
  0x7d   :  { %9917 = vst [vmem:[#allocation85_spill] sm:$0xff] %v7665_v13  ;;  %v766_v38 = vld [vmem:[%s9534_s2 + $0x2b0] sm:$0xff] }
  0x7e   :  { %4259 = vmatpush1.bf16.msra.mxu0 %v7623_v33  ;;  %9916 = vst [vmem:[#allocation84_spill] sm:$0xff] %v7663_v54  ;;  %9919 = vst [vmem:[#allocation87_spill] sm:$0xff] %v7695_v10  ;;  %v772_v33 = vld [vmem:[%s9534_s2 + $0x2e0] sm:$0xff] }
  0x7f   :  { %4323 = vmatpush1.bf16.msra.mxu1 %v7627_v62  ;;  %4261 = vmatprep.subr.bf16.mxu0 %v7629_v61  ;;  %v7701_v61 = vpack.c.bf16 %v773_v3, %v765_v29  ;;  %v764_v62 = vld [vmem:[%s9534_s2 + $0x2a0] sm:$0xff]  ;;  %9922 = vst [vmem:[#allocation90_spill] sm:$0xff] %v7713_v39  ;;  %v789_v29 = vld [vmem:[%s9534_s2 + $0x368] sm:$0xff]  ;;  %v783_v3 = vld [vmem:[%s9534_s2 + $0x338] sm:$0xff] }
  0x80   :  { %4325 = vmatprep.subr.bf16.mxu1 %v7641_v37  ;;  %v7699_v37 = vpack.c.bf16 %v758_v14, %v750_v26  ;;  %v774_v26 = vld [vmem:[%s9534_s2 + $0x2f0] sm:$0xff]  ;;  %v781_v14 = vld [vmem:[%s9534_s2 + $0x328] sm:$0xff]  ;;  %v7731_v45 = vpack.c.bf16 %v772_v33, %v764_v62  ;;  %v7749_v33 = vpack.c.bf16 %v791_v47, %v783_v3  ;;  %v807_v3 = vld [vmem:[%s9534_s2 + $0x3f8] sm:$0xff] }
  0x81   :  { %9921 = vst [vmem:[#allocation89_spill] sm:$0xff] %v7701_v61  ;;  %v782_v62 = vld [vmem:[%s9534_s2 + $0x330] sm:$0xff] }
  0x82   :  { %4263 = vmatpush1.bf16.msra.mxu0 %v7659_v44  ;;  %9920 = vst [vmem:[#allocation88_spill] sm:$0xff] %v7699_v37  ;;  %9923 = vst [vmem:[#allocation91_spill] sm:$0xff] %v7731_v45  ;;  %v788_v44 = vld [vmem:[%s9534_s2 + $0x360] sm:$0xff] }
  0x83   :  { %4327 = vmatpush1.bf16.msra.mxu1 %v7663_v54  ;;  %4265 = vmatprep.subr.bf16.mxu0 %v7665_v13  ;;  %v7737_v13 = vpack.c.bf16 %v789_v29, %v781_v14  ;;  %v780_v54 = vld [vmem:[%s9534_s2 + $0x320] sm:$0xff]  ;;  %9926 = vst [vmem:[#allocation94_spill] sm:$0xff] %v7749_v33  ;;  %v805_v14 = vld [vmem:[%s9534_s2 + $0x3e8] sm:$0xff]  ;;  %v799_v29 = vld [vmem:[%s9534_s2 + $0x3b8] sm:$0xff] }
  0x84   :  { %4329 = vmatprep.subr.bf16.mxu1 %v7677_v46  ;;  %v7735_v46 = vpack.c.bf16 %v774_v26, %v766_v38  ;;  %v790_v38 = vld [vmem:[%s9534_s2 + $0x370] sm:$0xff]  ;;  %v797_v26 = vld [vmem:[%s9534_s2 + $0x3a8] sm:$0xff]  ;;  %v7767_v47 = vpack.c.bf16 %v788_v44, %v780_v54  ;;  %v7785_v44 = vpack.c.bf16 %v807_v3, %v799_v29  ;;  %v823_v29 = vld [vmem:[%s9534_s2 + $0x478] sm:$0xff] }
  0x85   :  { %9925 = vst [vmem:[#allocation93_spill] sm:$0xff] %v7737_v13  ;;  %v798_v54 = vld [vmem:[%s9534_s2 + $0x3b0] sm:$0xff] }
  0x86   :  { %4267 = vmatpush1.bf16.msra.mxu0 %v7695_v10  ;;  %9924 = vst [vmem:[#allocation92_spill] sm:$0xff] %v7735_v46  ;;  %9927 = vst [vmem:[#allocation95_spill] sm:$0xff] %v7767_v47  ;;  %v804_v10 = vld [vmem:[%s9534_s2 + $0x3e0] sm:$0xff] }
  0x87   :  { %4331 = vmatpush1.bf16.msra.mxu1 %v7699_v37  ;;  %4269 = vmatprep.subr.bf16.mxu0 %v7701_v61  ;;  %v7773_v61 = vpack.c.bf16 %v805_v14, %v797_v26  ;;  %v796_v37 = vld [vmem:[%s9534_s2 + $0x3a0] sm:$0xff]  ;;  %9930 = vst [vmem:[#allocation98_spill] sm:$0xff] %v7785_v44  ;;  %v821_v26 = vld [vmem:[%s9534_s2 + $0x468] sm:$0xff]  ;;  %v815_v14 = vld [vmem:[%s9534_s2 + $0x438] sm:$0xff] }
  0x88   :  { %4333 = vmatprep.subr.bf16.mxu1 %v7713_v39  ;;  %v7771_v39 = vpack.c.bf16 %v790_v38, %v782_v62  ;;  %v806_v62 = vld [vmem:[%s9534_s2 + $0x3f0] sm:$0xff]  ;;  %v813_v38 = vld [vmem:[%s9534_s2 + $0x428] sm:$0xff]  ;;  %v7803_v3 = vpack.c.bf16 %v804_v10, %v796_v37  ;;  %v7821_v10 = vpack.c.bf16 %v823_v29, %v815_v14  ;;  %v839_v14 = vld [vmem:[%s9534_s2 + $0x4f8] sm:$0xff] }
  0x89   :  { %9929 = vst [vmem:[#allocation97_spill] sm:$0xff] %v7773_v61  ;;  %v814_v37 = vld [vmem:[%s9534_s2 + $0x430] sm:$0xff] }
  0x8a   :  { %4271 = vmatpush1.bf16.msra.mxu0 %v7731_v45  ;;  %9928 = vst [vmem:[#allocation96_spill] sm:$0xff] %v7771_v39  ;;  %9931 = vst [vmem:[#allocation99_spill] sm:$0xff] %v7803_v3  ;;  %v820_v45 = vld [vmem:[%s9534_s2 + $0x460] sm:$0xff] }
  0x8b   :  { %4335 = vmatpush1.bf16.msra.mxu1 %v7735_v46  ;;  %4273 = vmatprep.subr.bf16.mxu0 %v7737_v13  ;;  %v7809_v13 = vpack.c.bf16 %v821_v26, %v813_v38  ;;  %v812_v46 = vld [vmem:[%s9534_s2 + $0x420] sm:$0xff]  ;;  %9934 = vst [vmem:[#allocation102_spill] sm:$0xff] %v7821_v10  ;;  %v837_v38 = vld [vmem:[%s9534_s2 + $0x4e8] sm:$0xff]  ;;  %v831_v26 = vld [vmem:[%s9534_s2 + $0x4b8] sm:$0xff] }
  0x8c   :  { %4337 = vmatprep.subr.bf16.mxu1 %v7749_v33  ;;  %v7807_v33 = vpack.c.bf16 %v806_v62, %v798_v54  ;;  %v822_v54 = vld [vmem:[%s9534_s2 + $0x470] sm:$0xff]  ;;  %v829_v62 = vld [vmem:[%s9534_s2 + $0x4a8] sm:$0xff]  ;;  %v7839_v29 = vpack.c.bf16 %v820_v45, %v812_v46  ;;  %v7857_v45 = vpack.c.bf16 %v839_v14, %v831_v26  ;;  %v855_v26 = vld [vmem:[%s9534_s2 + $0x578] sm:$0xff] }
  0x8d   :  { %9933 = vst [vmem:[#allocation101_spill] sm:$0xff] %v7809_v13  ;;  %v830_v46 = vld [vmem:[%s9534_s2 + $0x4b0] sm:$0xff] }
  0x8e   :  { %4275 = vmatpush1.bf16.msra.mxu0 %v7767_v47  ;;  %9932 = vst [vmem:[#allocation100_spill] sm:$0xff] %v7807_v33  ;;  %9935 = vst [vmem:[#allocation103_spill] sm:$0xff] %v7839_v29  ;;  %v836_v47 = vld [vmem:[%s9534_s2 + $0x4e0] sm:$0xff] }
  0x8f   :  { %4339 = vmatpush1.bf16.msra.mxu1 %v7771_v39  ;;  %4277 = vmatprep.subr.bf16.mxu0 %v7773_v61  ;;  %v7845_v61 = vpack.c.bf16 %v837_v38, %v829_v62  ;;  %v828_v39 = vld [vmem:[%s9534_s2 + $0x4a0] sm:$0xff]  ;;  %9938 = vst [vmem:[#allocation106_spill] sm:$0xff] %v7857_v45  ;;  %v853_v62 = vld [vmem:[%s9534_s2 + $0x568] sm:$0xff]  ;;  %v847_v38 = vld [vmem:[%s9534_s2 + $0x538] sm:$0xff] }
  0x90   :  { %4341 = vmatprep.subr.bf16.mxu1 %v7785_v44  ;;  %v7843_v44 = vpack.c.bf16 %v822_v54, %v814_v37  ;;  %v838_v37 = vld [vmem:[%s9534_s2 + $0x4f0] sm:$0xff]  ;;  %v845_v54 = vld [vmem:[%s9534_s2 + $0x528] sm:$0xff]  ;;  %v7875_v14 = vpack.c.bf16 %v836_v47, %v828_v39  ;;  %v7893_v47 = vpack.c.bf16 %v855_v26, %v847_v38  ;;  %v871_v38 = vld [vmem:[%s9534_s2 + $0x5f8] sm:$0xff] }
  0x91   :  { %9937 = vst [vmem:[#allocation105_spill] sm:$0xff] %v7845_v61  ;;  %v846_v39 = vld [vmem:[%s9534_s2 + $0x530] sm:$0xff] }
  0x92   :  { %4279 = vmatpush1.bf16.msra.mxu0 %v7803_v3  ;;  %9936 = vst [vmem:[#allocation104_spill] sm:$0xff] %v7843_v44  ;;  %9939 = vst [vmem:[#allocation107_spill] sm:$0xff] %v7875_v14  ;;  %v852_v3 = vld [vmem:[%s9534_s2 + $0x560] sm:$0xff] }
  0x93   :  { %4343 = vmatpush1.bf16.msra.mxu1 %v7807_v33  ;;  %4281 = vmatprep.subr.bf16.mxu0 %v7809_v13  ;;  %v7881_v13 = vpack.c.bf16 %v853_v62, %v845_v54  ;;  %v844_v33 = vld [vmem:[%s9534_s2 + $0x520] sm:$0xff]  ;;  %9942 = vst [vmem:[#allocation110_spill] sm:$0xff] %v7893_v47  ;;  %v869_v54 = vld [vmem:[%s9534_s2 + $0x5e8] sm:$0xff]  ;;  %v863_v62 = vld [vmem:[%s9534_s2 + $0x5b8] sm:$0xff] }
  0x94   :  { %4345 = vmatprep.subr.bf16.mxu1 %v7821_v10  ;;  %v7879_v10 = vpack.c.bf16 %v838_v37, %v830_v46  ;;  %v854_v46 = vld [vmem:[%s9534_s2 + $0x570] sm:$0xff]  ;;  %v861_v37 = vld [vmem:[%s9534_s2 + $0x5a8] sm:$0xff]  ;;  %v7911_v26 = vpack.c.bf16 %v852_v3, %v844_v33  ;;  %v7929_v3 = vpack.c.bf16 %v871_v38, %v863_v62  ;;  %v887_v62 = vld [vmem:[%s9534_s2 + $0x678] sm:$0xff] }
  0x95   :  { %9941 = vst [vmem:[#allocation109_spill] sm:$0xff] %v7881_v13  ;;  %v862_v33 = vld [vmem:[%s9534_s2 + $0x5b0] sm:$0xff] }
  0x96   :  { %4283 = vmatpush1.bf16.msra.mxu0 %v7839_v29  ;;  %9940 = vst [vmem:[#allocation108_spill] sm:$0xff] %v7879_v10  ;;  %9943 = vst [vmem:[#allocation111_spill] sm:$0xff] %v7911_v26  ;;  %v868_v29 = vld [vmem:[%s9534_s2 + $0x5e0] sm:$0xff] }
  0x97   :  { %4347 = vmatpush1.bf16.msra.mxu1 %v7843_v44  ;;  %4285 = vmatprep.subr.bf16.mxu0 %v7845_v61  ;;  %v7917_v61 = vpack.c.bf16 %v869_v54, %v861_v37  ;;  %v860_v44 = vld [vmem:[%s9534_s2 + $0x5a0] sm:$0xff]  ;;  %9946 = vst [vmem:[#allocation114_spill] sm:$0xff] %v7929_v3  ;;  %v885_v37 = vld [vmem:[%s9534_s2 + $0x668] sm:$0xff]  ;;  %v879_v54 = vld [vmem:[%s9534_s2 + $0x638] sm:$0xff] }
  0x98   :  { %4349 = vmatprep.subr.bf16.mxu1 %v7857_v45  ;;  %v7915_v45 = vpack.c.bf16 %v854_v46, %v846_v39  ;;  %v870_v39 = vld [vmem:[%s9534_s2 + $0x5f0] sm:$0xff]  ;;  %v877_v46 = vld [vmem:[%s9534_s2 + $0x628] sm:$0xff]  ;;  %v7947_v38 = vpack.c.bf16 %v868_v29, %v860_v44  ;;  %v7965_v29 = vpack.c.bf16 %v887_v62, %v879_v54  ;;  %v903_v54 = vld [vmem:[%s9534_s2 + $0x6f8] sm:$0xff] }
  0x99   :  { %9945 = vst [vmem:[#allocation113_spill] sm:$0xff] %v7917_v61  ;;  %v878_v44 = vld [vmem:[%s9534_s2 + $0x630] sm:$0xff] }
  0x9a   :  { %4287 = vmatpush1.bf16.msra.mxu0 %v7875_v14  ;;  %9944 = vst [vmem:[#allocation112_spill] sm:$0xff] %v7915_v45  ;;  %9947 = vst [vmem:[#allocation115_spill] sm:$0xff] %v7947_v38  ;;  %v884_v14 = vld [vmem:[%s9534_s2 + $0x660] sm:$0xff] }
  0x9b   :  { %4351 = vmatpush1.bf16.msra.mxu1 %v7879_v10  ;;  %4289 = vmatprep.subr.bf16.mxu0 %v7881_v13  ;;  %v7953_v13 = vpack.c.bf16 %v885_v37, %v877_v46  ;;  %v876_v10 = vld [vmem:[%s9534_s2 + $0x620] sm:$0xff]  ;;  %9950 = vst [vmem:[#allocation118_spill] sm:$0xff] %v7965_v29  ;;  %v901_v46 = vld [vmem:[%s9534_s2 + $0x6e8] sm:$0xff]  ;;  %v895_v37 = vld [vmem:[%s9534_s2 + $0x6b8] sm:$0xff] }
  0x9c   :  { %4353 = vmatprep.subr.bf16.mxu1 %v7893_v47  ;;  %v7951_v47 = vpack.c.bf16 %v870_v39, %v862_v33  ;;  %v886_v33 = vld [vmem:[%s9534_s2 + $0x670] sm:$0xff]  ;;  %v893_v39 = vld [vmem:[%s9534_s2 + $0x6a8] sm:$0xff]  ;;  %v7983_v62 = vpack.c.bf16 %v884_v14, %v876_v10  ;;  %v8001_v14 = vpack.c.bf16 %v903_v54, %v895_v37  ;;  %v919_v37 = vld [vmem:[%s9534_s2 + $0x778] sm:$0xff] }
  0x9d   :  { %9949 = vst [vmem:[#allocation117_spill] sm:$0xff] %v7953_v13  ;;  %v894_v10 = vld [vmem:[%s9534_s2 + $0x6b0] sm:$0xff] }
  0x9e   :  { %4291 = vmatpush1.bf16.msra.mxu0 %v7911_v26  ;;  %9948 = vst [vmem:[#allocation116_spill] sm:$0xff] %v7951_v47  ;;  %9951 = vst [vmem:[#allocation119_spill] sm:$0xff] %v7983_v62  ;;  %v900_v26 = vld [vmem:[%s9534_s2 + $0x6e0] sm:$0xff] }
  0x9f   :  { %4355 = vmatpush1.bf16.msra.mxu1 %v7915_v45  ;;  %4293 = vmatprep.subr.bf16.mxu0 %v7917_v61  ;;  %v7989_v61 = vpack.c.bf16 %v901_v46, %v893_v39  ;;  %v892_v45 = vld [vmem:[%s9534_s2 + $0x6a0] sm:$0xff]  ;;  %9954 = vst [vmem:[#allocation122_spill] sm:$0xff] %v8001_v14  ;;  %v917_v39 = vld [vmem:[%s9534_s2 + $0x768] sm:$0xff]  ;;  %v911_v46 = vld [vmem:[%s9534_s2 + $0x738] sm:$0xff] }
  0xa0   :  { %4357 = vmatprep.subr.bf16.mxu1 %v7929_v3  ;;  %v7987_v3 = vpack.c.bf16 %v886_v33, %v878_v44  ;;  %v902_v44 = vld [vmem:[%s9534_s2 + $0x6f0] sm:$0xff]  ;;  %v909_v33 = vld [vmem:[%s9534_s2 + $0x728] sm:$0xff]  ;;  %v8019_v54 = vpack.c.bf16 %v900_v26, %v892_v45  ;;  %v8037_v26 = vpack.c.bf16 %v919_v37, %v911_v46  ;;  %v935_v46 = vld [vmem:[%s9534_s2 + $0x7f8] sm:$0xff] }
  0xa1   :  { %9953 = vst [vmem:[#allocation121_spill] sm:$0xff] %v7989_v61  ;;  %v910_v45 = vld [vmem:[%s9534_s2 + $0x730] sm:$0xff] }
  0xa2   :  { %4295 = vmatpush1.bf16.msra.mxu0 %v7947_v38  ;;  %9952 = vst [vmem:[#allocation120_spill] sm:$0xff] %v7987_v3  ;;  %9955 = vst [vmem:[#allocation123_spill] sm:$0xff] %v8019_v54  ;;  %v916_v38 = vld [vmem:[%s9534_s2 + $0x760] sm:$0xff] }
  0xa3   :  { %4359 = vmatpush1.bf16.msra.mxu1 %v7951_v47  ;;  %4297 = vmatprep.subr.bf16.mxu0 %v7953_v13  ;;  %v8025_v13 = vpack.c.bf16 %v917_v39, %v909_v33  ;;  %v908_v47 = vld [vmem:[%s9534_s2 + $0x720] sm:$0xff]  ;;  %9958 = vst [vmem:[#allocation126_spill] sm:$0xff] %v8037_v26  ;;  %v933_v33 = vld [vmem:[%s9534_s2 + $0x7e8] sm:$0xff]  ;;  %v927_v39 = vld [vmem:[%s9534_s2 + $0x7b8] sm:$0xff] }
  0xa4   :  { %4361 = vmatprep.subr.bf16.mxu1 %v7965_v29  ;;  %v8023_v29 = vpack.c.bf16 %v902_v44, %v894_v10  ;;  %v918_v10 = vld [vmem:[%s9534_s2 + $0x770] sm:$0xff]  ;;  %v925_v44 = vld [vmem:[%s9534_s2 + $0x7a8] sm:$0xff]  ;;  %v8055_v37 = vpack.c.bf16 %v916_v38, %v908_v47  ;;  %v8070_v47 = vpack.c.bf16 %v935_v46, %v927_v39  ;;  %v9970_v46 = vld [vmem:[#allocation56_spill] sm:$0xff] }
  0xa5   :  { %9957 = vst [vmem:[#allocation125_spill] sm:$0xff] %v8025_v13  ;;  %v926_v38 = vld [vmem:[%s9534_s2 + $0x7b0] sm:$0xff] }
  0xa6   :  { %4299 = vmatpush1.bf16.msra.mxu0 %v7983_v62  ;;  %9956 = vst [vmem:[#allocation124_spill] sm:$0xff] %v8023_v29  ;;  %9959 = vst [vmem:[#allocation127_spill] sm:$0xff] %v8055_v37  ;;  %v932_v62 = vld [vmem:[%s9534_s2 + $0x7e0] sm:$0xff]  ;;  %v9969_v39 = vld [vmem:[#allocation55_spill] sm:$0xff] }
  0xa7   :  { %4363 = vmatpush1.bf16.msra.mxu1 %v7987_v3  ;;  %4301 = vmatprep.subr.bf16.mxu0 %v7989_v61  ;;  %v8061_v61 = vpack.c.bf16 %v933_v33, %v925_v44  ;;  %v924_v3 = vld [vmem:[%s9534_s2 + $0x7a0] sm:$0xff]  ;;  %9962 = vst [vmem:[#allocation130_spill] sm:$0xff] %v8070_v47  ;;  %v9968_v33 = vld [vmem:[#allocation54_spill] sm:$0xff] }
  0xa8   :  { %4365 = vmatprep.subr.bf16.mxu1 %v8001_v14  ;;  %v8059_v14 = vpack.c.bf16 %v918_v10, %v910_v45  ;;  %v934_v45 = vld [vmem:[%s9534_s2 + $0x7f0] sm:$0xff]  ;;  %v8079_v10 = vpack.c.bf16 %v932_v62, %v924_v3  ;;  %v9966_v3 = vld [vmem:[#allocation52_spill] sm:$0xff]  ;;  %v9967_v62 = vld [vmem:[#allocation53_spill] sm:$0xff] }
  0xa9   :  { %9961 = vst [vmem:[#allocation129_spill] sm:$0xff] %v8061_v61  ;;  %v8083_v44 = vpack.c.bf16 %v934_v45, %v926_v38  ;;  %v9971_v38 = vld [vmem:[#allocation57_spill] sm:$0xff]  ;;  %v9972_v45 = vld [vmem:[#allocation58_spill] sm:$0xff] }
  0xaa   :  { %4303 = vmatpush1.bf16.msra.mxu0 %v8019_v54  ;;  %9960 = vst [vmem:[#allocation128_spill] sm:$0xff] %v8059_v14  ;;  %9963 = vst [vmem:[#allocation131_spill] sm:$0xff] %v8079_v10 }
  0xab   :  { %4367 = vmatpush1.bf16.msra.mxu1 %v8023_v29  ;;  %4305 = vmatprep.subr.bf16.mxu0 %v8025_v13  ;;  %9964 = vst [vmem:[#allocation132_spill] sm:$0xff] %v8083_v44 }
  0xac   :  { %4369 = vmatprep.subr.bf16.mxu1 %v8037_v26 }
  0xae   :  { %4307 = vmatpush1.bf16.msra.mxu0 %v8055_v37 }
  0xaf   :  { %4371 = vmatpush1.bf16.msra.mxu1 %v8059_v14  ;;  %4309 = vmatprep.subr.bf16.mxu0 %v8061_v61 }
  0xb0   :  { %4373 = vmatprep.subr.bf16.mxu1 %v8070_v47 }
  0xb2   :  { %4311 = vmatpush1.bf16.msra.mxu0 %v8079_v10 }
  0xb3   :  { %4375 = vmatpush1.bf16.msra.mxu1 %v8083_v44  ;;  %4377 = vmatprep.subr.bf16.mxu0 %v6846_v42 }
  0xb4   :  { %4441 = vmatprep.subr.bf16.mxu1 %v6850_v43 }
  0xb5   :  { %1155 = vmatmul.mubr.f32.vlgmr.msra.gmra.mrb[16].mxu0 %v9906_v27 }
  0xb6   :  { %1226 = vmatmul.mubr.f32.vlgmr.msra.gmra.mrb[16].mxu1 %v9906_v27  ;;  %4379 = vmatpush1.bf16.msra.mxu0 %v6925_v56  ;;  %v9965_v27 = vld [vmem:[#allocation51_spill] sm:$0xff] }
  0xb7   :  { %4443 = vmatpush1.bf16.msra.mxu1 %v6928_v57  ;;  %4381 = vmatprep.subr.bf16.mxu0 %v6930_v58 }
  0xb8   :  { %4445 = vmatprep.subr.bf16.mxu1 %v6941_v63 }
  0xba   :  { %4383 = vmatpush1.bf16.msra.mxu0 %v6963_v6 }
  0xbb   :  { %4447 = vmatpush1.bf16.msra.mxu1 %v6967_v7  ;;  %4385 = vmatprep.subr.bf16.mxu0 %v6969_v8 }
  0xbc   :  { %4449 = vmatprep.subr.bf16.mxu1 %v6981_v12 }
  0xbe   :  { %4387 = vmatpush1.bf16.msra.mxu0 %v7003_v18 }
  0xbf   :  { %4451 = vmatpush1.bf16.msra.mxu1 %v7009_v19  ;;  %4389 = vmatprep.subr.bf16.mxu0 %v7011_v20 }
  0xc0   :  { %4453 = vmatprep.subr.bf16.mxu1 %v7023_v23 }
  0xc2   :  { %4391 = vmatpush1.bf16.msra.mxu0 %v7045_v30 }
  0xc3   :  { %4455 = vmatpush1.bf16.msra.mxu1 %v7051_v31  ;;  %4393 = vmatprep.subr.bf16.mxu0 %v7053_v32 }
  0xc4   :  { %4457 = vmatprep.subr.bf16.mxu1 %v7065_v35 }
  0xc6   :  { %4395 = vmatpush1.bf16.msra.mxu0 %v7087_v48 }
  0xc7   :  { %4459 = vmatpush1.bf16.msra.mxu1 %v7093_v49  ;;  %4397 = vmatprep.subr.bf16.mxu0 %v7095_v50 }
  0xc8   :  { %4461 = vmatprep.subr.bf16.mxu1 %v7107_v53 }
  0xca   :  { %4399 = vmatpush1.bf16.msra.mxu0 %v7129_v0 }
  0xcb   :  { %4463 = vmatpush1.bf16.msra.mxu1 %v7135_v1  ;;  %4401 = vmatprep.subr.bf16.mxu0 %v7137_v2 }
  0xcc   :  { %4465 = vmatprep.subr.bf16.mxu1 %v7149_v9 }
  0xce   :  { %4403 = vmatpush1.bf16.msra.mxu0 %v7171_v16 }
  0xcf   :  { %4467 = vmatpush1.bf16.msra.mxu1 %v7177_v17  ;;  %4405 = vmatprep.subr.bf16.mxu0 %v7179_v21 }
  0xd0   :  { %4469 = vmatprep.subr.bf16.mxu1 %v7191_v25 }
  0xd2   :  { %4407 = vmatpush1.bf16.msra.mxu0 %v7213_v34 }
  0xd3   :  { %4471 = vmatpush1.bf16.msra.mxu1 %v7219_v24  ;;  %4409 = vmatprep.subr.bf16.mxu0 %v7221_v36 }
  0xd4   :  { %4473 = vmatprep.subr.bf16.mxu1 %v7233_v40 }
  0xd6   :  { %4411 = vmatpush1.bf16.msra.mxu0 %v7255_v55 }
  0xd7   :  { %4475 = vmatpush1.bf16.msra.mxu1 %v7261_v59  ;;  %4413 = vmatprep.subr.bf16.mxu0 %v7263_v60 }
  0xd8   :  { %4477 = vmatprep.subr.bf16.mxu1 %v7275_v5 }
  0xda   :  { %4415 = vmatpush1.bf16.msra.mxu0 %v7295_v15 }
  0xdb   :  { %4479 = vmatpush1.bf16.msra.mxu1 %v7299_v22  ;;  %4417 = vmatprep.subr.bf16.mxu0 %v7301_v11 }
  0xdc   :  { %4481 = vmatprep.subr.bf16.mxu1 %v7313_v28  ;;  %v99_v28 = vlaneseq }
  0xde   :  { %4419 = vmatpush1.bf16.msra.mxu0 %v7331_v41 }
  0xdf   :  { %4483 = vmatpush1.bf16.msra.mxu1 %v7335_v51  ;;  %4421 = vmatprep.subr.bf16.mxu0 %v7337_v52  ;;  %v9973_v51 = vld [vmem:[#allocation59_spill] sm:$0xff]  ;;  %v9974_v52 = vld [vmem:[#allocation60_spill] sm:$0xff] }
  0xe0   :  { %4485 = vmatprep.subr.bf16.mxu1 %v7349_v4  ;;  %v9975_v4 = vld [vmem:[#allocation61_spill] sm:$0xff] }
  0xe2   :  { %4423 = vmatpush1.bf16.msra.mxu0 %v9965_v27  ;;  %v9976_v27 = vld [vmem:[#allocation62_spill] sm:$0xff] }
  0xe3   :  { %4487 = vmatpush1.bf16.msra.mxu1 %v9966_v3  ;;  %4425 = vmatprep.subr.bf16.mxu0 %v9967_v62  ;;  %v9977_v3 = vld [vmem:[#allocation63_spill] sm:$0xff]  ;;  %v9978_v62 = vld [vmem:[#allocation64_spill] sm:$0xff] }
  0xe4   :  { %4489 = vmatprep.subr.bf16.mxu1 %v9968_v33  ;;  %v9979_v33 = vld [vmem:[#allocation65_spill] sm:$0xff] }
  0xe6   :  { %4427 = vmatpush1.bf16.msra.mxu0 %v9969_v39  ;;  %v9980_v39 = vld [vmem:[#allocation66_spill] sm:$0xff] }
  0xe7   :  { %4491 = vmatpush1.bf16.msra.mxu1 %v9970_v46  ;;  %4429 = vmatprep.subr.bf16.mxu0 %v9971_v38  ;;  %v9981_v46 = vld [vmem:[#allocation67_spill] sm:$0xff]  ;;  %v9982_v38 = vld [vmem:[#allocation68_spill] sm:$0xff] }
  0xe8   :  { %4493 = vmatprep.subr.bf16.mxu1 %v9972_v45  ;;  %v9983_v45 = vld [vmem:[#allocation69_spill] sm:$0xff] }
  0xea   :  { %4431 = vmatpush1.bf16.msra.mxu0 %v9973_v51  ;;  %v9984_v51 = vld [vmem:[#allocation70_spill] sm:$0xff] }
  0xeb   :  { %4495 = vmatpush1.bf16.msra.mxu1 %v9974_v52  ;;  %4433 = vmatprep.subr.bf16.mxu0 %v9975_v4 }
  0xec   :  { %4497 = vmatprep.subr.bf16.mxu1 %v9976_v27 }
  0xee   :  { %4435 = vmatpush1.bf16.msra.mxu0 %v9977_v3  ;;  %v100_v3 = vshrl.u32 %v99_v28, 7 }
  0xef   :  { %4499 = vmatpush1.bf16.msra.mxu1 %v9978_v62  ;;  %4437 = vmatprep.subr.bf16.mxu0 %v9979_v33  ;;  %v97_v33 = vld [vmem:[%s9535_s3] sm:$0xff] }
  0xf0   :  { %4501 = vmatprep.subr.bf16.mxu1 %v9980_v39  ;;  %v101_v11 = vsub.s32 0, %v100_v3  ;;  %v109_v39 = vsub.s32 2, %v100_v3  ;;  %v105_v62 = vsub.s32 1, %v100_v3  ;;  %v125_v24 = vsub.s32 6, %v100_v3 }
  0xf2   :  { %4439 = vmatpush1.bf16.msra.mxu0 %v9981_v46  ;;  %v113_v46 = vsub.s32 3, %v100_v3  ;;  %v8159_v22 = vrot.slane %v97_v33, %v101_v11 }
  0xf3   :  { %4503 = vmatpush1.bf16.msra.mxu1 %v9982_v38  ;;  %4505 = vmatprep.subr.bf16.mxu0 %v9983_v45  ;;  %v8161_v38 = vrot.slane %v97_v33, %v109_v39  ;;  %v8163_v45 = vrot.slane %v97_v33, %v105_v62  ;;  %v117_v39 = vsub.s32 4, %v100_v3 }
  0xf4   :  { %4569 = vmatprep.subr.bf16.mxu1 %v9984_v51  ;;  %9985 = vst [vmem:[#allocation133_spill] sm:$0xff] %v8159_v22  ;;  %v8165_v51 = vrot.slane %v97_v33, %v113_v46 }
  0xf5   :  { %9986 = vst [vmem:[#allocation134_spill] sm:$0xff] %v8161_v38  ;;  %9987 = vst [vmem:[#allocation135_spill] sm:$0xff] %v8163_v45 }
  0xf6   :  { %9988 = vst [vmem:[#allocation136_spill] sm:$0xff] %v8165_v51 }
 0x148   :  { %v1014_v52 = vpop.f32.mrb[0].mxu0 }
 0x149   :  { %v1085_v4 = vpop.f32.mrb[0].mxu1  ;;  %v1016_v41 = vpop.f32.mrb[1].mxu0  ;;  %v6168_v15 = vadd.f32 %v1014_v52, %v8159_v22  ;;  %v121_v52 = vsub.s32 5, %v100_v3 }
 0x14a   :  { %v1087_v27 = vpop.f32.mrb[1].mxu1  ;;  %v6184_v28 = vadd.f32 %v1085_v4, %v8161_v38  ;;  %v6169_v5 = vadd.f32 %v1016_v41, %v8163_v45  ;;  %v129_v38 = vsub.s32 7, %v100_v3 }
 0x14b   :  { %v6185_v60 = vadd.f32 %v1087_v27, %v8165_v51  ;;  %v3986_v59 = vmul.f32 -1.442695, %v6168_v15  ;;  %v8171_v27 = vrot.slane %v97_v33, %v117_v39  ;;  %v8186_v39 = vld [vmem:[%s9536_s4 + $0x8] sm:$0xff] }
 0x14c   :  { %v3988_v55 = vmul.f32 -1.442695, %v6184_v28  ;;  %v3987_v40 = vmul.f32 -1.442695, %v6169_v5  ;;  %v8173_v5 = vrot.slane %v97_v33, %v125_v24  ;;  %9989 = vst [vmem:[#allocation137_spill] sm:$0xff] %v8186_v39  ;;  %vm1300_vm1 = vcmp.le.s32.totalorder %v8186_v39, 0 }
 0x14d   :  { %v3989_v36 = vmul.f32 -1.442695, %v6185_v60  ;;  %6297 = vpow2.f32 %v3986_v59  ;;  %v8175_v59 = vrot.slane %v97_v33, %v121_v52 }
 0x14e   :  { %6299 = vpow2.f32 %v3988_v55 }
 0x14f   :  { %6301 = vpow2.f32 %v3987_v40 }
 0x150   :  { %6303 = vpow2.f32 %v3989_v36  ;;  %v8177_v36 = vrot.slane %v97_v33, %v129_v38 }
 0x157   :  { %v6298_v11 = vpop.eup %6297 }
 0x158   :  { %v6300_v62 = vpop.eup %6299  ;;  %v1257_v4 = vadd.f32 1.0, %v6298_v11 }
 0x159   :  { %v6302_v46 = vpop.eup %6301  ;;  %v1269_v41 = vadd.f32 1.0, %v6300_v62 }
 0x15a   :  { %v6304_v22 = vpop.eup %6303  ;;  %v1258_v45 = vadd.f32 1.0, %v6302_v46  ;;  %6305 = vrcp.f32 %v1257_v4  ;;  %v8191_v46 = vld [vmem:[%s9537_s5 + $0x8] sm:$0xff] }
 0x15b   :  { %v1270_v15 = vadd.f32 1.0, %v6304_v22  ;;  %6307 = vrcp.f32 %v1269_v41  ;;  %vm1302_vm2 = vcmp.gt.s32.totalorder %v8191_v46, 0  ;;  %vm1675_vm10 = vcmp.gt.s32.totalorder %v8191_v46, 1 }
 0x15c   :  { %6309 = vrcp.f32 %v1258_v45  ;;  %vm8197_vm3 = vmand %vm1300_vm1, %vm1302_vm2  ;;  %vm2049_vm0 = vcmp.gt.s32.totalorder %v8191_v46, 2 }
 0x15d   :  { %6311 = vrcp.f32 %v1270_v15 }
 0x164   :  { %v6306_v38 = vpop.eup %6305 }
 0x165   :  { %v6308_v45 = vpop.eup %6307 }
 0x166   :  { %v6310_v52 = vpop.eup %6309 }
 0x167   :  { %v6312_v4 = vpop.eup %6311 }
 0x188   :  { %v1156_v40 = vpop.f32.mrb[16].mxu0 }
 0x189   :  { %v6200_v55 = vadd.f32 %v1156_v40, %v8171_v27  ;;  %v1227_v60 = vpop.f32.mrb[16].mxu1  ;;  %v1158_v28 = vpop.f32.mrb[17].mxu0  ;;  %v1289_v40 = vmul.f32 0.0, %v6308_v45 }
 0x18a   :  { %v6216_v3 = vadd.f32 %v1227_v60, %v8173_v5  ;;  %v6201_v11 = vadd.f32 %v1158_v28, %v8175_v59  ;;  %v1229_v22 = vpop.f32.mrb[17].mxu1  ;;  %v1290_v60 = vmul.f32 0.0, %v6312_v4 }
 0x18b   :  { %6313 = vtanh.f32 %v6200_v55  ;;  %v6217_v24 = vadd.f32 %v1229_v22, %v8177_v36  ;;  %v10007_v22 = vld [vmem:[#allocation82_spill] sm:$0xff] }
 0x18c   :  { %v3990_v62 = vmul.f32 -1.442695, %v6216_v3  ;;  %6315 = vtanh.f32 %v6201_v11 }
 0x18d   :  { %v3991_v33 = vmul.f32 -1.442695, %v6217_v24 }
 0x18e   :  { %6317 = vpow2.f32 %v3990_v62 }
 0x18f   :  { %6319 = vpow2.f32 %v3991_v33 }
 0x195   :  { %v6314_v41 = vpop.eup %6313 }
 0x196   :  { %v6316_v15 = vpop.eup %6315  ;;  %v1291_v55 = vmul.f32 %v6314_v41, %v6306_v38  ;;  %v8209_v38 = vld [vmem:[%s9536_s4] sm:$0xff] }
 0x197   :  { %v1292_v28 = vmul.f32 %v6316_v15, %v6310_v52  ;;  %v8214_v52 = vld [vmem:[%s9537_s5] sm:$0xff]  ;;  %vm1299_vm4 = vcmp.le.s32.totalorder %v8209_v38, 0  ;;  %vm1672_vm7 = vcmp.le.s32.totalorder %v8209_v38, 1  ;;  %vm2046_vm13 = vcmp.le.s32.totalorder %v8209_v38, 2  ;;  %v10203_v38 = vld [vmem:[#allocation86_spill] sm:$0xff] }
 0x198   :  { %v6318_v3 = vpop.eup %6317  ;;  %v8195_v11 = vadd.f32 %v1291_v55, %v1289_v40  ;;  %vm1301_vm5 = vcmp.gt.s32.totalorder %v8214_v52, 0  ;;  %vm1674_vm8 = vcmp.gt.s32.totalorder %v8214_v52, 1  ;;  %vm2048_vm14 = vcmp.gt.s32.totalorder %v8214_v52, 2 }
 0x199   :  { %v6320_v24 = vpop.eup %6319  ;;  %v1283_v62 = vadd.f32 1.0, %v6318_v3  ;;  %v1294_v33 = vadd.f32 %v1292_v28, %v1290_v60  ;;  %vm8220_vm6 = vmand %vm1299_vm4, %vm1301_vm5 }
 0x19a   :  { %6321 = vtanh.f32 %v8195_v11  ;;  %v1284_v39 = vadd.f32 1.0, %v6320_v24  ;;  %v9996_v24 = vld [vmem:[#allocation71_spill] sm:$0xff]  ;;  %vm8405_vm11 = vmand %vm1672_vm7, %vm1674_vm8 }
 0x19b   :  { %6323 = vrcp.f32 %v1283_v62  ;;  %v8204_v45 = vsel %vm8197_vm3, %v1294_v33, 0.0  ;;  %v9997_v62 = vld [vmem:[#allocation72_spill] sm:$0xff]  ;;  %vm8592_vm1 = vmand %vm2046_vm13, %vm2048_vm14 }
 0x19c   :  { %6325 = vtanh.f32 %v1294_v33  ;;  %v9998_v33 = vld [vmem:[#allocation73_spill] sm:$0xff] }
 0x19d   :  { %6327 = vrcp.f32 %v1284_v39 }
 0x1a4   :  { %v6322_v4 = vpop.eup %6321 }
 0x1a5   :  { %v6324_v41 = vpop.eup %6323 }
 0x1a6   :  { %v6326_v15 = vpop.eup %6325  ;;  %v8218_v40 = vmul.f32 %v6324_v41, %v6322_v4  ;;  %v9999_v4 = vld [vmem:[#allocation74_spill] sm:$0xff]  ;;  %v10000_v41 = vld [vmem:[#allocation75_spill] sm:$0xff] }
 0x1a7   :  { %v6328_v39 = vpop.eup %6327 }
 0x1a8   :  { %v1298_v60 = vmul.f32 %v6328_v39, %v6326_v15  ;;  %v8227_v28 = vsel %vm8220_vm6, %v8218_v40, 0.0  ;;  %v10001_v15 = vld [vmem:[#allocation76_spill] sm:$0xff]  ;;  %v10002_v39 = vld [vmem:[#allocation77_spill] sm:$0xff] }
 0x1a9   :  { %9994 = vst [vmem:[#allocation138_spill] sm:$0xff] %v8227_v28  ;;  %1315 = vst [vmem:[%s9538_s6] sm:$0xff] %v8227_v28  ;;  %v10003_v28 = vld [vmem:[#allocation78_spill] sm:$0xff] }
 0x1aa   :  { %4048 = vmatprep.mubr.msk.f32.mxu0 %vm8197_vm3, %v1298_v60  ;;  %4050 = vmatprep.mubr.msk.f32.mxu1 %vm8197_vm3, %v1298_v60  ;;  %v8239_v3 = vsel %vm8197_vm3, %v1298_v60, 0.0 }
 0x1ab   :  { %9995 = vst [vmem:[#allocation139_spill] sm:$0xff] %v8239_v3  ;;  %4049 = vmatmul.mubr.msk.f32.vlgmr.msra.gmra.mrb[2].mxu0 %vm8220_vm6, %v8218_v40  ;;  %4051 = vmatmul.mubr.msk.f32.vlgmr.msra.gmra.mrb[2].mxu1 %vm8220_vm6, %v8218_v40  ;;  %1316 = vst [vmem:[%s9538_s6 + $0x8] sm:$0xff] %v8239_v3  ;;  %v10006_v3 = vld [vmem:[#allocation81_spill] sm:$0xff] }
 0x1ac   :  { %4507 = vmatpush1.bf16.msra.mxu0 %v9996_v24  ;;  %4571 = vmatpush1.bf16.msra.mxu1 %v9997_v62  ;;  %v10004_v24 = vld [vmem:[#allocation79_spill] sm:$0xff]  ;;  %v10005_v62 = vld [vmem:[#allocation80_spill] sm:$0xff] }
 0x1ad   :  { %4052 = vmatprep.mubr.msk.f32.mxu0 %vm8197_vm3, %v1298_v60  ;;  %4054 = vmatprep.mubr.msk.f32.mxu1 %vm8197_vm3, %v1298_v60  ;;  %v10008_v60 = vld [vmem:[#allocation83_spill] sm:$0xff] }
 0x1ae   :  { %4509 = vmatprep.subr.bf16.mxu0 %v9998_v33  ;;  %4573 = vmatprep.subr.bf16.mxu1 %v9999_v4  ;;  %v10009_v33 = vld [vmem:[#allocation84_spill] sm:$0xff]  ;;  %v10010_v4 = vld [vmem:[#allocation85_spill] sm:$0xff] }
 0x1b0   :  { %4511 = vmatpush1.bf16.msra.mxu0 %v10000_v41  ;;  %4575 = vmatpush1.bf16.msra.mxu1 %v10001_v15  ;;  %v10011_v41 = vld [vmem:[#allocation86_spill] sm:$0xff]  ;;  %v10012_v15 = vld [vmem:[#allocation87_spill] sm:$0xff] }
 0x1b1   :  { %4513 = vmatprep.subr.bf16.mxu0 %v10002_v39  ;;  %4577 = vmatprep.subr.bf16.mxu1 %v10003_v28  ;;  %v10013_v39 = vld [vmem:[#allocation88_spill] sm:$0xff]  ;;  %v10014_v28 = vld [vmem:[#allocation89_spill] sm:$0xff] }
 0x1b4   :  { %4515 = vmatpush1.bf16.msra.mxu0 %v10004_v24  ;;  %4579 = vmatpush1.bf16.msra.mxu1 %v10005_v62  ;;  %v10015_v24 = vld [vmem:[#allocation90_spill] sm:$0xff]  ;;  %v10016_v62 = vld [vmem:[#allocation91_spill] sm:$0xff] }
 0x1b5   :  { %4517 = vmatprep.subr.bf16.mxu0 %v10006_v3  ;;  %4581 = vmatprep.subr.bf16.mxu1 %v10007_v22  ;;  %v10017_v3 = vld [vmem:[#allocation92_spill] sm:$0xff]  ;;  %v10018_v22 = vld [vmem:[#allocation93_spill] sm:$0xff] }
 0x1b8   :  { %4519 = vmatpush1.bf16.msra.mxu0 %v10008_v60  ;;  %4583 = vmatpush1.bf16.msra.mxu1 %v10009_v33  ;;  %v10019_v60 = vld [vmem:[#allocation94_spill] sm:$0xff]  ;;  %v10020_v33 = vld [vmem:[#allocation95_spill] sm:$0xff] }
 0x1b9   :  { %4521 = vmatprep.subr.bf16.mxu0 %v10010_v4  ;;  %4585 = vmatprep.subr.bf16.mxu1 %v10011_v41  ;;  %v10021_v4 = vld [vmem:[#allocation96_spill] sm:$0xff]  ;;  %v10022_v41 = vld [vmem:[#allocation97_spill] sm:$0xff] }
 0x1bc   :  { %4523 = vmatpush1.bf16.msra.mxu0 %v10012_v15  ;;  %4587 = vmatpush1.bf16.msra.mxu1 %v10013_v39  ;;  %v10023_v15 = vld [vmem:[#allocation98_spill] sm:$0xff]  ;;  %v10024_v39 = vld [vmem:[#allocation99_spill] sm:$0xff] }
 0x1bd   :  { %4525 = vmatprep.subr.bf16.mxu0 %v10014_v28  ;;  %4589 = vmatprep.subr.bf16.mxu1 %v10015_v24  ;;  %v10025_v28 = vld [vmem:[#allocation100_spill] sm:$0xff]  ;;  %v10026_v24 = vld [vmem:[#allocation101_spill] sm:$0xff] }
 0x1c0   :  { %4527 = vmatpush1.bf16.msra.mxu0 %v10016_v62  ;;  %4591 = vmatpush1.bf16.msra.mxu1 %v10017_v3  ;;  %v10027_v62 = vld [vmem:[#allocation102_spill] sm:$0xff]  ;;  %v10028_v3 = vld [vmem:[#allocation103_spill] sm:$0xff] }
 0x1c1   :  { %4529 = vmatprep.subr.bf16.mxu0 %v10018_v22  ;;  %4593 = vmatprep.subr.bf16.mxu1 %v10019_v60  ;;  %v10029_v22 = vld [vmem:[#allocation104_spill] sm:$0xff]  ;;  %v10030_v60 = vld [vmem:[#allocation105_spill] sm:$0xff] }
 0x1c4   :  { %4531 = vmatpush1.bf16.msra.mxu0 %v10020_v33  ;;  %4595 = vmatpush1.bf16.msra.mxu1 %v10021_v4  ;;  %v10031_v33 = vld [vmem:[#allocation106_spill] sm:$0xff]  ;;  %v10032_v4 = vld [vmem:[#allocation107_spill] sm:$0xff] }
 0x1c5   :  { %4533 = vmatprep.subr.bf16.mxu0 %v10022_v41  ;;  %4597 = vmatprep.subr.bf16.mxu1 %v10023_v15  ;;  %v10033_v41 = vld [vmem:[#allocation108_spill] sm:$0xff]  ;;  %v10034_v15 = vld [vmem:[#allocation109_spill] sm:$0xff] }
 0x1c8   :  { %4535 = vmatpush1.bf16.msra.mxu0 %v10024_v39  ;;  %4599 = vmatpush1.bf16.msra.mxu1 %v10025_v28  ;;  %v10035_v39 = vld [vmem:[#allocation110_spill] sm:$0xff]  ;;  %v10036_v28 = vld [vmem:[#allocation111_spill] sm:$0xff] }
 0x1c9   :  { %4537 = vmatprep.subr.bf16.mxu0 %v10026_v24  ;;  %4601 = vmatprep.subr.bf16.mxu1 %v10027_v62  ;;  %v10037_v24 = vld [vmem:[#allocation112_spill] sm:$0xff]  ;;  %v10038_v62 = vld [vmem:[#allocation113_spill] sm:$0xff] }
 0x1cc   :  { %4539 = vmatpush1.bf16.msra.mxu0 %v10028_v3  ;;  %4603 = vmatpush1.bf16.msra.mxu1 %v10029_v22  ;;  %v10039_v3 = vld [vmem:[#allocation114_spill] sm:$0xff]  ;;  %v10040_v22 = vld [vmem:[#allocation115_spill] sm:$0xff] }
 0x1cd   :  { %4541 = vmatprep.subr.bf16.mxu0 %v10030_v60  ;;  %4605 = vmatprep.subr.bf16.mxu1 %v10031_v33  ;;  %v10041_v60 = vld [vmem:[#allocation116_spill] sm:$0xff]  ;;  %v10042_v33 = vld [vmem:[#allocation117_spill] sm:$0xff] }
 0x1d0   :  { %4543 = vmatpush1.bf16.msra.mxu0 %v10032_v4  ;;  %4607 = vmatpush1.bf16.msra.mxu1 %v10033_v41  ;;  %v10043_v4 = vld [vmem:[#allocation118_spill] sm:$0xff]  ;;  %v10044_v41 = vld [vmem:[#allocation119_spill] sm:$0xff] }
 0x1d1   :  { %4545 = vmatprep.subr.bf16.mxu0 %v10034_v15  ;;  %4609 = vmatprep.subr.bf16.mxu1 %v10035_v39  ;;  %v10045_v15 = vld [vmem:[#allocation120_spill] sm:$0xff]  ;;  %v10046_v39 = vld [vmem:[#allocation121_spill] sm:$0xff] }
 0x1d4   :  { %4547 = vmatpush1.bf16.msra.mxu0 %v10036_v28  ;;  %4611 = vmatpush1.bf16.msra.mxu1 %v10037_v24  ;;  %v10047_v28 = vld [vmem:[#allocation122_spill] sm:$0xff] }
 0x1d5   :  { %4549 = vmatprep.subr.bf16.mxu0 %v10038_v62  ;;  %4613 = vmatprep.subr.bf16.mxu1 %v10039_v3 }
 0x1d8   :  { %4551 = vmatpush1.bf16.msra.mxu0 %v10040_v22  ;;  %4615 = vmatpush1.bf16.msra.mxu1 %v10041_v60 }
 0x1d9   :  { %4553 = vmatprep.subr.bf16.mxu0 %v10042_v33  ;;  %4617 = vmatprep.subr.bf16.mxu1 %v10043_v4 }
 0x1dc   :  { %4555 = vmatpush1.bf16.msra.mxu0 %v10044_v41  ;;  %4619 = vmatpush1.bf16.msra.mxu1 %v10045_v15 }
 0x1dd   :  { %4557 = vmatprep.subr.bf16.mxu0 %v10046_v39  ;;  %4621 = vmatprep.subr.bf16.mxu1 %v10047_v28 }
 0x1e0   :  { %4559 = vmatpush1.bf16.msra.mxu0 %v8019_v54  ;;  %4623 = vmatpush1.bf16.msra.mxu1 %v8023_v29 }
 0x1e1   :  { %4561 = vmatprep.subr.bf16.mxu0 %v8025_v13  ;;  %4625 = vmatprep.subr.bf16.mxu1 %v8037_v26 }
 0x1e4   :  { %4563 = vmatpush1.bf16.msra.mxu0 %v8055_v37  ;;  %4627 = vmatpush1.bf16.msra.mxu1 %v8059_v14 }
 0x1e5   :  { %4565 = vmatprep.subr.bf16.mxu0 %v8061_v61  ;;  %4629 = vmatprep.subr.bf16.mxu1 %v8070_v47 }
 0x1e8   :  { %4567 = vmatpush1.bf16.msra.mxu0 %v8079_v10  ;;  %4631 = vmatpush1.bf16.msra.mxu1 %v8083_v44 }
 0x1e9   :  { %4633 = vmatprep.subr.bf16.mxu0 %v6846_v42  ;;  %4697 = vmatprep.subr.bf16.mxu1 %v6850_v43 }
 0x1eb   :  { %4053 = vmatmul.mubr.msk.f32.vlgmr.msra.gmra.mrb[18].mxu0 %vm8220_vm6, %v8218_v40  ;;  %4055 = vmatmul.mubr.msk.f32.vlgmr.msra.gmra.mrb[18].mxu1 %vm8220_vm6, %v8218_v40  ;;  %v10048_v40 = vld [vmem:[#allocation36_spill] sm:$0xff] }
 0x1ec   :  { %4635 = vmatpush1.bf16.msra.mxu0 %v6925_v56  ;;  %4699 = vmatpush1.bf16.msra.mxu1 %v6928_v57 }
 0x1ed   :  { %4637 = vmatprep.subr.bf16.mxu0 %v6930_v58  ;;  %4701 = vmatprep.subr.bf16.mxu1 %v6941_v63 }
 0x1f0   :  { %4639 = vmatpush1.bf16.msra.mxu0 %v6963_v6  ;;  %4703 = vmatpush1.bf16.msra.mxu1 %v6967_v7 }
 0x1f1   :  { %4641 = vmatprep.subr.bf16.mxu0 %v6969_v8  ;;  %4705 = vmatprep.subr.bf16.mxu1 %v6981_v12 }
 0x1f4   :  { %4643 = vmatpush1.bf16.msra.mxu0 %v7003_v18  ;;  %4707 = vmatpush1.bf16.msra.mxu1 %v7009_v19 }
 0x1f5   :  { %4645 = vmatprep.subr.bf16.mxu0 %v7011_v20  ;;  %4709 = vmatprep.subr.bf16.mxu1 %v7023_v23 }
 0x1f8   :  { %4647 = vmatpush1.bf16.msra.mxu0 %v7045_v30  ;;  %4711 = vmatpush1.bf16.msra.mxu1 %v7051_v31 }
 0x1f9   :  { %4649 = vmatprep.subr.bf16.mxu0 %v7053_v32  ;;  %4713 = vmatprep.subr.bf16.mxu1 %v7065_v35 }
 0x1fc   :  { %4651 = vmatpush1.bf16.msra.mxu0 %v7087_v48  ;;  %4715 = vmatpush1.bf16.msra.mxu1 %v7093_v49 }
 0x1fd   :  { %4653 = vmatprep.subr.bf16.mxu0 %v7095_v50  ;;  %4717 = vmatprep.subr.bf16.mxu1 %v7107_v53  ;;  %v10049_v53 = vld [vmem:[#allocation37_spill] sm:$0xff]  ;;  %v10083_v50 = vld [vmem:[#allocation134_spill] sm:$0xff] }
 0x200   :  { %4655 = vmatpush1.bf16.msra.mxu0 %v7129_v0  ;;  %4719 = vmatpush1.bf16.msra.mxu1 %v7135_v1  ;;  %v10050_v0 = vld [vmem:[#allocation38_spill] sm:$0xff]  ;;  %v10051_v1 = vld [vmem:[#allocation39_spill] sm:$0xff] }
 0x201   :  { %4657 = vmatprep.subr.bf16.mxu0 %v7137_v2  ;;  %4721 = vmatprep.subr.bf16.mxu1 %v7149_v9  ;;  %v10052_v2 = vld [vmem:[#allocation40_spill] sm:$0xff]  ;;  %v10053_v9 = vld [vmem:[#allocation41_spill] sm:$0xff] }
 0x204   :  { %4659 = vmatpush1.bf16.msra.mxu0 %v7171_v16  ;;  %4723 = vmatpush1.bf16.msra.mxu1 %v7177_v17  ;;  %v10054_v16 = vld [vmem:[#allocation42_spill] sm:$0xff]  ;;  %v10055_v17 = vld [vmem:[#allocation43_spill] sm:$0xff] }
 0x205   :  { %4661 = vmatprep.subr.bf16.mxu0 %v7179_v21  ;;  %4725 = vmatprep.subr.bf16.mxu1 %v7191_v25  ;;  %v10056_v21 = vld [vmem:[#allocation44_spill] sm:$0xff]  ;;  %v10057_v25 = vld [vmem:[#allocation45_spill] sm:$0xff] }
 0x208   :  { %4663 = vmatpush1.bf16.msra.mxu0 %v7213_v34  ;;  %4727 = vmatpush1.bf16.msra.mxu1 %v10048_v40  ;;  %v10058_v34 = vld [vmem:[#allocation46_spill] sm:$0xff]  ;;  %v10059_v40 = vld [vmem:[#allocation47_spill] sm:$0xff] }
 0x209   :  { %4665 = vmatprep.subr.bf16.mxu0 %v10049_v53  ;;  %4729 = vmatprep.subr.bf16.mxu1 %v10050_v0  ;;  %v10060_v53 = vld [vmem:[#allocation48_spill] sm:$0xff]  ;;  %v10061_v0 = vld [vmem:[#allocation49_spill] sm:$0xff] }
 0x20c   :  { %4667 = vmatpush1.bf16.msra.mxu0 %v10051_v1  ;;  %4731 = vmatpush1.bf16.msra.mxu1 %v10052_v2  ;;  %v10062_v1 = vld [vmem:[#allocation50_spill] sm:$0xff]  ;;  %v10063_v2 = vld [vmem:[#allocation51_spill] sm:$0xff] }
 0x20d   :  { %4669 = vmatprep.subr.bf16.mxu0 %v10053_v9  ;;  %4733 = vmatprep.subr.bf16.mxu1 %v10054_v16  ;;  %v10064_v9 = vld [vmem:[#allocation52_spill] sm:$0xff]  ;;  %v10065_v16 = vld [vmem:[#allocation53_spill] sm:$0xff] }
 0x210   :  { %4671 = vmatpush1.bf16.msra.mxu0 %v10055_v17  ;;  %4735 = vmatpush1.bf16.msra.mxu1 %v10056_v21  ;;  %v10066_v17 = vld [vmem:[#allocation54_spill] sm:$0xff]  ;;  %v10067_v21 = vld [vmem:[#allocation55_spill] sm:$0xff] }
 0x211   :  { %4673 = vmatprep.subr.bf16.mxu0 %v10057_v25  ;;  %4737 = vmatprep.subr.bf16.mxu1 %v10058_v34  ;;  %v10068_v25 = vld [vmem:[#allocation56_spill] sm:$0xff]  ;;  %v10069_v34 = vld [vmem:[#allocation57_spill] sm:$0xff] }
 0x214   :  { %4675 = vmatpush1.bf16.msra.mxu0 %v10059_v40  ;;  %4739 = vmatpush1.bf16.msra.mxu1 %v10060_v53  ;;  %v10070_v40 = vld [vmem:[#allocation58_spill] sm:$0xff]  ;;  %v10071_v53 = vld [vmem:[#allocation59_spill] sm:$0xff] }
 0x215   :  { %4677 = vmatprep.subr.bf16.mxu0 %v10061_v0  ;;  %4741 = vmatprep.subr.bf16.mxu1 %v10062_v1  ;;  %v10072_v0 = vld [vmem:[#allocation60_spill] sm:$0xff]  ;;  %v10073_v1 = vld [vmem:[#allocation61_spill] sm:$0xff] }
 0x218   :  { %4679 = vmatpush1.bf16.msra.mxu0 %v10063_v2  ;;  %4743 = vmatpush1.bf16.msra.mxu1 %v10064_v9  ;;  %v10074_v2 = vld [vmem:[#allocation62_spill] sm:$0xff]  ;;  %v10075_v9 = vld [vmem:[#allocation63_spill] sm:$0xff] }
 0x219   :  { %4681 = vmatprep.subr.bf16.mxu0 %v10065_v16  ;;  %4745 = vmatprep.subr.bf16.mxu1 %v10066_v17  ;;  %v10076_v16 = vld [vmem:[#allocation64_spill] sm:$0xff]  ;;  %v10077_v17 = vld [vmem:[#allocation65_spill] sm:$0xff] }
 0x21c   :  { %4683 = vmatpush1.bf16.msra.mxu0 %v10067_v21  ;;  %4747 = vmatpush1.bf16.msra.mxu1 %v10068_v25  ;;  %v10078_v21 = vld [vmem:[#allocation66_spill] sm:$0xff]  ;;  %v10079_v25 = vld [vmem:[#allocation67_spill] sm:$0xff] }
 0x21d   :  { %4685 = vmatprep.subr.bf16.mxu0 %v10069_v34  ;;  %4749 = vmatprep.subr.bf16.mxu1 %v10070_v40  ;;  %v10080_v34 = vld [vmem:[#allocation68_spill] sm:$0xff]  ;;  %v10081_v40 = vld [vmem:[#allocation69_spill] sm:$0xff] }
 0x220   :  { %4687 = vmatpush1.bf16.msra.mxu0 %v10071_v53  ;;  %4751 = vmatpush1.bf16.msra.mxu1 %v10072_v0  ;;  %v10082_v53 = vld [vmem:[#allocation70_spill] sm:$0xff] }
 0x221   :  { %4689 = vmatprep.subr.bf16.mxu0 %v10073_v1  ;;  %4753 = vmatprep.subr.bf16.mxu1 %v10074_v2 }
 0x224   :  { %4691 = vmatpush1.bf16.msra.mxu0 %v10075_v9  ;;  %4755 = vmatpush1.bf16.msra.mxu1 %v10076_v16 }
 0x225   :  { %4693 = vmatprep.subr.bf16.mxu0 %v10077_v17  ;;  %4757 = vmatprep.subr.bf16.mxu1 %v10078_v21 }
 0x228   :  { %4695 = vmatpush1.bf16.msra.mxu0 %v10079_v25  ;;  %4759 = vmatpush1.bf16.msra.mxu1 %v10080_v34 }
 0x229   :  { %4761 = vmatprep.subr.bf16.mxu0 %v10081_v40  ;;  %4825 = vmatprep.subr.bf16.mxu1 %v10082_v53  ;;  %v1309_v53 = vsel %vm8220_vm6, %v8195_v11, 0.0 }
 0x27e   :  { %v1387_v0 = vpop.f32.mrb[2].mxu0  ;;  %v1458_v1 = vpop.f32.mrb[2].mxu1 }
 0x27f   :  { %v6186_v2 = vadd.f32 %v1458_v1, %v10083_v50  ;;  %v1389_v49 = vpop.f32.mrb[3].mxu0  ;;  %v1460_v9 = vpop.f32.mrb[3].mxu1 }
 0x280   :  { %v6187_v16 = vadd.f32 %v1460_v9, %v8165_v51  ;;  %v10084_v9 = vld [vmem:[#allocation133_spill] sm:$0xff] }
 0x281   :  { %v3994_v48 = vmul.f32 -1.442695, %v6186_v2  ;;  %v6170_v2 = vadd.f32 %v1387_v0, %v10084_v9 }
 0x282   :  { %v3995_v17 = vmul.f32 -1.442695, %v6187_v16  ;;  %v10085_v16 = vld [vmem:[#allocation135_spill] sm:$0xff] }
 0x283   :  { %6329 = vpow2.f32 %v3994_v48  ;;  %v6171_v48 = vadd.f32 %v1389_v49, %v10085_v16 }
 0x284   :  { %6331 = vpow2.f32 %v3995_v17  ;;  %v3992_v17 = vmul.f32 -1.442695, %v6170_v2 }
 0x285   :  { %v3993_v51 = vmul.f32 -1.442695, %v6171_v48 }
 0x28d   :  { %v6330_v21 = vpop.eup %6329 }
 0x28e   :  { %v1642_v25 = vadd.f32 1.0, %v6330_v21  ;;  %v6332_v35 = vpop.eup %6331 }
 0x28f   :  { %v1643_v34 = vadd.f32 1.0, %v6332_v35 }
 0x290   :  { %6333 = vrcp.f32 %v1642_v25 }
 0x291   :  { %6335 = vrcp.f32 %v1643_v34 }
 0x292   :  { %6337 = vpow2.f32 %v3992_v17 }
 0x293   :  { %6339 = vpow2.f32 %v3993_v51 }
 0x29a   :  { %v6334_v40 = vpop.eup %6333 }
 0x29b   :  { %v1662_v1 = vmul.f32 %v6334_v40, %v1309_v53  ;;  %v6336_v50 = vpop.eup %6335 }
 0x29c   :  { %v1663_v32 = vmul.f32 %v6336_v50, %v8204_v45  ;;  %v6338_v21 = vpop.eup %6337 }
 0x29d   :  { %v6340_v35 = vpop.eup %6339  ;;  %v1630_v25 = vadd.f32 1.0, %v6338_v21 }
 0x29e   :  { %v1631_v34 = vadd.f32 1.0, %v6340_v35 }
 0x29f   :  { %6341 = vrcp.f32 %v1630_v25 }
 0x2a0   :  { %6343 = vrcp.f32 %v1631_v34 }
 0x2a9   :  { %v6342_v48 = vpop.eup %6341 }
 0x2aa   :  { %v6344_v17 = vpop.eup %6343 }
 0x2be   :  { %v1529_v31 = vpop.f32.mrb[18].mxu0  ;;  %v1600_v30 = vpop.f32.mrb[18].mxu1 }
 0x2bf   :  { %v6202_v11 = vadd.f32 %v1529_v31, %v8171_v27  ;;  %v6218_v55 = vadd.f32 %v1600_v30, %v8173_v5  ;;  %v1531_v50 = vpop.f32.mrb[19].mxu0  ;;  %v1602_v40 = vpop.f32.mrb[19].mxu1  ;;  %v10086_v31 = vld [vmem:[#allocation137_spill] sm:$0xff] }
 0x2c0   :  { %v6203_v49 = vadd.f32 %v1531_v50, %v8175_v59  ;;  %v6219_v0 = vadd.f32 %v1602_v40, %v8177_v36  ;;  %vm1673_vm9 = vcmp.le.s32.totalorder %v10086_v31, 1  ;;  %v10093_v40 = vld [vmem:[#allocation71_spill] sm:$0xff]  ;;  %vm2047_vm15 = vcmp.le.s32.totalorder %v10086_v31, 2 }
 0x2c1   :  { %6345 = vtanh.f32 %v6202_v11  ;;  %v3996_v51 = vmul.f32 -1.442695, %v6218_v55  ;;  %vm8409_vm12 = vmand %vm1673_vm9, %vm1675_vm10  ;;  %v10096_v11 = vld [vmem:[#allocation74_spill] sm:$0xff] }
 0x2c2   :  { %6347 = vtanh.f32 %v6203_v49  ;;  %v3997_v2 = vmul.f32 -1.442695, %v6219_v0  ;;  %vm8596_vm2 = vmand %vm2047_vm15, %vm2049_vm0 }
 0x2c3   :  { %6349 = vpow2.f32 %v3996_v51 }
 0x2c4   :  { %6351 = vpow2.f32 %v3997_v2 }
 0x2cb   :  { %v6346_v30 = vpop.eup %6345 }
 0x2cc   :  { %v6348_v21 = vpop.eup %6347  ;;  %v1664_v35 = vmul.f32 %v6346_v30, %v6342_v48 }
 0x2cd   :  { %v6350_v25 = vpop.eup %6349  ;;  %v1665_v34 = vmul.f32 %v6348_v21, %v6344_v17 }
 0x2ce   :  { %v6352_v55 = vpop.eup %6351  ;;  %v1656_v50 = vadd.f32 1.0, %v6350_v25  ;;  %v1666_v49 = vadd.f32 %v1664_v35, %v1662_v1 }
 0x2cf   :  { %v1657_v0 = vadd.f32 1.0, %v6352_v55  ;;  %v1667_v51 = vadd.f32 %v1665_v34, %v1663_v32  ;;  %v10091_v32 = vld [vmem:[#allocation139_spill] sm:$0xff] }
 0x2d0   :  { %6353 = vrcp.f32 %v1656_v50  ;;  %v8415_v2 = vsel %vm8405_vm11, %v1666_v49, %v1309_v53 }
 0x2d1   :  { %6355 = vrcp.f32 %v1657_v0  ;;  %v8420_v48 = vsel %vm8409_vm12, %v1667_v51, %v8204_v45  ;;  %v10092_v45 = vld [vmem:[#allocation138_spill] sm:$0xff]  ;;  %v10095_v0 = vld [vmem:[#allocation73_spill] sm:$0xff] }
 0x2d2   :  { %6357 = vtanh.f32 %v1667_v51  ;;  %v10097_v51 = vld [vmem:[#allocation75_spill] sm:$0xff] }
 0x2d3   :  { %6359 = vtanh.f32 %v1666_v49  ;;  %v10094_v49 = vld [vmem:[#allocation72_spill] sm:$0xff] }
 0x2da   :  { %v6354_v17 = vpop.eup %6353 }
 0x2db   :  { %v6356_v30 = vpop.eup %6355 }
 0x2dc   :  { %v6358_v21 = vpop.eup %6357 }
 0x2dd   :  { %v6360_v25 = vpop.eup %6359  ;;  %v1671_v1 = vmul.f32 %v6358_v21, %v6356_v30  ;;  %v10099_v30 = vld [vmem:[#allocation77_spill] sm:$0xff]  ;;  %v10100_v21 = vld [vmem:[#allocation78_spill] sm:$0xff] }
 0x2de   :  { %v1670_v35 = vmul.f32 %v6360_v25, %v6354_v17  ;;  %v10098_v17 = vld [vmem:[#allocation76_spill] sm:$0xff]  ;;  %v10101_v25 = vld [vmem:[#allocation79_spill] sm:$0xff] }
 0x2df   :  { %v8425_v34 = vsel %vm8409_vm12, %v1671_v1, %v10091_v32  ;;  %v1687_v53 = vsel %vm8409_vm12, %v1671_v1, 0.0  ;;  %v10102_v1 = vld [vmem:[#allocation80_spill] sm:$0xff]  ;;  %v10104_v32 = vld [vmem:[#allocation82_spill] sm:$0xff] }
 0x2e0   :  { %3999 = vst [vmem:[%s9538_s6 + $0x18] sm:$0xff] %v1687_v53  ;;  %1759 = vmatprep.mubr.f32.mxu0 %v8425_v34  ;;  %1830 = vmatprep.mubr.f32.mxu1 %v8425_v34  ;;  %v8437_v55 = vsel %vm8405_vm11, %v1670_v35, %v10092_v45  ;;  %v1686_v50 = vsel %vm8405_vm11, %v1670_v35, 0.0  ;;  %v10103_v35 = vld [vmem:[#allocation81_spill] sm:$0xff]  ;;  %v10105_v53 = vld [vmem:[#allocation83_spill] sm:$0xff]  ;;  %v10106_v45 = vld [vmem:[#allocation84_spill] sm:$0xff] }
 0x2e1   :  { %3998 = vst [vmem:[%s9538_s6 + $0x10] sm:$0xff] %v1686_v50  ;;  %1760 = vmatmul.mubr.f32.vlgmr.msra.gmra.mrb[4].mxu0 %v8437_v55  ;;  %1831 = vmatmul.mubr.f32.vlgmr.msra.gmra.mrb[4].mxu1 %v8437_v55  ;;  %v10107_v50 = vld [vmem:[#allocation85_spill] sm:$0xff] }
 0x2e2   :  { %4763 = vmatpush1.bf16.msra.mxu0 %v10093_v40  ;;  %4827 = vmatpush1.bf16.msra.mxu1 %v10094_v49 }
 0x2e3   :  { %1901 = vmatprep.mubr.f32.mxu0 %v8425_v34  ;;  %1972 = vmatprep.mubr.f32.mxu1 %v8425_v34 }
 0x2e4   :  { %4765 = vmatprep.subr.bf16.mxu0 %v10095_v0  ;;  %4829 = vmatprep.subr.bf16.mxu1 %v10096_v11 }
 0x2e6   :  { %4767 = vmatpush1.bf16.msra.mxu0 %v10097_v51  ;;  %4831 = vmatpush1.bf16.msra.mxu1 %v10098_v17  ;;  %v10108_v51 = vld [vmem:[#allocation86_spill] sm:$0xff]  ;;  %v10109_v17 = vld [vmem:[#allocation87_spill] sm:$0xff] }
 0x2e7   :  { %4769 = vmatprep.subr.bf16.mxu0 %v10099_v30  ;;  %4833 = vmatprep.subr.bf16.mxu1 %v10100_v21  ;;  %v10110_v30 = vld [vmem:[#allocation88_spill] sm:$0xff]  ;;  %v10111_v21 = vld [vmem:[#allocation89_spill] sm:$0xff] }
 0x2ea   :  { %4771 = vmatpush1.bf16.msra.mxu0 %v10101_v25  ;;  %4835 = vmatpush1.bf16.msra.mxu1 %v10102_v1  ;;  %v10112_v25 = vld [vmem:[#allocation90_spill] sm:$0xff]  ;;  %v10113_v1 = vld [vmem:[#allocation91_spill] sm:$0xff] }
 0x2eb   :  { %4773 = vmatprep.subr.bf16.mxu0 %v10103_v35  ;;  %4837 = vmatprep.subr.bf16.mxu1 %v10104_v32  ;;  %v10114_v35 = vld [vmem:[#allocation92_spill] sm:$0xff]  ;;  %v10115_v32 = vld [vmem:[#allocation93_spill] sm:$0xff] }
 0x2ee   :  { %4775 = vmatpush1.bf16.msra.mxu0 %v10105_v53  ;;  %4839 = vmatpush1.bf16.msra.mxu1 %v10106_v45  ;;  %v10116_v53 = vld [vmem:[#allocation94_spill] sm:$0xff]  ;;  %v10117_v45 = vld [vmem:[#allocation95_spill] sm:$0xff] }
 0x2ef   :  { %4777 = vmatprep.subr.bf16.mxu0 %v10107_v50  ;;  %4841 = vmatprep.subr.bf16.mxu1 %v10108_v51  ;;  %v10118_v50 = vld [vmem:[#allocation96_spill] sm:$0xff]  ;;  %v10119_v51 = vld [vmem:[#allocation97_spill] sm:$0xff] }
 0x2f2   :  { %4779 = vmatpush1.bf16.msra.mxu0 %v10109_v17  ;;  %4843 = vmatpush1.bf16.msra.mxu1 %v10110_v30  ;;  %v10120_v17 = vld [vmem:[#allocation98_spill] sm:$0xff]  ;;  %v10121_v30 = vld [vmem:[#allocation99_spill] sm:$0xff] }
 0x2f3   :  { %4781 = vmatprep.subr.bf16.mxu0 %v10111_v21  ;;  %4845 = vmatprep.subr.bf16.mxu1 %v10112_v25  ;;  %v10122_v21 = vld [vmem:[#allocation100_spill] sm:$0xff]  ;;  %v10123_v25 = vld [vmem:[#allocation101_spill] sm:$0xff] }
 0x2f6   :  { %4783 = vmatpush1.bf16.msra.mxu0 %v10113_v1  ;;  %4847 = vmatpush1.bf16.msra.mxu1 %v10114_v35  ;;  %v10124_v1 = vld [vmem:[#allocation102_spill] sm:$0xff]  ;;  %v10125_v35 = vld [vmem:[#allocation103_spill] sm:$0xff] }
 0x2f7   :  { %4785 = vmatprep.subr.bf16.mxu0 %v10115_v32  ;;  %4849 = vmatprep.subr.bf16.mxu1 %v10116_v53  ;;  %v10126_v32 = vld [vmem:[#allocation104_spill] sm:$0xff]  ;;  %v10127_v53 = vld [vmem:[#allocation105_spill] sm:$0xff] }
 0x2fa   :  { %4787 = vmatpush1.bf16.msra.mxu0 %v10117_v45  ;;  %4851 = vmatpush1.bf16.msra.mxu1 %v10118_v50  ;;  %v10128_v45 = vld [vmem:[#allocation106_spill] sm:$0xff]  ;;  %v10129_v50 = vld [vmem:[#allocation107_spill] sm:$0xff] }
 0x2fb   :  { %4789 = vmatprep.subr.bf16.mxu0 %v10119_v51  ;;  %4853 = vmatprep.subr.bf16.mxu1 %v10120_v17  ;;  %v10130_v51 = vld [vmem:[#allocation108_spill] sm:$0xff]  ;;  %v10131_v17 = vld [vmem:[#allocation109_spill] sm:$0xff] }
 0x2fe   :  { %4791 = vmatpush1.bf16.msra.mxu0 %v10121_v30  ;;  %4855 = vmatpush1.bf16.msra.mxu1 %v10122_v21  ;;  %v10132_v30 = vld [vmem:[#allocation110_spill] sm:$0xff]  ;;  %v10133_v21 = vld [vmem:[#allocation111_spill] sm:$0xff] }
 0x2ff   :  { %4793 = vmatprep.subr.bf16.mxu0 %v10123_v25  ;;  %4857 = vmatprep.subr.bf16.mxu1 %v10124_v1 }
 0x302   :  { %4795 = vmatpush1.bf16.msra.mxu0 %v10125_v35  ;;  %4859 = vmatpush1.bf16.msra.mxu1 %v10126_v32 }
 0x303   :  { %4797 = vmatprep.subr.bf16.mxu0 %v10127_v53  ;;  %4861 = vmatprep.subr.bf16.mxu1 %v10128_v45 }
 0x306   :  { %4799 = vmatpush1.bf16.msra.mxu0 %v10129_v50  ;;  %4863 = vmatpush1.bf16.msra.mxu1 %v10130_v51 }
 0x307   :  { %4801 = vmatprep.subr.bf16.mxu0 %v10131_v17  ;;  %4865 = vmatprep.subr.bf16.mxu1 %v10132_v30 }
 0x30a   :  { %4803 = vmatpush1.bf16.msra.mxu0 %v10133_v21  ;;  %4867 = vmatpush1.bf16.msra.mxu1 %v10037_v24 }
 0x30b   :  { %4805 = vmatprep.subr.bf16.mxu0 %v10038_v62  ;;  %4869 = vmatprep.subr.bf16.mxu1 %v10039_v3 }
 0x30e   :  { %4807 = vmatpush1.bf16.msra.mxu0 %v10040_v22  ;;  %4871 = vmatpush1.bf16.msra.mxu1 %v10041_v60 }
 0x30f   :  { %4809 = vmatprep.subr.bf16.mxu0 %v10042_v33  ;;  %4873 = vmatprep.subr.bf16.mxu1 %v10043_v4 }
 0x312   :  { %4811 = vmatpush1.bf16.msra.mxu0 %v10044_v41  ;;  %4875 = vmatpush1.bf16.msra.mxu1 %v10045_v15 }
 0x313   :  { %4813 = vmatprep.subr.bf16.mxu0 %v10046_v39  ;;  %4877 = vmatprep.subr.bf16.mxu1 %v10047_v28 }
 0x316   :  { %4815 = vmatpush1.bf16.msra.mxu0 %v8019_v54  ;;  %4879 = vmatpush1.bf16.msra.mxu1 %v8023_v29 }
 0x317   :  { %4817 = vmatprep.subr.bf16.mxu0 %v8025_v13  ;;  %4881 = vmatprep.subr.bf16.mxu1 %v8037_v26 }
 0x31a   :  { %4819 = vmatpush1.bf16.msra.mxu0 %v8055_v37  ;;  %4883 = vmatpush1.bf16.msra.mxu1 %v8059_v14 }
 0x31b   :  { %4821 = vmatprep.subr.bf16.mxu0 %v8061_v61  ;;  %4885 = vmatprep.subr.bf16.mxu1 %v8070_v47 }
 0x31e   :  { %4823 = vmatpush1.bf16.msra.mxu0 %v8079_v10  ;;  %4887 = vmatpush1.bf16.msra.mxu1 %v8083_v44 }
 0x31f   :  { %4889 = vmatprep.subr.bf16.mxu0 %v6846_v42  ;;  %4953 = vmatprep.subr.bf16.mxu1 %v6850_v43  ;;  %v10187_v42 = vld [vmem:[#allocation136_spill] sm:$0xff] }
 0x321   :  { %1902 = vmatmul.mubr.f32.vlgmr.msra.gmra.mrb[20].mxu0 %v8437_v55  ;;  %1973 = vmatmul.mubr.f32.vlgmr.msra.gmra.mrb[20].mxu1 %v8437_v55 }
 0x322   :  { %4891 = vmatpush1.bf16.msra.mxu0 %v6925_v56  ;;  %4955 = vmatpush1.bf16.msra.mxu1 %v6928_v57  ;;  %v10134_v57 = vld [vmem:[#allocation19_spill] sm:$0xff]  ;;  %v10186_v56 = vld [vmem:[#allocation134_spill] sm:$0xff] }
 0x323   :  { %4893 = vmatprep.subr.bf16.mxu0 %v6930_v58  ;;  %4957 = vmatprep.subr.bf16.mxu1 %v6941_v63  ;;  %v10135_v58 = vld [vmem:[#allocation20_spill] sm:$0xff]  ;;  %v10136_v63 = vld [vmem:[#allocation21_spill] sm:$0xff] }
 0x326   :  { %4895 = vmatpush1.bf16.msra.mxu0 %v6963_v6  ;;  %4959 = vmatpush1.bf16.msra.mxu1 %v6967_v7  ;;  %v10137_v6 = vld [vmem:[#allocation22_spill] sm:$0xff]  ;;  %v10138_v7 = vld [vmem:[#allocation23_spill] sm:$0xff] }
 0x327   :  { %4897 = vmatprep.subr.bf16.mxu0 %v6969_v8  ;;  %4961 = vmatprep.subr.bf16.mxu1 %v6981_v12  ;;  %v10139_v8 = vld [vmem:[#allocation24_spill] sm:$0xff]  ;;  %v10140_v12 = vld [vmem:[#allocation25_spill] sm:$0xff] }
 0x32a   :  { %4899 = vmatpush1.bf16.msra.mxu0 %v7003_v18  ;;  %4963 = vmatpush1.bf16.msra.mxu1 %v7009_v19  ;;  %v10141_v18 = vld [vmem:[#allocation26_spill] sm:$0xff]  ;;  %v10142_v19 = vld [vmem:[#allocation27_spill] sm:$0xff] }
 0x32b   :  { %4901 = vmatprep.subr.bf16.mxu0 %v7011_v20  ;;  %4965 = vmatprep.subr.bf16.mxu1 %v7023_v23  ;;  %v10143_v20 = vld [vmem:[#allocation28_spill] sm:$0xff]  ;;  %v10144_v23 = vld [vmem:[#allocation29_spill] sm:$0xff] }
 0x32e   :  { %4903 = vmatpush1.bf16.msra.mxu0 %v10134_v57  ;;  %4967 = vmatpush1.bf16.msra.mxu1 %v10135_v58  ;;  %v10145_v57 = vld [vmem:[#allocation30_spill] sm:$0xff]  ;;  %v10146_v58 = vld [vmem:[#allocation31_spill] sm:$0xff] }
 0x32f   :  { %4905 = vmatprep.subr.bf16.mxu0 %v10136_v63  ;;  %4969 = vmatprep.subr.bf16.mxu1 %v10137_v6  ;;  %v10147_v63 = vld [vmem:[#allocation32_spill] sm:$0xff]  ;;  %v10148_v6 = vld [vmem:[#allocation33_spill] sm:$0xff] }
 0x332   :  { %4907 = vmatpush1.bf16.msra.mxu0 %v10138_v7  ;;  %4971 = vmatpush1.bf16.msra.mxu1 %v10139_v8  ;;  %v10149_v7 = vld [vmem:[#allocation34_spill] sm:$0xff]  ;;  %v10150_v8 = vld [vmem:[#allocation35_spill] sm:$0xff] }
 0x333   :  { %4909 = vmatprep.subr.bf16.mxu0 %v10140_v12  ;;  %4973 = vmatprep.subr.bf16.mxu1 %v10141_v18  ;;  %v10151_v12 = vld [vmem:[#allocation36_spill] sm:$0xff]  ;;  %v10152_v18 = vld [vmem:[#allocation37_spill] sm:$0xff] }
 0x336   :  { %4911 = vmatpush1.bf16.msra.mxu0 %v10142_v19  ;;  %4975 = vmatpush1.bf16.msra.mxu1 %v10143_v20  ;;  %v10153_v19 = vld [vmem:[#allocation38_spill] sm:$0xff]  ;;  %v10154_v20 = vld [vmem:[#allocation39_spill] sm:$0xff] }
 0x337   :  { %4913 = vmatprep.subr.bf16.mxu0 %v10144_v23  ;;  %4977 = vmatprep.subr.bf16.mxu1 %v10145_v57  ;;  %v10155_v23 = vld [vmem:[#allocation40_spill] sm:$0xff]  ;;  %v10156_v57 = vld [vmem:[#allocation41_spill] sm:$0xff] }
 0x33a   :  { %4915 = vmatpush1.bf16.msra.mxu0 %v10146_v58  ;;  %4979 = vmatpush1.bf16.msra.mxu1 %v10147_v63  ;;  %v10157_v58 = vld [vmem:[#allocation42_spill] sm:$0xff]  ;;  %v10158_v63 = vld [vmem:[#allocation43_spill] sm:$0xff] }
 0x33b   :  { %4917 = vmatprep.subr.bf16.mxu0 %v10148_v6  ;;  %4981 = vmatprep.subr.bf16.mxu1 %v10149_v7  ;;  %v10159_v6 = vld [vmem:[#allocation44_spill] sm:$0xff]  ;;  %v10160_v7 = vld [vmem:[#allocation45_spill] sm:$0xff] }
 0x33e   :  { %4919 = vmatpush1.bf16.msra.mxu0 %v10150_v8  ;;  %4983 = vmatpush1.bf16.msra.mxu1 %v10151_v12  ;;  %v10161_v8 = vld [vmem:[#allocation46_spill] sm:$0xff]  ;;  %v10162_v12 = vld [vmem:[#allocation47_spill] sm:$0xff] }
 0x33f   :  { %4921 = vmatprep.subr.bf16.mxu0 %v10152_v18  ;;  %4985 = vmatprep.subr.bf16.mxu1 %v10153_v19  ;;  %v10163_v18 = vld [vmem:[#allocation48_spill] sm:$0xff]  ;;  %v10164_v19 = vld [vmem:[#allocation49_spill] sm:$0xff] }
 0x342   :  { %4923 = vmatpush1.bf16.msra.mxu0 %v10154_v20  ;;  %4987 = vmatpush1.bf16.msra.mxu1 %v10155_v23  ;;  %v10165_v20 = vld [vmem:[#allocation50_spill] sm:$0xff]  ;;  %v10166_v23 = vld [vmem:[#allocation51_spill] sm:$0xff] }
 0x343   :  { %4925 = vmatprep.subr.bf16.mxu0 %v10156_v57  ;;  %4989 = vmatprep.subr.bf16.mxu1 %v10157_v58  ;;  %v10167_v57 = vld [vmem:[#allocation52_spill] sm:$0xff]  ;;  %v10168_v58 = vld [vmem:[#allocation53_spill] sm:$0xff] }
 0x346   :  { %4927 = vmatpush1.bf16.msra.mxu0 %v10158_v63  ;;  %4991 = vmatpush1.bf16.msra.mxu1 %v10159_v6  ;;  %v10169_v63 = vld [vmem:[#allocation54_spill] sm:$0xff]  ;;  %v10170_v6 = vld [vmem:[#allocation55_spill] sm:$0xff] }
 0x347   :  { %4929 = vmatprep.subr.bf16.mxu0 %v10160_v7  ;;  %4993 = vmatprep.subr.bf16.mxu1 %v10161_v8  ;;  %v10171_v7 = vld [vmem:[#allocation56_spill] sm:$0xff]  ;;  %v10172_v8 = vld [vmem:[#allocation57_spill] sm:$0xff] }
 0x34a   :  { %4931 = vmatpush1.bf16.msra.mxu0 %v10162_v12  ;;  %4995 = vmatpush1.bf16.msra.mxu1 %v10163_v18  ;;  %v10173_v12 = vld [vmem:[#allocation58_spill] sm:$0xff]  ;;  %v10174_v18 = vld [vmem:[#allocation59_spill] sm:$0xff] }
 0x34b   :  { %4933 = vmatprep.subr.bf16.mxu0 %v10164_v19  ;;  %4997 = vmatprep.subr.bf16.mxu1 %v10165_v20  ;;  %v10175_v19 = vld [vmem:[#allocation60_spill] sm:$0xff]  ;;  %v10176_v20 = vld [vmem:[#allocation61_spill] sm:$0xff] }
 0x34e   :  { %4935 = vmatpush1.bf16.msra.mxu0 %v10166_v23  ;;  %4999 = vmatpush1.bf16.msra.mxu1 %v10167_v57  ;;  %v10177_v23 = vld [vmem:[#allocation62_spill] sm:$0xff]  ;;  %v10178_v57 = vld [vmem:[#allocation63_spill] sm:$0xff] }
 0x34f   :  { %4937 = vmatprep.subr.bf16.mxu0 %v10168_v58  ;;  %5001 = vmatprep.subr.bf16.mxu1 %v10169_v63  ;;  %v10179_v58 = vld [vmem:[#allocation64_spill] sm:$0xff]  ;;  %v10180_v63 = vld [vmem:[#allocation65_spill] sm:$0xff] }
 0x352   :  { %4939 = vmatpush1.bf16.msra.mxu0 %v10170_v6  ;;  %5003 = vmatpush1.bf16.msra.mxu1 %v10171_v7  ;;  %v10181_v6 = vld [vmem:[#allocation66_spill] sm:$0xff]  ;;  %v10182_v7 = vld [vmem:[#allocation67_spill] sm:$0xff] }
 0x353   :  { %4941 = vmatprep.subr.bf16.mxu0 %v10172_v8  ;;  %5005 = vmatprep.subr.bf16.mxu1 %v10173_v12  ;;  %v10183_v8 = vld [vmem:[#allocation68_spill] sm:$0xff]  ;;  %v10184_v12 = vld [vmem:[#allocation69_spill] sm:$0xff] }
 0x356   :  { %4943 = vmatpush1.bf16.msra.mxu0 %v10174_v18  ;;  %5007 = vmatpush1.bf16.msra.mxu1 %v10175_v19  ;;  %v10185_v18 = vld [vmem:[#allocation70_spill] sm:$0xff] }
 0x357   :  { %4945 = vmatprep.subr.bf16.mxu0 %v10176_v20  ;;  %5009 = vmatprep.subr.bf16.mxu1 %v10177_v23 }
 0x35a   :  { %4947 = vmatpush1.bf16.msra.mxu0 %v10178_v57  ;;  %5011 = vmatpush1.bf16.msra.mxu1 %v10179_v58 }
 0x35b   :  { %4949 = vmatprep.subr.bf16.mxu0 %v10180_v63  ;;  %5013 = vmatprep.subr.bf16.mxu1 %v10181_v6 }
 0x35e   :  { %4951 = vmatpush1.bf16.msra.mxu0 %v10182_v7  ;;  %5015 = vmatpush1.bf16.msra.mxu1 %v10183_v8 }
 0x35f   :  { %5017 = vmatprep.subr.bf16.mxu0 %v10184_v12  ;;  %5081 = vmatprep.subr.bf16.mxu1 %v10185_v18 }
 0x3b4   :  { %v1761_v19 = vpop.f32.mrb[4].mxu0  ;;  %v1832_v20 = vpop.f32.mrb[4].mxu1 }
 0x3b5   :  { %v6188_v23 = vadd.f32 %v1832_v20, %v10186_v56  ;;  %v1763_v43 = vpop.f32.mrb[5].mxu0  ;;  %v1834_v57 = vpop.f32.mrb[5].mxu1  ;;  %v6172_v56 = vadd.f32 %v1761_v19, %v10084_v9 }
 0x3b6   :  { %v6189_v58 = vadd.f32 %v1834_v57, %v10187_v42  ;;  %v6173_v57 = vadd.f32 %v1763_v43, %v10085_v16 }
 0x3b7   :  { %v4002_v44 = vmul.f32 -1.442695, %v6188_v23  ;;  %v4000_v23 = vmul.f32 -1.442695, %v6172_v56 }
 0x3b8   :  { %v4003_v63 = vmul.f32 -1.442695, %v6189_v58  ;;  %v4001_v58 = vmul.f32 -1.442695, %v6173_v57 }
 0x3b9   :  { %6361 = vpow2.f32 %v4002_v44 }
 0x3ba   :  { %6363 = vpow2.f32 %v4003_v63 }
 0x3c3   :  { %v6362_v6 = vpop.eup %6361 }
 0x3c4   :  { %v2016_v7 = vadd.f32 1.0, %v6362_v6  ;;  %v6364_v10 = vpop.eup %6363 }
 0x3c5   :  { %v2017_v8 = vadd.f32 1.0, %v6364_v10 }
 0x3c6   :  { %6365 = vrcp.f32 %v2016_v7 }
 0x3c7   :  { %6367 = vrcp.f32 %v2017_v8 }
 0x3c8   :  { %6369 = vpow2.f32 %v4000_v23 }
 0x3c9   :  { %6371 = vpow2.f32 %v4001_v58 }
 0x3d0   :  { %v6366_v12 = vpop.eup %6365 }
 0x3d1   :  { %v2036_v18 = vmul.f32 %v6366_v12, %v8415_v2  ;;  %v6368_v47 = vpop.eup %6367 }
 0x3d2   :  { %v2037_v20 = vmul.f32 %v6368_v47, %v8420_v48  ;;  %v6370_v63 = vpop.eup %6369 }
 0x3d3   :  { %v6372_v6 = vpop.eup %6371  ;;  %v2004_v44 = vadd.f32 1.0, %v6370_v63 }
 0x3d4   :  { %v2005_v7 = vadd.f32 1.0, %v6372_v6 }
 0x3d5   :  { %6373 = vrcp.f32 %v2004_v44 }
 0x3d6   :  { %6375 = vrcp.f32 %v2005_v7 }
 0x3df   :  { %v6374_v23 = vpop.eup %6373 }
 0x3e0   :  { %v6376_v58 = vpop.eup %6375 }
 0x3f4   :  { %v1903_v10 = vpop.f32.mrb[20].mxu0  ;;  %v1974_v8 = vpop.f32.mrb[20].mxu1 }
 0x3f5   :  { %v6204_v12 = vadd.f32 %v1903_v10, %v8171_v27  ;;  %v6220_v42 = vadd.f32 %v1974_v8, %v8173_v5  ;;  %v1905_v47 = vpop.f32.mrb[21].mxu0  ;;  %v1976_v61 = vpop.f32.mrb[21].mxu1 }
 0x3f6   :  { %v6205_v43 = vadd.f32 %v1905_v47, %v8175_v59  ;;  %v6221_v56 = vadd.f32 %v1976_v61, %v8177_v36 }
 0x3f7   :  { %6377 = vtanh.f32 %v6204_v12  ;;  %v4004_v19 = vmul.f32 -1.442695, %v6220_v42  ;;  %v10199_v42 = vld [vmem:[#allocation82_spill] sm:$0xff] }
 0x3f8   :  { %6379 = vtanh.f32 %v6205_v43  ;;  %v4005_v57 = vmul.f32 -1.442695, %v6221_v56 }
 0x3f9   :  { %6381 = vpow2.f32 %v4004_v19 }
 0x3fa   :  { %6383 = vpow2.f32 %v4005_v57 }
 0x401   :  { %v6378_v63 = vpop.eup %6377 }
 0x402   :  { %v6380_v6 = vpop.eup %6379  ;;  %v2038_v44 = vmul.f32 %v6378_v63, %v6374_v23  ;;  %v10194_v63 = vld [vmem:[#allocation77_spill] sm:$0xff] }
 0x403   :  { %v6382_v61 = vpop.eup %6381  ;;  %v2039_v7 = vmul.f32 %v6380_v6, %v6376_v58  ;;  %v10195_v6 = vld [vmem:[#allocation78_spill] sm:$0xff] }
 0x404   :  { %v6384_v10 = vpop.eup %6383  ;;  %v2040_v8 = vadd.f32 %v2038_v44, %v2036_v18  ;;  %v2030_v12 = vadd.f32 1.0, %v6382_v61  ;;  %v10196_v44 = vld [vmem:[#allocation79_spill] sm:$0xff]  ;;  %v10197_v61 = vld [vmem:[#allocation80_spill] sm:$0xff] }
 0x405   :  { %v2041_v52 = vadd.f32 %v2039_v7, %v2037_v20  ;;  %v2031_v47 = vadd.f32 1.0, %v6384_v10  ;;  %v10198_v7 = vld [vmem:[#allocation81_spill] sm:$0xff]  ;;  %v10200_v10 = vld [vmem:[#allocation83_spill] sm:$0xff] }
 0x406   :  { %6385 = vtanh.f32 %v2040_v8  ;;  %v8603_v46 = vsel %vm8592_vm1, %v2040_v8, %v8415_v2  ;;  %v10201_v8 = vld [vmem:[#allocation84_spill] sm:$0xff] }
 0x407   :  { %6387 = vrcp.f32 %v2030_v12  ;;  %v8608_v31 = vsel %vm8596_vm2, %v2041_v52, %v8420_v48  ;;  %v10202_v12 = vld [vmem:[#allocation85_spill] sm:$0xff] }
 0x408   :  { %6389 = vtanh.f32 %v2041_v52  ;;  %v10204_v52 = vld [vmem:[#allocation87_spill] sm:$0xff] }
 0x409   :  { %6391 = vrcp.f32 %v2031_v47  ;;  %v10205_v47 = vld [vmem:[#allocation88_spill] sm:$0xff] }
 0x410   :  { %v6386_v18 = vpop.eup %6385 }
 0x411   :  { %v6388_v43 = vpop.eup %6387 }
 0x412   :  { %v6390_v56 = vpop.eup %6389  ;;  %v2044_v19 = vmul.f32 %v6388_v43, %v6386_v18  ;;  %v10206_v18 = vld [vmem:[#allocation89_spill] sm:$0xff]  ;;  %v10207_v43 = vld [vmem:[#allocation90_spill] sm:$0xff] }
 0x413   :  { %v6392_v20 = vpop.eup %6391 }
 0x414   :  { %v2045_v57 = vmul.f32 %v6392_v20, %v6390_v56  ;;  %v2060_v23 = vsel %vm8592_vm1, %v2044_v19, 0.0  ;;  %v8630_v58 = vsel %vm8592_vm1, %v2044_v19, %v8437_v55  ;;  %v10193_v55 = vld [vmem:[#allocation76_spill] sm:$0xff]  ;;  %v10208_v56 = vld [vmem:[#allocation91_spill] sm:$0xff]  ;;  %v10210_v20 = vld [vmem:[#allocation93_spill] sm:$0xff] }
 0x415   :  { %4006 = vst [vmem:[%s9538_s6 + $0x20] sm:$0xff] %v2060_v23  ;;  %v10209_v19 = vld [vmem:[#allocation92_spill] sm:$0xff]  ;;  %v10212_v23 = vld [vmem:[#allocation95_spill] sm:$0xff] }
 0x416   :  { %v8618_v2 = vsel %vm8596_vm2, %v2045_v57, %v8425_v34  ;;  %v2061_v48 = vsel %vm8596_vm2, %v2045_v57, 0.0  ;;  %v10192_v34 = vld [vmem:[#allocation75_spill] sm:$0xff]  ;;  %v10211_v57 = vld [vmem:[#allocation94_spill] sm:$0xff] }
 0x417   :  { %4007 = vst [vmem:[%s9538_s6 + $0x28] sm:$0xff] %v2061_v48  ;;  %2133 = vmatprep.mubr.f32.mxu0 %v8618_v2  ;;  %2204 = vmatprep.mubr.f32.mxu1 %v8618_v2  ;;  %v10213_v48 = vld [vmem:[#allocation96_spill] sm:$0xff] }
 0x418   :  { %2134 = vmatmul.mubr.f32.vlgmr.msra.gmra.mrb[6].mxu0 %v8630_v58  ;;  %2205 = vmatmul.mubr.f32.vlgmr.msra.gmra.mrb[6].mxu1 %v8630_v58 }
 0x419   :  { %5019 = vmatpush1.bf16.msra.mxu0 %v10093_v40  ;;  %5083 = vmatpush1.bf16.msra.mxu1 %v10094_v49 }
 0x41a   :  { %2275 = vmatprep.mubr.f32.mxu0 %v8618_v2  ;;  %2346 = vmatprep.mubr.f32.mxu1 %v8618_v2 }
 0x41b   :  { %5021 = vmatprep.subr.bf16.mxu0 %v10095_v0  ;;  %5085 = vmatprep.subr.bf16.mxu1 %v10096_v11 }
 0x41d   :  { %5023 = vmatpush1.bf16.msra.mxu0 %v10192_v34  ;;  %5087 = vmatpush1.bf16.msra.mxu1 %v10193_v55 }
 0x41e   :  { %5025 = vmatprep.subr.bf16.mxu0 %v10194_v63  ;;  %5089 = vmatprep.subr.bf16.mxu1 %v10195_v6 }
 0x421   :  { %5027 = vmatpush1.bf16.msra.mxu0 %v10196_v44  ;;  %5091 = vmatpush1.bf16.msra.mxu1 %v10197_v61 }
 0x422   :  { %5029 = vmatprep.subr.bf16.mxu0 %v10198_v7  ;;  %5093 = vmatprep.subr.bf16.mxu1 %v10199_v42 }
 0x425   :  { %5031 = vmatpush1.bf16.msra.mxu0 %v10200_v10  ;;  %5095 = vmatpush1.bf16.msra.mxu1 %v10201_v8 }
 0x426   :  { %5033 = vmatprep.subr.bf16.mxu0 %v10202_v12  ;;  %5097 = vmatprep.subr.bf16.mxu1 %v10203_v38  ;;  %v10214_v38 = vld [vmem:[#allocation97_spill] sm:$0xff] }
 0x429   :  { %5035 = vmatpush1.bf16.msra.mxu0 %v10204_v52  ;;  %5099 = vmatpush1.bf16.msra.mxu1 %v10205_v47  ;;  %v10215_v52 = vld [vmem:[#allocation98_spill] sm:$0xff]  ;;  %v10216_v47 = vld [vmem:[#allocation99_spill] sm:$0xff] }
 0x42a   :  { %5037 = vmatprep.subr.bf16.mxu0 %v10206_v18  ;;  %5101 = vmatprep.subr.bf16.mxu1 %v10207_v43  ;;  %v10217_v18 = vld [vmem:[#allocation100_spill] sm:$0xff] }
 0x42d   :  { %5039 = vmatpush1.bf16.msra.mxu0 %v10208_v56  ;;  %5103 = vmatpush1.bf16.msra.mxu1 %v10209_v19 }
 0x42e   :  { %5041 = vmatprep.subr.bf16.mxu0 %v10210_v20  ;;  %5105 = vmatprep.subr.bf16.mxu1 %v10211_v57 }
 0x431   :  { %5043 = vmatpush1.bf16.msra.mxu0 %v10212_v23  ;;  %5107 = vmatpush1.bf16.msra.mxu1 %v10213_v48 }
 0x432   :  { %5045 = vmatprep.subr.bf16.mxu0 %v10214_v38  ;;  %5109 = vmatprep.subr.bf16.mxu1 %v10215_v52 }
 0x435   :  { %5047 = vmatpush1.bf16.msra.mxu0 %v10216_v47  ;;  %5111 = vmatpush1.bf16.msra.mxu1 %v10217_v18 }
 0x436   :  { %5049 = vmatprep.subr.bf16.mxu0 %v10123_v25  ;;  %5113 = vmatprep.subr.bf16.mxu1 %v10124_v1 }
 0x439   :  { %5051 = vmatpush1.bf16.msra.mxu0 %v10125_v35  ;;  %5115 = vmatpush1.bf16.msra.mxu1 %v10126_v32 }
 0x43a   :  { %5053 = vmatprep.subr.bf16.mxu0 %v10127_v53  ;;  %5117 = vmatprep.subr.bf16.mxu1 %v10128_v45 }
 0x43d   :  { %5055 = vmatpush1.bf16.msra.mxu0 %v10129_v50  ;;  %5119 = vmatpush1.bf16.msra.mxu1 %v10130_v51 }
 0x43e   :  { %5057 = vmatprep.subr.bf16.mxu0 %v10131_v17  ;;  %5121 = vmatprep.subr.bf16.mxu1 %v10132_v30 }
 0x441   :  { %5059 = vmatpush1.bf16.msra.mxu0 %v10133_v21  ;;  %5123 = vmatpush1.bf16.msra.mxu1 %v10037_v24 }
 0x442   :  { %5061 = vmatprep.subr.bf16.mxu0 %v10038_v62  ;;  %5125 = vmatprep.subr.bf16.mxu1 %v10039_v3 }
 0x445   :  { %5063 = vmatpush1.bf16.msra.mxu0 %v10040_v22  ;;  %5127 = vmatpush1.bf16.msra.mxu1 %v10041_v60  ;;  %v10289_v22 = vld [vmem:[#allocation136_spill] sm:$0xff] }
 0x446   :  { %5065 = vmatprep.subr.bf16.mxu0 %v10042_v33  ;;  %5129 = vmatprep.subr.bf16.mxu1 %v10043_v4  ;;  %v10218_v4 = vld [vmem:[#allocation129_spill] sm:$0xff]  ;;  %v10288_v33 = vld [vmem:[#allocation134_spill] sm:$0xff] }
 0x449   :  { %5067 = vmatpush1.bf16.msra.mxu0 %v10044_v41  ;;  %5131 = vmatpush1.bf16.msra.mxu1 %v10045_v15  ;;  %v10219_v41 = vld [vmem:[#allocation130_spill] sm:$0xff]  ;;  %v10220_v15 = vld [vmem:[#allocation131_spill] sm:$0xff] }
 0x44a   :  { %5069 = vmatprep.subr.bf16.mxu0 %v10046_v39  ;;  %5133 = vmatprep.subr.bf16.mxu1 %v10047_v28  ;;  %v10221_v39 = vld [vmem:[#allocation132_spill] sm:$0xff]  ;;  %v10222_v28 = vld [vmem:[#allocation5_spill] sm:$0xff] }
 0x44d   :  { %5071 = vmatpush1.bf16.msra.mxu0 %v8019_v54  ;;  %5135 = vmatpush1.bf16.msra.mxu1 %v8023_v29  ;;  %v10223_v54 = vld [vmem:[#allocation6_spill] sm:$0xff]  ;;  %v10234_v29 = vld [vmem:[#allocation17_spill] sm:$0xff] }
 0x44e   :  { %5073 = vmatprep.subr.bf16.mxu0 %v8025_v13  ;;  %5137 = vmatprep.subr.bf16.mxu1 %v8037_v26  ;;  %v10224_v26 = vld [vmem:[#allocation7_spill] sm:$0xff]  ;;  %v10233_v13 = vld [vmem:[#allocation16_spill] sm:$0xff] }
 0x451   :  { %5075 = vmatpush1.bf16.msra.mxu0 %v8055_v37  ;;  %5139 = vmatpush1.bf16.msra.mxu1 %v8059_v14  ;;  %v10225_v37 = vld [vmem:[#allocation8_spill] sm:$0xff]  ;;  %v10226_v14 = vld [vmem:[#allocation9_spill] sm:$0xff] }
 0x452   :  { %5077 = vmatprep.subr.bf16.mxu0 %v10218_v4  ;;  %5141 = vmatprep.subr.bf16.mxu1 %v10219_v41  ;;  %v10227_v4 = vld [vmem:[#allocation10_spill] sm:$0xff]  ;;  %v10228_v41 = vld [vmem:[#allocation11_spill] sm:$0xff] }
 0x455   :  { %5079 = vmatpush1.bf16.msra.mxu0 %v10220_v15  ;;  %5143 = vmatpush1.bf16.msra.mxu1 %v10221_v39  ;;  %v10229_v15 = vld [vmem:[#allocation12_spill] sm:$0xff]  ;;  %v10230_v39 = vld [vmem:[#allocation13_spill] sm:$0xff] }
 0x456   :  { %5145 = vmatprep.subr.bf16.mxu0 %v10222_v28  ;;  %5209 = vmatprep.subr.bf16.mxu1 %v10223_v54  ;;  %v10231_v28 = vld [vmem:[#allocation14_spill] sm:$0xff]  ;;  %v10232_v54 = vld [vmem:[#allocation15_spill] sm:$0xff] }
 0x458   :  { %2276 = vmatmul.mubr.f32.vlgmr.msra.gmra.mrb[22].mxu0 %v8630_v58  ;;  %2347 = vmatmul.mubr.f32.vlgmr.msra.gmra.mrb[22].mxu1 %v8630_v58 }
 0x459   :  { %5147 = vmatpush1.bf16.msra.mxu0 %v10224_v26  ;;  %5211 = vmatpush1.bf16.msra.mxu1 %v10225_v37  ;;  %v10235_v26 = vld [vmem:[#allocation18_spill] sm:$0xff]  ;;  %v10236_v37 = vld [vmem:[#allocation19_spill] sm:$0xff] }
 0x45a   :  { %5149 = vmatprep.subr.bf16.mxu0 %v10226_v14  ;;  %5213 = vmatprep.subr.bf16.mxu1 %v10227_v4  ;;  %v10237_v14 = vld [vmem:[#allocation20_spill] sm:$0xff]  ;;  %v10238_v4 = vld [vmem:[#allocation21_spill] sm:$0xff] }
 0x45d   :  { %5151 = vmatpush1.bf16.msra.mxu0 %v10228_v41  ;;  %5215 = vmatpush1.bf16.msra.mxu1 %v10229_v15  ;;  %v10239_v41 = vld [vmem:[#allocation22_spill] sm:$0xff]  ;;  %v10240_v15 = vld [vmem:[#allocation23_spill] sm:$0xff] }
 0x45e   :  { %5153 = vmatprep.subr.bf16.mxu0 %v10230_v39  ;;  %5217 = vmatprep.subr.bf16.mxu1 %v10231_v28  ;;  %v10241_v39 = vld [vmem:[#allocation24_spill] sm:$0xff]  ;;  %v10242_v28 = vld [vmem:[#allocation25_spill] sm:$0xff] }
 0x461   :  { %5155 = vmatpush1.bf16.msra.mxu0 %v10232_v54  ;;  %5219 = vmatpush1.bf16.msra.mxu1 %v10233_v13  ;;  %v10243_v54 = vld [vmem:[#allocation26_spill] sm:$0xff]  ;;  %v10244_v13 = vld [vmem:[#allocation27_spill] sm:$0xff] }
 0x462   :  { %5157 = vmatprep.subr.bf16.mxu0 %v10234_v29  ;;  %5221 = vmatprep.subr.bf16.mxu1 %v10235_v26  ;;  %v10245_v29 = vld [vmem:[#allocation28_spill] sm:$0xff]  ;;  %v10246_v26 = vld [vmem:[#allocation29_spill] sm:$0xff] }
 0x465   :  { %5159 = vmatpush1.bf16.msra.mxu0 %v10236_v37  ;;  %5223 = vmatpush1.bf16.msra.mxu1 %v10237_v14  ;;  %v10247_v37 = vld [vmem:[#allocation30_spill] sm:$0xff]  ;;  %v10248_v14 = vld [vmem:[#allocation31_spill] sm:$0xff] }
 0x466   :  { %5161 = vmatprep.subr.bf16.mxu0 %v10238_v4  ;;  %5225 = vmatprep.subr.bf16.mxu1 %v10239_v41  ;;  %v10249_v4 = vld [vmem:[#allocation32_spill] sm:$0xff]  ;;  %v10250_v41 = vld [vmem:[#allocation33_spill] sm:$0xff] }
 0x469   :  { %5163 = vmatpush1.bf16.msra.mxu0 %v10240_v15  ;;  %5227 = vmatpush1.bf16.msra.mxu1 %v10241_v39  ;;  %v10251_v15 = vld [vmem:[#allocation34_spill] sm:$0xff]  ;;  %v10252_v39 = vld [vmem:[#allocation35_spill] sm:$0xff] }
 0x46a   :  { %5165 = vmatprep.subr.bf16.mxu0 %v10242_v28  ;;  %5229 = vmatprep.subr.bf16.mxu1 %v10243_v54  ;;  %v10253_v28 = vld [vmem:[#allocation36_spill] sm:$0xff]  ;;  %v10254_v54 = vld [vmem:[#allocation37_spill] sm:$0xff] }
 0x46d   :  { %5167 = vmatpush1.bf16.msra.mxu0 %v10244_v13  ;;  %5231 = vmatpush1.bf16.msra.mxu1 %v10245_v29  ;;  %v10255_v13 = vld [vmem:[#allocation38_spill] sm:$0xff]  ;;  %v10256_v29 = vld [vmem:[#allocation39_spill] sm:$0xff] }
 0x46e   :  { %5169 = vmatprep.subr.bf16.mxu0 %v10246_v26  ;;  %5233 = vmatprep.subr.bf16.mxu1 %v10247_v37  ;;  %v10257_v26 = vld [vmem:[#allocation40_spill] sm:$0xff]  ;;  %v10258_v37 = vld [vmem:[#allocation41_spill] sm:$0xff] }
 0x471   :  { %5171 = vmatpush1.bf16.msra.mxu0 %v10248_v14  ;;  %5235 = vmatpush1.bf16.msra.mxu1 %v10249_v4  ;;  %v10259_v14 = vld [vmem:[#allocation42_spill] sm:$0xff]  ;;  %v10260_v4 = vld [vmem:[#allocation43_spill] sm:$0xff] }
 0x472   :  { %5173 = vmatprep.subr.bf16.mxu0 %v10250_v41  ;;  %5237 = vmatprep.subr.bf16.mxu1 %v10251_v15  ;;  %v10261_v41 = vld [vmem:[#allocation44_spill] sm:$0xff]  ;;  %v10262_v15 = vld [vmem:[#allocation45_spill] sm:$0xff] }
 0x475   :  { %5175 = vmatpush1.bf16.msra.mxu0 %v10252_v39  ;;  %5239 = vmatpush1.bf16.msra.mxu1 %v10253_v28  ;;  %v10263_v39 = vld [vmem:[#allocation46_spill] sm:$0xff]  ;;  %v10264_v28 = vld [vmem:[#allocation47_spill] sm:$0xff] }
 0x476   :  { %5177 = vmatprep.subr.bf16.mxu0 %v10254_v54  ;;  %5241 = vmatprep.subr.bf16.mxu1 %v10255_v13  ;;  %v10265_v54 = vld [vmem:[#allocation48_spill] sm:$0xff]  ;;  %v10266_v13 = vld [vmem:[#allocation49_spill] sm:$0xff] }
 0x479   :  { %5179 = vmatpush1.bf16.msra.mxu0 %v10256_v29  ;;  %5243 = vmatpush1.bf16.msra.mxu1 %v10257_v26  ;;  %v10267_v29 = vld [vmem:[#allocation50_spill] sm:$0xff]  ;;  %v10268_v26 = vld [vmem:[#allocation51_spill] sm:$0xff] }
 0x47a   :  { %5181 = vmatprep.subr.bf16.mxu0 %v10258_v37  ;;  %5245 = vmatprep.subr.bf16.mxu1 %v10259_v14  ;;  %v10269_v37 = vld [vmem:[#allocation52_spill] sm:$0xff]  ;;  %v10270_v14 = vld [vmem:[#allocation53_spill] sm:$0xff] }
 0x47d   :  { %5183 = vmatpush1.bf16.msra.mxu0 %v10260_v4  ;;  %5247 = vmatpush1.bf16.msra.mxu1 %v10261_v41  ;;  %v10271_v4 = vld [vmem:[#allocation54_spill] sm:$0xff]  ;;  %v10272_v41 = vld [vmem:[#allocation55_spill] sm:$0xff] }
 0x47e   :  { %5185 = vmatprep.subr.bf16.mxu0 %v10262_v15  ;;  %5249 = vmatprep.subr.bf16.mxu1 %v10263_v39  ;;  %v10273_v15 = vld [vmem:[#allocation56_spill] sm:$0xff]  ;;  %v10274_v39 = vld [vmem:[#allocation57_spill] sm:$0xff] }
 0x481   :  { %5187 = vmatpush1.bf16.msra.mxu0 %v10264_v28  ;;  %5251 = vmatpush1.bf16.msra.mxu1 %v10265_v54  ;;  %v10275_v28 = vld [vmem:[#allocation58_spill] sm:$0xff]  ;;  %v10276_v54 = vld [vmem:[#allocation59_spill] sm:$0xff] }
 0x482   :  { %5189 = vmatprep.subr.bf16.mxu0 %v10266_v13  ;;  %5253 = vmatprep.subr.bf16.mxu1 %v10267_v29  ;;  %v10277_v13 = vld [vmem:[#allocation60_spill] sm:$0xff]  ;;  %v10278_v29 = vld [vmem:[#allocation61_spill] sm:$0xff] }
 0x485   :  { %5191 = vmatpush1.bf16.msra.mxu0 %v10268_v26  ;;  %5255 = vmatpush1.bf16.msra.mxu1 %v10269_v37  ;;  %v10279_v26 = vld [vmem:[#allocation62_spill] sm:$0xff]  ;;  %v10280_v37 = vld [vmem:[#allocation63_spill] sm:$0xff] }
 0x486   :  { %5193 = vmatprep.subr.bf16.mxu0 %v10270_v14  ;;  %5257 = vmatprep.subr.bf16.mxu1 %v10271_v4  ;;  %v10281_v14 = vld [vmem:[#allocation64_spill] sm:$0xff]  ;;  %v10282_v4 = vld [vmem:[#allocation65_spill] sm:$0xff] }
 0x489   :  { %5195 = vmatpush1.bf16.msra.mxu0 %v10272_v41  ;;  %5259 = vmatpush1.bf16.msra.mxu1 %v10273_v15  ;;  %v10283_v41 = vld [vmem:[#allocation66_spill] sm:$0xff]  ;;  %v10284_v15 = vld [vmem:[#allocation67_spill] sm:$0xff] }
 0x48a   :  { %5197 = vmatprep.subr.bf16.mxu0 %v10274_v39  ;;  %5261 = vmatprep.subr.bf16.mxu1 %v10275_v28  ;;  %v10285_v39 = vld [vmem:[#allocation68_spill] sm:$0xff]  ;;  %v10286_v28 = vld [vmem:[#allocation69_spill] sm:$0xff] }
 0x48d   :  { %5199 = vmatpush1.bf16.msra.mxu0 %v10276_v54  ;;  %5263 = vmatpush1.bf16.msra.mxu1 %v10277_v13  ;;  %v10287_v54 = vld [vmem:[#allocation70_spill] sm:$0xff] }
 0x48e   :  { %5201 = vmatprep.subr.bf16.mxu0 %v10278_v29  ;;  %5265 = vmatprep.subr.bf16.mxu1 %v10279_v26 }
 0x491   :  { %5203 = vmatpush1.bf16.msra.mxu0 %v10280_v37  ;;  %5267 = vmatpush1.bf16.msra.mxu1 %v10281_v14 }
 0x492   :  { %5205 = vmatprep.subr.bf16.mxu0 %v10282_v4  ;;  %5269 = vmatprep.subr.bf16.mxu1 %v10283_v41 }
 0x495   :  { %5207 = vmatpush1.bf16.msra.mxu0 %v10284_v15  ;;  %5271 = vmatpush1.bf16.msra.mxu1 %v10285_v39 }
 0x496   :  { %5273 = vmatprep.subr.bf16.mxu0 %v10286_v28  ;;  %5337 = vmatprep.subr.bf16.mxu1 %v10287_v54 }
 0x4eb   :  { %v2135_v13 = vpop.f32.mrb[6].mxu0  ;;  %v2206_v29 = vpop.f32.mrb[6].mxu1 }
 0x4ec   :  { %v6190_v26 = vadd.f32 %v2206_v29, %v10288_v33  ;;  %v2137_v60 = vpop.f32.mrb[7].mxu0  ;;  %v2208_v37 = vpop.f32.mrb[7].mxu1  ;;  %v6174_v33 = vadd.f32 %v2135_v13, %v10084_v9 }
 0x4ed   :  { %v6191_v14 = vadd.f32 %v2208_v37, %v10289_v22  ;;  %v6175_v37 = vadd.f32 %v2137_v60, %v10085_v16 }
 0x4ee   :  { %v4010_v3 = vmul.f32 -1.442695, %v6190_v26  ;;  %v4008_v26 = vmul.f32 -1.442695, %v6174_v33 }
 0x4ef   :  { %v4011_v4 = vmul.f32 -1.442695, %v6191_v14  ;;  %v4009_v14 = vmul.f32 -1.442695, %v6175_v37 }
 0x4f0   :  { %6393 = vpow2.f32 %v4010_v3 }
 0x4f1   :  { %6395 = vpow2.f32 %v4011_v4 }
 0x4fa   :  { %v6394_v41 = vpop.eup %6393 }
 0x4fb   :  { %v2390_v15 = vadd.f32 1.0, %v6394_v41  ;;  %v6396_v62 = vpop.eup %6395 }
 0x4fc   :  { %v2391_v39 = vadd.f32 1.0, %v6396_v62 }
 0x4fd   :  { %6397 = vrcp.f32 %v2390_v15 }
 0x4fe   :  { %6399 = vrcp.f32 %v2391_v39 }
 0x4ff   :  { %6401 = vpow2.f32 %v4008_v26 }
 0x500   :  { %6403 = vpow2.f32 %v4009_v14 }
 0x507   :  { %v6398_v28 = vpop.eup %6397 }
 0x508   :  { %v2410_v54 = vmul.f32 %v6398_v28, %v8603_v46  ;;  %v6400_v24 = vpop.eup %6399 }
 0x509   :  { %v2411_v29 = vmul.f32 %v6400_v24, %v8608_v31  ;;  %v6402_v3 = vpop.eup %6401 }
 0x50a   :  { %v6404_v4 = vpop.eup %6403  ;;  %v2378_v41 = vadd.f32 1.0, %v6402_v3  ;;  %v8779_v3 = vld [vmem:[%s9536_s4] sm:$0xff] }
 0x50b   :  { %v2379_v15 = vadd.f32 1.0, %v6404_v4  ;;  %vm2420_vm3 = vcmp.le.s32.totalorder %v8779_v3, 3  ;;  %v8785_v4 = vld [vmem:[%s9537_s5] sm:$0xff]  ;;  %vm2794_vm9 = vcmp.le.s32.totalorder %v8779_v3, 4  ;;  %vm3168_vm15 = vcmp.le.s32.totalorder %v8779_v3, 5  ;;  %v10507_v3 = vld [vmem:[#allocation114_spill] sm:$0xff] }
 0x50c   :  { %6405 = vrcp.f32 %v2378_v41  ;;  %10290 = vst [vmem:[#allocation133_spill] sm:$0xff] %v8785_v4  ;;  %vm2422_vm4 = vcmp.gt.s32.totalorder %v8785_v4, 3  ;;  %v8797_v41 = vld [vmem:[%s9537_s5 + $0x8] sm:$0xff] }
 0x50d   :  { %6407 = vrcp.f32 %v2379_v15  ;;  %vm2423_vm6 = vcmp.gt.s32.totalorder %v8797_v41, 3  ;;  %vm8800_vm7 = vmand %vm2420_vm3, %vm2422_vm4  ;;  %vm2797_vm12 = vcmp.gt.s32.totalorder %v8797_v41, 4  ;;  %vm3171_vm2 = vcmp.gt.s32.totalorder %v8797_v41, 5 }
 0x516   :  { %v6406_v26 = vpop.eup %6405 }
 0x517   :  { %v6408_v14 = vpop.eup %6407 }
 0x52b   :  { %v2277_v62 = vpop.f32.mrb[22].mxu0  ;;  %v2348_v39 = vpop.f32.mrb[22].mxu1 }
 0x52c   :  { %v6206_v28 = vadd.f32 %v2277_v62, %v8171_v27  ;;  %v6222_v22 = vadd.f32 %v2348_v39, %v8173_v5  ;;  %v2279_v24 = vpop.f32.mrb[23].mxu0  ;;  %v2350_v21 = vpop.f32.mrb[23].mxu1 }
 0x52d   :  { %v6207_v13 = vadd.f32 %v2279_v24, %v8175_v59  ;;  %v6223_v33 = vadd.f32 %v2350_v21, %v8177_v36  ;;  %v8791_v21 = vld [vmem:[%s9536_s4 + $0x8] sm:$0xff]  ;;  %v10299_v24 = vld [vmem:[#allocation89_spill] sm:$0xff] }
 0x52e   :  { %6409 = vtanh.f32 %v6206_v28  ;;  %v4012_v60 = vmul.f32 -1.442695, %v6222_v22  ;;  %10291 = vst [vmem:[#allocation135_spill] sm:$0xff] %v8791_v21  ;;  %vm2421_vm5 = vcmp.le.s32.totalorder %v8791_v21, 3 }
 0x52f   :  { %6411 = vtanh.f32 %v6207_v13  ;;  %v4013_v37 = vmul.f32 -1.442695, %v6223_v33  ;;  %vm8804_vm8 = vmand %vm2421_vm5, %vm2423_vm6 }
 0x530   :  { %6413 = vpow2.f32 %v4012_v60 }
 0x531   :  { %6415 = vpow2.f32 %v4013_v37  ;;  %v10303_v37 = vld [vmem:[#allocation114_spill] sm:$0xff] }
 0x538   :  { %v6410_v22 = vpop.eup %6409 }
 0x539   :  { %v6412_v15 = vpop.eup %6411  ;;  %v2412_v62 = vmul.f32 %v6410_v22, %v6406_v26 }
 0x53a   :  { %v6414_v39 = vpop.eup %6413  ;;  %v2413_v28 = vmul.f32 %v6412_v15, %v6408_v14 }
 0x53b   :  { %v6416_v13 = vpop.eup %6415  ;;  %v2414_v33 = vadd.f32 %v2412_v62, %v2410_v54  ;;  %v2404_v60 = vadd.f32 1.0, %v6414_v39 }
 0x53c   :  { %v2415_v21 = vadd.f32 %v2413_v28, %v2411_v29  ;;  %v2405_v4 = vadd.f32 1.0, %v6416_v13  ;;  %v10300_v13 = vld [vmem:[#allocation111_spill] sm:$0xff] }
 0x53d   :  { %6417 = vtanh.f32 %v2414_v33  ;;  %v8811_v26 = vsel %vm8800_vm7, %v2414_v33, %v8603_v46  ;;  %v10301_v33 = vld [vmem:[#allocation112_spill] sm:$0xff] }
 0x53e   :  { %6419 = vrcp.f32 %v2404_v60  ;;  %v8816_v14 = vsel %vm8804_vm8, %v2415_v21, %v8608_v31  ;;  %v10302_v60 = vld [vmem:[#allocation113_spill] sm:$0xff] }
 0x53f   :  { %6421 = vtanh.f32 %v2415_v21  ;;  %v10298_v21 = vld [vmem:[#allocation88_spill] sm:$0xff] }
 0x540   :  { %6423 = vrcp.f32 %v2405_v4 }
 0x547   :  { %v6418_v54 = vpop.eup %6417 }
 0x548   :  { %v6420_v22 = vpop.eup %6419 }
 0x549   :  { %v6422_v15 = vpop.eup %6421  ;;  %v2418_v62 = vmul.f32 %v6420_v22, %v6418_v54  ;;  %v10304_v54 = vld [vmem:[#allocation115_spill] sm:$0xff]  ;;  %v10305_v22 = vld [vmem:[#allocation116_spill] sm:$0xff] }
 0x54a   :  { %v6424_v29 = vpop.eup %6423 }
 0x54b   :  { %v2419_v39 = vmul.f32 %v6424_v29, %v6422_v15  ;;  %v2434_v28 = vsel %vm8800_vm7, %v2418_v62, 0.0  ;;  %v8838_v4 = vsel %vm8800_vm7, %v2418_v62, %v8630_v58  ;;  %v10297_v58 = vld [vmem:[#allocation87_spill] sm:$0xff]  ;;  %v10306_v15 = vld [vmem:[#allocation117_spill] sm:$0xff]  ;;  %v10307_v62 = vld [vmem:[#allocation118_spill] sm:$0xff] }
 0x54c   :  { %4014 = vst [vmem:[%s9538_s6 + $0x30] sm:$0xff] %v2434_v28  ;;  %v10308_v29 = vld [vmem:[#allocation119_spill] sm:$0xff]  ;;  %v10310_v28 = vld [vmem:[#allocation121_spill] sm:$0xff] }
 0x54d   :  { %v8826_v46 = vsel %vm8804_vm8, %v2419_v39, %v8618_v2  ;;  %v2435_v31 = vsel %vm8804_vm8, %v2419_v39, 0.0  ;;  %v10296_v2 = vld [vmem:[#allocation86_spill] sm:$0xff]  ;;  %v10309_v39 = vld [vmem:[#allocation120_spill] sm:$0xff] }
 0x54e   :  { %4015 = vst [vmem:[%s9538_s6 + $0x38] sm:$0xff] %v2435_v31  ;;  %2507 = vmatprep.mubr.f32.mxu0 %v8826_v46  ;;  %2578 = vmatprep.mubr.f32.mxu1 %v8826_v46  ;;  %v10311_v31 = vld [vmem:[#allocation122_spill] sm:$0xff] }
 0x54f   :  { %2508 = vmatmul.mubr.f32.vlgmr.msra.gmra.mrb[8].mxu0 %v8838_v4  ;;  %2579 = vmatmul.mubr.f32.vlgmr.msra.gmra.mrb[8].mxu1 %v8838_v4 }
 0x550   :  { %5275 = vmatpush1.bf16.msra.mxu0 %v10093_v40  ;;  %5339 = vmatpush1.bf16.msra.mxu1 %v10094_v49 }
 0x551   :  { %2649 = vmatprep.mubr.f32.mxu0 %v8826_v46  ;;  %2720 = vmatprep.mubr.f32.mxu1 %v8826_v46 }
 0x552   :  { %5277 = vmatprep.subr.bf16.mxu0 %v10095_v0  ;;  %5341 = vmatprep.subr.bf16.mxu1 %v10096_v11 }
 0x554   :  { %5279 = vmatpush1.bf16.msra.mxu0 %v10192_v34  ;;  %5343 = vmatpush1.bf16.msra.mxu1 %v10193_v55 }
 0x555   :  { %5281 = vmatprep.subr.bf16.mxu0 %v10194_v63  ;;  %5345 = vmatprep.subr.bf16.mxu1 %v10195_v6 }
 0x558   :  { %5283 = vmatpush1.bf16.msra.mxu0 %v10196_v44  ;;  %5347 = vmatpush1.bf16.msra.mxu1 %v10197_v61 }
 0x559   :  { %5285 = vmatprep.subr.bf16.mxu0 %v10198_v7  ;;  %5349 = vmatprep.subr.bf16.mxu1 %v10199_v42 }
 0x55c   :  { %5287 = vmatpush1.bf16.msra.mxu0 %v10200_v10  ;;  %5351 = vmatpush1.bf16.msra.mxu1 %v10201_v8 }
 0x55d   :  { %5289 = vmatprep.subr.bf16.mxu0 %v10202_v12  ;;  %5353 = vmatprep.subr.bf16.mxu1 %v10296_v2 }
 0x560   :  { %5291 = vmatpush1.bf16.msra.mxu0 %v10297_v58  ;;  %5355 = vmatpush1.bf16.msra.mxu1 %v10298_v21 }
 0x561   :  { %5293 = vmatprep.subr.bf16.mxu0 %v10299_v24  ;;  %5357 = vmatprep.subr.bf16.mxu1 %v10207_v43 }
 0x564   :  { %5295 = vmatpush1.bf16.msra.mxu0 %v10208_v56  ;;  %5359 = vmatpush1.bf16.msra.mxu1 %v10209_v19 }
 0x565   :  { %5297 = vmatprep.subr.bf16.mxu0 %v10210_v20  ;;  %5361 = vmatprep.subr.bf16.mxu1 %v10211_v57 }
 0x568   :  { %5299 = vmatpush1.bf16.msra.mxu0 %v10212_v23  ;;  %5363 = vmatpush1.bf16.msra.mxu1 %v10213_v48 }
 0x569   :  { %5301 = vmatprep.subr.bf16.mxu0 %v10214_v38  ;;  %5365 = vmatprep.subr.bf16.mxu1 %v10215_v52 }
 0x56c   :  { %5303 = vmatpush1.bf16.msra.mxu0 %v10216_v47  ;;  %5367 = vmatpush1.bf16.msra.mxu1 %v10217_v18 }
 0x56d   :  { %5305 = vmatprep.subr.bf16.mxu0 %v10123_v25  ;;  %5369 = vmatprep.subr.bf16.mxu1 %v10124_v1 }
 0x570   :  { %5307 = vmatpush1.bf16.msra.mxu0 %v10125_v35  ;;  %5371 = vmatpush1.bf16.msra.mxu1 %v10126_v32 }
 0x571   :  { %5309 = vmatprep.subr.bf16.mxu0 %v10127_v53  ;;  %5373 = vmatprep.subr.bf16.mxu1 %v10128_v45 }
 0x574   :  { %5311 = vmatpush1.bf16.msra.mxu0 %v10129_v50  ;;  %5375 = vmatpush1.bf16.msra.mxu1 %v10130_v51 }
 0x575   :  { %5313 = vmatprep.subr.bf16.mxu0 %v10131_v17  ;;  %5377 = vmatprep.subr.bf16.mxu1 %v10132_v30  ;;  %v10389_v17 = vld [vmem:[#allocation136_spill] sm:$0xff] }
 0x578   :  { %5315 = vmatpush1.bf16.msra.mxu0 %v10300_v13  ;;  %5379 = vmatpush1.bf16.msra.mxu1 %v10301_v33  ;;  %v10312_v33 = vld [vmem:[#allocation123_spill] sm:$0xff]  ;;  %v10388_v13 = vld [vmem:[#allocation134_spill] sm:$0xff] }
 0x579   :  { %5317 = vmatprep.subr.bf16.mxu0 %v10302_v60  ;;  %5381 = vmatprep.subr.bf16.mxu1 %v10303_v37  ;;  %v10313_v60 = vld [vmem:[#allocation124_spill] sm:$0xff]  ;;  %v10314_v37 = vld [vmem:[#allocation125_spill] sm:$0xff] }
 0x57c   :  { %5319 = vmatpush1.bf16.msra.mxu0 %v10304_v54  ;;  %5383 = vmatpush1.bf16.msra.mxu1 %v10305_v22  ;;  %v10315_v54 = vld [vmem:[#allocation126_spill] sm:$0xff]  ;;  %v10316_v22 = vld [vmem:[#allocation127_spill] sm:$0xff] }
 0x57d   :  { %5321 = vmatprep.subr.bf16.mxu0 %v10306_v15  ;;  %5385 = vmatprep.subr.bf16.mxu1 %v10307_v62  ;;  %v10317_v15 = vld [vmem:[#allocation128_spill] sm:$0xff]  ;;  %v10318_v62 = vld [vmem:[#allocation129_spill] sm:$0xff] }
 0x580   :  { %5323 = vmatpush1.bf16.msra.mxu0 %v10308_v29  ;;  %5387 = vmatpush1.bf16.msra.mxu1 %v10309_v39  ;;  %v10319_v29 = vld [vmem:[#allocation130_spill] sm:$0xff]  ;;  %v10320_v39 = vld [vmem:[#allocation131_spill] sm:$0xff] }
 0x581   :  { %5325 = vmatprep.subr.bf16.mxu0 %v10310_v28  ;;  %5389 = vmatprep.subr.bf16.mxu1 %v10311_v31  ;;  %v10321_v28 = vld [vmem:[#allocation132_spill] sm:$0xff]  ;;  %v10322_v31 = vld [vmem:[#allocation5_spill] sm:$0xff] }
 0x584   :  { %5327 = vmatpush1.bf16.msra.mxu0 %v10312_v33  ;;  %5391 = vmatpush1.bf16.msra.mxu1 %v10313_v60  ;;  %v10323_v33 = vld [vmem:[#allocation6_spill] sm:$0xff]  ;;  %v10334_v60 = vld [vmem:[#allocation17_spill] sm:$0xff] }
 0x585   :  { %5329 = vmatprep.subr.bf16.mxu0 %v10314_v37  ;;  %5393 = vmatprep.subr.bf16.mxu1 %v10315_v54  ;;  %v10324_v54 = vld [vmem:[#allocation7_spill] sm:$0xff]  ;;  %v10333_v37 = vld [vmem:[#allocation16_spill] sm:$0xff] }
 0x588   :  { %5331 = vmatpush1.bf16.msra.mxu0 %v10316_v22  ;;  %5395 = vmatpush1.bf16.msra.mxu1 %v10317_v15  ;;  %v10325_v22 = vld [vmem:[#allocation8_spill] sm:$0xff]  ;;  %v10326_v15 = vld [vmem:[#allocation9_spill] sm:$0xff] }
 0x589   :  { %5333 = vmatprep.subr.bf16.mxu0 %v10318_v62  ;;  %5397 = vmatprep.subr.bf16.mxu1 %v10319_v29  ;;  %v10327_v62 = vld [vmem:[#allocation10_spill] sm:$0xff]  ;;  %v10328_v29 = vld [vmem:[#allocation11_spill] sm:$0xff] }
 0x58c   :  { %5335 = vmatpush1.bf16.msra.mxu0 %v10320_v39  ;;  %5399 = vmatpush1.bf16.msra.mxu1 %v10321_v28  ;;  %v10329_v39 = vld [vmem:[#allocation12_spill] sm:$0xff]  ;;  %v10330_v28 = vld [vmem:[#allocation13_spill] sm:$0xff] }
 0x58d   :  { %5401 = vmatprep.subr.bf16.mxu0 %v10322_v31  ;;  %5465 = vmatprep.subr.bf16.mxu1 %v10323_v33  ;;  %v10331_v31 = vld [vmem:[#allocation14_spill] sm:$0xff]  ;;  %v10332_v33 = vld [vmem:[#allocation15_spill] sm:$0xff] }
 0x58f   :  { %2650 = vmatmul.mubr.f32.vlgmr.msra.gmra.mrb[24].mxu0 %v8838_v4  ;;  %2721 = vmatmul.mubr.f32.vlgmr.msra.gmra.mrb[24].mxu1 %v8838_v4 }
 0x590   :  { %5403 = vmatpush1.bf16.msra.mxu0 %v10324_v54  ;;  %5467 = vmatpush1.bf16.msra.mxu1 %v10325_v22  ;;  %v10335_v54 = vld [vmem:[#allocation18_spill] sm:$0xff]  ;;  %v10336_v22 = vld [vmem:[#allocation19_spill] sm:$0xff] }
 0x591   :  { %5405 = vmatprep.subr.bf16.mxu0 %v10326_v15  ;;  %5469 = vmatprep.subr.bf16.mxu1 %v10327_v62  ;;  %v10337_v15 = vld [vmem:[#allocation20_spill] sm:$0xff]  ;;  %v10338_v62 = vld [vmem:[#allocation21_spill] sm:$0xff] }
 0x594   :  { %5407 = vmatpush1.bf16.msra.mxu0 %v10328_v29  ;;  %5471 = vmatpush1.bf16.msra.mxu1 %v10329_v39  ;;  %v10339_v29 = vld [vmem:[#allocation22_spill] sm:$0xff]  ;;  %v10340_v39 = vld [vmem:[#allocation23_spill] sm:$0xff] }
 0x595   :  { %5409 = vmatprep.subr.bf16.mxu0 %v10330_v28  ;;  %5473 = vmatprep.subr.bf16.mxu1 %v10331_v31  ;;  %v10341_v28 = vld [vmem:[#allocation24_spill] sm:$0xff]  ;;  %v10342_v31 = vld [vmem:[#allocation25_spill] sm:$0xff] }
 0x598   :  { %5411 = vmatpush1.bf16.msra.mxu0 %v10332_v33  ;;  %5475 = vmatpush1.bf16.msra.mxu1 %v10333_v37  ;;  %v10343_v33 = vld [vmem:[#allocation26_spill] sm:$0xff]  ;;  %v10344_v37 = vld [vmem:[#allocation27_spill] sm:$0xff] }
 0x599   :  { %5413 = vmatprep.subr.bf16.mxu0 %v10334_v60  ;;  %5477 = vmatprep.subr.bf16.mxu1 %v10335_v54  ;;  %v10345_v60 = vld [vmem:[#allocation28_spill] sm:$0xff]  ;;  %v10346_v54 = vld [vmem:[#allocation29_spill] sm:$0xff] }
 0x59c   :  { %5415 = vmatpush1.bf16.msra.mxu0 %v10336_v22  ;;  %5479 = vmatpush1.bf16.msra.mxu1 %v10337_v15  ;;  %v10347_v22 = vld [vmem:[#allocation30_spill] sm:$0xff]  ;;  %v10348_v15 = vld [vmem:[#allocation31_spill] sm:$0xff] }
 0x59d   :  { %5417 = vmatprep.subr.bf16.mxu0 %v10338_v62  ;;  %5481 = vmatprep.subr.bf16.mxu1 %v10339_v29  ;;  %v10349_v62 = vld [vmem:[#allocation32_spill] sm:$0xff]  ;;  %v10350_v29 = vld [vmem:[#allocation33_spill] sm:$0xff] }
 0x5a0   :  { %5419 = vmatpush1.bf16.msra.mxu0 %v10340_v39  ;;  %5483 = vmatpush1.bf16.msra.mxu1 %v10341_v28  ;;  %v10351_v39 = vld [vmem:[#allocation34_spill] sm:$0xff]  ;;  %v10352_v28 = vld [vmem:[#allocation35_spill] sm:$0xff] }
 0x5a1   :  { %5421 = vmatprep.subr.bf16.mxu0 %v10342_v31  ;;  %5485 = vmatprep.subr.bf16.mxu1 %v10343_v33  ;;  %v10353_v31 = vld [vmem:[#allocation36_spill] sm:$0xff]  ;;  %v10354_v33 = vld [vmem:[#allocation37_spill] sm:$0xff] }
 0x5a4   :  { %5423 = vmatpush1.bf16.msra.mxu0 %v10344_v37  ;;  %5487 = vmatpush1.bf16.msra.mxu1 %v10345_v60  ;;  %v10355_v37 = vld [vmem:[#allocation38_spill] sm:$0xff]  ;;  %v10356_v60 = vld [vmem:[#allocation39_spill] sm:$0xff] }
 0x5a5   :  { %5425 = vmatprep.subr.bf16.mxu0 %v10346_v54  ;;  %5489 = vmatprep.subr.bf16.mxu1 %v10347_v22  ;;  %v10357_v54 = vld [vmem:[#allocation40_spill] sm:$0xff]  ;;  %v10358_v22 = vld [vmem:[#allocation41_spill] sm:$0xff] }
 0x5a8   :  { %5427 = vmatpush1.bf16.msra.mxu0 %v10348_v15  ;;  %5491 = vmatpush1.bf16.msra.mxu1 %v10349_v62  ;;  %v10359_v15 = vld [vmem:[#allocation42_spill] sm:$0xff]  ;;  %v10360_v62 = vld [vmem:[#allocation43_spill] sm:$0xff] }
 0x5a9   :  { %5429 = vmatprep.subr.bf16.mxu0 %v10350_v29  ;;  %5493 = vmatprep.subr.bf16.mxu1 %v10351_v39  ;;  %v10361_v29 = vld [vmem:[#allocation44_spill] sm:$0xff]  ;;  %v10362_v39 = vld [vmem:[#allocation45_spill] sm:$0xff] }
 0x5ac   :  { %5431 = vmatpush1.bf16.msra.mxu0 %v10352_v28  ;;  %5495 = vmatpush1.bf16.msra.mxu1 %v10353_v31  ;;  %v10363_v28 = vld [vmem:[#allocation46_spill] sm:$0xff]  ;;  %v10364_v31 = vld [vmem:[#allocation47_spill] sm:$0xff] }
 0x5ad   :  { %5433 = vmatprep.subr.bf16.mxu0 %v10354_v33  ;;  %5497 = vmatprep.subr.bf16.mxu1 %v10355_v37  ;;  %v10365_v33 = vld [vmem:[#allocation48_spill] sm:$0xff]  ;;  %v10366_v37 = vld [vmem:[#allocation49_spill] sm:$0xff] }
 0x5b0   :  { %5435 = vmatpush1.bf16.msra.mxu0 %v10356_v60  ;;  %5499 = vmatpush1.bf16.msra.mxu1 %v10357_v54  ;;  %v10367_v60 = vld [vmem:[#allocation50_spill] sm:$0xff]  ;;  %v10368_v54 = vld [vmem:[#allocation51_spill] sm:$0xff] }
 0x5b1   :  { %5437 = vmatprep.subr.bf16.mxu0 %v10358_v22  ;;  %5501 = vmatprep.subr.bf16.mxu1 %v10359_v15  ;;  %v10369_v22 = vld [vmem:[#allocation52_spill] sm:$0xff]  ;;  %v10370_v15 = vld [vmem:[#allocation53_spill] sm:$0xff] }
 0x5b4   :  { %5439 = vmatpush1.bf16.msra.mxu0 %v10360_v62  ;;  %5503 = vmatpush1.bf16.msra.mxu1 %v10361_v29  ;;  %v10371_v62 = vld [vmem:[#allocation54_spill] sm:$0xff]  ;;  %v10372_v29 = vld [vmem:[#allocation55_spill] sm:$0xff] }
 0x5b5   :  { %5441 = vmatprep.subr.bf16.mxu0 %v10362_v39  ;;  %5505 = vmatprep.subr.bf16.mxu1 %v10363_v28  ;;  %v10373_v39 = vld [vmem:[#allocation56_spill] sm:$0xff]  ;;  %v10374_v28 = vld [vmem:[#allocation57_spill] sm:$0xff] }
 0x5b8   :  { %5443 = vmatpush1.bf16.msra.mxu0 %v10364_v31  ;;  %5507 = vmatpush1.bf16.msra.mxu1 %v10365_v33  ;;  %v10375_v31 = vld [vmem:[#allocation58_spill] sm:$0xff]  ;;  %v10376_v33 = vld [vmem:[#allocation59_spill] sm:$0xff] }
 0x5b9   :  { %5445 = vmatprep.subr.bf16.mxu0 %v10366_v37  ;;  %5509 = vmatprep.subr.bf16.mxu1 %v10367_v60  ;;  %v10377_v37 = vld [vmem:[#allocation60_spill] sm:$0xff]  ;;  %v10378_v60 = vld [vmem:[#allocation61_spill] sm:$0xff] }
 0x5bc   :  { %5447 = vmatpush1.bf16.msra.mxu0 %v10368_v54  ;;  %5511 = vmatpush1.bf16.msra.mxu1 %v10369_v22  ;;  %v10379_v54 = vld [vmem:[#allocation62_spill] sm:$0xff]  ;;  %v10380_v22 = vld [vmem:[#allocation63_spill] sm:$0xff] }
 0x5bd   :  { %5449 = vmatprep.subr.bf16.mxu0 %v10370_v15  ;;  %5513 = vmatprep.subr.bf16.mxu1 %v10371_v62  ;;  %v10381_v15 = vld [vmem:[#allocation64_spill] sm:$0xff]  ;;  %v10382_v62 = vld [vmem:[#allocation65_spill] sm:$0xff] }
 0x5c0   :  { %5451 = vmatpush1.bf16.msra.mxu0 %v10372_v29  ;;  %5515 = vmatpush1.bf16.msra.mxu1 %v10373_v39  ;;  %v10383_v29 = vld [vmem:[#allocation66_spill] sm:$0xff]  ;;  %v10384_v39 = vld [vmem:[#allocation67_spill] sm:$0xff] }
 0x5c1   :  { %5453 = vmatprep.subr.bf16.mxu0 %v10374_v28  ;;  %5517 = vmatprep.subr.bf16.mxu1 %v10375_v31  ;;  %v10385_v28 = vld [vmem:[#allocation68_spill] sm:$0xff]  ;;  %v10386_v31 = vld [vmem:[#allocation69_spill] sm:$0xff] }
 0x5c4   :  { %5455 = vmatpush1.bf16.msra.mxu0 %v10376_v33  ;;  %5519 = vmatpush1.bf16.msra.mxu1 %v10377_v37  ;;  %v10387_v33 = vld [vmem:[#allocation70_spill] sm:$0xff] }
 0x5c5   :  { %5457 = vmatprep.subr.bf16.mxu0 %v10378_v60  ;;  %5521 = vmatprep.subr.bf16.mxu1 %v10379_v54 }
 0x5c8   :  { %5459 = vmatpush1.bf16.msra.mxu0 %v10380_v22  ;;  %5523 = vmatpush1.bf16.msra.mxu1 %v10381_v15 }
 0x5c9   :  { %5461 = vmatprep.subr.bf16.mxu0 %v10382_v62  ;;  %5525 = vmatprep.subr.bf16.mxu1 %v10383_v29 }
 0x5cc   :  { %5463 = vmatpush1.bf16.msra.mxu0 %v10384_v39  ;;  %5527 = vmatpush1.bf16.msra.mxu1 %v10385_v28 }
 0x5cd   :  { %5529 = vmatprep.subr.bf16.mxu0 %v10386_v31  ;;  %5593 = vmatprep.subr.bf16.mxu1 %v10387_v33 }
 0x622   :  { %v2509_v37 = vpop.f32.mrb[8].mxu0  ;;  %v2580_v60 = vpop.f32.mrb[8].mxu1 }
 0x623   :  { %v6192_v54 = vadd.f32 %v2580_v60, %v10388_v13  ;;  %v2511_v30 = vpop.f32.mrb[9].mxu0  ;;  %v2582_v22 = vpop.f32.mrb[9].mxu1  ;;  %v6176_v13 = vadd.f32 %v2509_v37, %v10084_v9 }
 0x624   :  { %v6193_v15 = vadd.f32 %v2582_v22, %v10389_v17  ;;  %v6177_v22 = vadd.f32 %v2511_v30, %v10085_v16 }
 0x625   :  { %v4018_v51 = vmul.f32 -1.442695, %v6192_v54  ;;  %v4016_v54 = vmul.f32 -1.442695, %v6176_v13 }
 0x626   :  { %v4019_v62 = vmul.f32 -1.442695, %v6193_v15  ;;  %v4017_v15 = vmul.f32 -1.442695, %v6177_v22 }
 0x627   :  { %6425 = vpow2.f32 %v4018_v51 }
 0x628   :  { %6427 = vpow2.f32 %v4019_v62 }
 0x631   :  { %v6426_v29 = vpop.eup %6425 }
 0x632   :  { %v2764_v39 = vadd.f32 1.0, %v6426_v29  ;;  %v6428_v50 = vpop.eup %6427 }
 0x633   :  { %v2765_v28 = vadd.f32 1.0, %v6428_v50 }
 0x634   :  { %6429 = vrcp.f32 %v2764_v39 }
 0x635   :  { %6431 = vrcp.f32 %v2765_v28 }
 0x636   :  { %6433 = vpow2.f32 %v4016_v54 }
 0x637   :  { %6435 = vpow2.f32 %v4017_v15 }
 0x63e   :  { %v6430_v31 = vpop.eup %6429 }
 0x63f   :  { %v2784_v33 = vmul.f32 %v6430_v31, %v8811_v26  ;;  %v6432_v45 = vpop.eup %6431 }
 0x640   :  { %v2785_v60 = vmul.f32 %v6432_v45, %v8816_v14  ;;  %v6434_v51 = vpop.eup %6433 }
 0x641   :  { %v6436_v62 = vpop.eup %6435  ;;  %v2752_v29 = vadd.f32 1.0, %v6434_v51  ;;  %v10390_v51 = vld [vmem:[#allocation133_spill] sm:$0xff] }
 0x642   :  { %v2753_v39 = vadd.f32 1.0, %v6436_v62  ;;  %vm2796_vm10 = vcmp.gt.s32.totalorder %v10390_v51, 4  ;;  %vm3170_vm0 = vcmp.gt.s32.totalorder %v10390_v51, 5 }
 0x643   :  { %6437 = vrcp.f32 %v2752_v29  ;;  %v10391_v29 = vld [vmem:[#allocation135_spill] sm:$0xff]  ;;  %vm8988_vm13 = vmand %vm2794_vm9, %vm2796_vm10 }
 0x644   :  { %6439 = vrcp.f32 %v2753_v39  ;;  %vm2795_vm11 = vcmp.le.s32.totalorder %v10391_v29, 4  ;;  %vm3169_vm1 = vcmp.le.s32.totalorder %v10391_v29, 5  ;;  %vm9176_vm3 = vmand %vm3168_vm15, %vm3170_vm0 }
 0x645   :  { %vm8992_vm14 = vmand %vm2795_vm11, %vm2797_vm12 }
 0x646   :  { %vm9180_vm4 = vmand %vm3169_vm1, %vm3171_vm2 }
 0x64d   :  { %v6438_v54 = vpop.eup %6437 }
 0x64e   :  { %v6440_v15 = vpop.eup %6439 }
 0x662   :  { %v2651_v50 = vpop.f32.mrb[24].mxu0  ;;  %v2722_v28 = vpop.f32.mrb[24].mxu1 }
 0x663   :  { %v6208_v31 = vadd.f32 %v2651_v50, %v8171_v27  ;;  %v6224_v17 = vadd.f32 %v2722_v28, %v8173_v5  ;;  %v2653_v45 = vpop.f32.mrb[25].mxu0  ;;  %v2724_v53 = vpop.f32.mrb[25].mxu1 }
 0x664   :  { %v6209_v30 = vadd.f32 %v2653_v45, %v8175_v59  ;;  %v6225_v13 = vadd.f32 %v2724_v53, %v8177_v36 }
 0x665   :  { %6441 = vtanh.f32 %v6208_v31  ;;  %v4020_v37 = vmul.f32 -1.442695, %v6224_v17  ;;  %v10398_v17 = vld [vmem:[#allocation107_spill] sm:$0xff] }
 0x666   :  { %6443 = vtanh.f32 %v6209_v30  ;;  %v4021_v22 = vmul.f32 -1.442695, %v6225_v13  ;;  %v10401_v13 = vld [vmem:[#allocation110_spill] sm:$0xff] }
 0x667   :  { %6445 = vpow2.f32 %v4020_v37 }
 0x668   :  { %6447 = vpow2.f32 %v4021_v22 }
 0x66f   :  { %v6442_v62 = vpop.eup %6441 }
 0x670   :  { %v6444_v39 = vpop.eup %6443  ;;  %v2786_v50 = vmul.f32 %v6442_v62, %v6438_v54 }
 0x671   :  { %v6446_v53 = vpop.eup %6445  ;;  %v2787_v28 = vmul.f32 %v6444_v39, %v6440_v15 }
 0x672   :  { %v6448_v31 = vpop.eup %6447  ;;  %v2788_v45 = vadd.f32 %v2786_v50, %v2784_v33  ;;  %v2778_v30 = vadd.f32 1.0, %v6446_v53 }
 0x673   :  { %v2789_v37 = vadd.f32 %v2787_v28, %v2785_v60  ;;  %v2779_v22 = vadd.f32 1.0, %v6448_v31 }
 0x674   :  { %6449 = vtanh.f32 %v2788_v45  ;;  %v8999_v54 = vsel %vm8988_vm13, %v2788_v45, %v8811_v26  ;;  %v10399_v45 = vld [vmem:[#allocation108_spill] sm:$0xff] }
 0x675   :  { %6451 = vrcp.f32 %v2778_v30  ;;  %v9004_v15 = vsel %vm8992_vm14, %v2789_v37, %v8816_v14  ;;  %v10400_v30 = vld [vmem:[#allocation109_spill] sm:$0xff] }
 0x676   :  { %6453 = vtanh.f32 %v2789_v37  ;;  %v10402_v37 = vld [vmem:[#allocation111_spill] sm:$0xff] }
 0x677   :  { %6455 = vrcp.f32 %v2779_v22  ;;  %v10403_v22 = vld [vmem:[#allocation112_spill] sm:$0xff] }
 0x67e   :  { %v6450_v33 = vpop.eup %6449 }
 0x67f   :  { %v6452_v62 = vpop.eup %6451 }
 0x680   :  { %v6454_v39 = vpop.eup %6453  ;;  %v2792_v50 = vmul.f32 %v6452_v62, %v6450_v33  ;;  %v10404_v33 = vld [vmem:[#allocation113_spill] sm:$0xff]  ;;  %v10405_v62 = vld [vmem:[#allocation114_spill] sm:$0xff] }
 0x681   :  { %v6456_v60 = vpop.eup %6455 }
 0x682   :  { %v2793_v53 = vmul.f32 %v6456_v60, %v6454_v39  ;;  %v2808_v28 = vsel %vm8988_vm13, %v2792_v50, 0.0  ;;  %v9026_v31 = vsel %vm8988_vm13, %v2792_v50, %v8838_v4  ;;  %v10397_v4 = vld [vmem:[#allocation106_spill] sm:$0xff]  ;;  %v10406_v39 = vld [vmem:[#allocation115_spill] sm:$0xff]  ;;  %v10407_v50 = vld [vmem:[#allocation116_spill] sm:$0xff] }
 0x683   :  { %4022 = vst [vmem:[%s9538_s6 + $0x40] sm:$0xff] %v2808_v28  ;;  %v10408_v60 = vld [vmem:[#allocation117_spill] sm:$0xff]  ;;  %v10410_v28 = vld [vmem:[#allocation119_spill] sm:$0xff] }
 0x684   :  { %v9014_v26 = vsel %vm8992_vm14, %v2793_v53, %v8826_v46  ;;  %v2809_v14 = vsel %vm8992_vm14, %v2793_v53, 0.0  ;;  %v10396_v46 = vld [vmem:[#allocation105_spill] sm:$0xff]  ;;  %v10409_v53 = vld [vmem:[#allocation118_spill] sm:$0xff] }
 0x685   :  { %4023 = vst [vmem:[%s9538_s6 + $0x48] sm:$0xff] %v2809_v14  ;;  %2881 = vmatprep.mubr.f32.mxu0 %v9014_v26  ;;  %2952 = vmatprep.mubr.f32.mxu1 %v9014_v26  ;;  %v10411_v14 = vld [vmem:[#allocation120_spill] sm:$0xff] }
 0x686   :  { %2882 = vmatmul.mubr.f32.vlgmr.msra.gmra.mrb[10].mxu0 %v9026_v31  ;;  %2953 = vmatmul.mubr.f32.vlgmr.msra.gmra.mrb[10].mxu1 %v9026_v31 }
 0x687   :  { %5531 = vmatpush1.bf16.msra.mxu0 %v10093_v40  ;;  %5595 = vmatpush1.bf16.msra.mxu1 %v10094_v49 }
 0x688   :  { %3023 = vmatprep.mubr.f32.mxu0 %v9014_v26  ;;  %3094 = vmatprep.mubr.f32.mxu1 %v9014_v26 }
 0x689   :  { %5533 = vmatprep.subr.bf16.mxu0 %v10095_v0  ;;  %5597 = vmatprep.subr.bf16.mxu1 %v10096_v11 }
 0x68b   :  { %5535 = vmatpush1.bf16.msra.mxu0 %v10192_v34  ;;  %5599 = vmatpush1.bf16.msra.mxu1 %v10193_v55 }
 0x68c   :  { %5537 = vmatprep.subr.bf16.mxu0 %v10194_v63  ;;  %5601 = vmatprep.subr.bf16.mxu1 %v10195_v6 }
 0x68f   :  { %5539 = vmatpush1.bf16.msra.mxu0 %v10196_v44  ;;  %5603 = vmatpush1.bf16.msra.mxu1 %v10197_v61 }
 0x690   :  { %5541 = vmatprep.subr.bf16.mxu0 %v10198_v7  ;;  %5605 = vmatprep.subr.bf16.mxu1 %v10199_v42 }
 0x693   :  { %5543 = vmatpush1.bf16.msra.mxu0 %v10200_v10  ;;  %5607 = vmatpush1.bf16.msra.mxu1 %v10201_v8 }
 0x694   :  { %5545 = vmatprep.subr.bf16.mxu0 %v10202_v12  ;;  %5609 = vmatprep.subr.bf16.mxu1 %v10296_v2 }
 0x697   :  { %5547 = vmatpush1.bf16.msra.mxu0 %v10297_v58  ;;  %5611 = vmatpush1.bf16.msra.mxu1 %v10298_v21 }
 0x698   :  { %5549 = vmatprep.subr.bf16.mxu0 %v10299_v24  ;;  %5613 = vmatprep.subr.bf16.mxu1 %v10207_v43 }
 0x69b   :  { %5551 = vmatpush1.bf16.msra.mxu0 %v10208_v56  ;;  %5615 = vmatpush1.bf16.msra.mxu1 %v10209_v19 }
 0x69c   :  { %5553 = vmatprep.subr.bf16.mxu0 %v10210_v20  ;;  %5617 = vmatprep.subr.bf16.mxu1 %v10211_v57 }
 0x69f   :  { %5555 = vmatpush1.bf16.msra.mxu0 %v10212_v23  ;;  %5619 = vmatpush1.bf16.msra.mxu1 %v10213_v48 }
 0x6a0   :  { %5557 = vmatprep.subr.bf16.mxu0 %v10214_v38  ;;  %5621 = vmatprep.subr.bf16.mxu1 %v10215_v52 }
 0x6a3   :  { %5559 = vmatpush1.bf16.msra.mxu0 %v10216_v47  ;;  %5623 = vmatpush1.bf16.msra.mxu1 %v10217_v18 }
 0x6a4   :  { %5561 = vmatprep.subr.bf16.mxu0 %v10123_v25  ;;  %5625 = vmatprep.subr.bf16.mxu1 %v10124_v1 }
 0x6a7   :  { %5563 = vmatpush1.bf16.msra.mxu0 %v10125_v35  ;;  %5627 = vmatpush1.bf16.msra.mxu1 %v10126_v32 }
 0x6a8   :  { %5565 = vmatprep.subr.bf16.mxu0 %v10396_v46  ;;  %5629 = vmatprep.subr.bf16.mxu1 %v10397_v4 }
 0x6ab   :  { %5567 = vmatpush1.bf16.msra.mxu0 %v10398_v17  ;;  %5631 = vmatpush1.bf16.msra.mxu1 %v10399_v45  ;;  %v10491_v17 = vld [vmem:[#allocation136_spill] sm:$0xff] }
 0x6ac   :  { %5569 = vmatprep.subr.bf16.mxu0 %v10400_v30  ;;  %5633 = vmatprep.subr.bf16.mxu1 %v10401_v13  ;;  %v10412_v13 = vld [vmem:[#allocation121_spill] sm:$0xff]  ;;  %v10490_v30 = vld [vmem:[#allocation134_spill] sm:$0xff] }
 0x6af   :  { %5571 = vmatpush1.bf16.msra.mxu0 %v10402_v37  ;;  %5635 = vmatpush1.bf16.msra.mxu1 %v10403_v22  ;;  %v10413_v37 = vld [vmem:[#allocation122_spill] sm:$0xff]  ;;  %v10414_v22 = vld [vmem:[#allocation123_spill] sm:$0xff] }
 0x6b0   :  { %5573 = vmatprep.subr.bf16.mxu0 %v10404_v33  ;;  %5637 = vmatprep.subr.bf16.mxu1 %v10405_v62  ;;  %v10415_v33 = vld [vmem:[#allocation124_spill] sm:$0xff]  ;;  %v10416_v62 = vld [vmem:[#allocation125_spill] sm:$0xff] }
 0x6b3   :  { %5575 = vmatpush1.bf16.msra.mxu0 %v10406_v39  ;;  %5639 = vmatpush1.bf16.msra.mxu1 %v10407_v50  ;;  %v10417_v39 = vld [vmem:[#allocation126_spill] sm:$0xff]  ;;  %v10418_v50 = vld [vmem:[#allocation127_spill] sm:$0xff] }
 0x6b4   :  { %5577 = vmatprep.subr.bf16.mxu0 %v10408_v60  ;;  %5641 = vmatprep.subr.bf16.mxu1 %v10409_v53  ;;  %v10419_v60 = vld [vmem:[#allocation128_spill] sm:$0xff]  ;;  %v10420_v53 = vld [vmem:[#allocation129_spill] sm:$0xff] }
 0x6b7   :  { %5579 = vmatpush1.bf16.msra.mxu0 %v10410_v28  ;;  %5643 = vmatpush1.bf16.msra.mxu1 %v10411_v14  ;;  %v10421_v28 = vld [vmem:[#allocation130_spill] sm:$0xff]  ;;  %v10422_v14 = vld [vmem:[#allocation131_spill] sm:$0xff] }
 0x6b8   :  { %5581 = vmatprep.subr.bf16.mxu0 %v10412_v13  ;;  %5645 = vmatprep.subr.bf16.mxu1 %v10413_v37  ;;  %v10423_v13 = vld [vmem:[#allocation132_spill] sm:$0xff]  ;;  %v10424_v37 = vld [vmem:[#allocation5_spill] sm:$0xff] }
 0x6bb   :  { %5583 = vmatpush1.bf16.msra.mxu0 %v10414_v22  ;;  %5647 = vmatpush1.bf16.msra.mxu1 %v10415_v33  ;;  %v10425_v22 = vld [vmem:[#allocation6_spill] sm:$0xff]  ;;  %v10436_v33 = vld [vmem:[#allocation17_spill] sm:$0xff] }
 0x6bc   :  { %5585 = vmatprep.subr.bf16.mxu0 %v10416_v62  ;;  %5649 = vmatprep.subr.bf16.mxu1 %v10417_v39  ;;  %v10426_v39 = vld [vmem:[#allocation7_spill] sm:$0xff]  ;;  %v10435_v62 = vld [vmem:[#allocation16_spill] sm:$0xff] }
 0x6bf   :  { %5587 = vmatpush1.bf16.msra.mxu0 %v10418_v50  ;;  %5651 = vmatpush1.bf16.msra.mxu1 %v10419_v60  ;;  %v10427_v50 = vld [vmem:[#allocation8_spill] sm:$0xff]  ;;  %v10428_v60 = vld [vmem:[#allocation9_spill] sm:$0xff] }
 0x6c0   :  { %5589 = vmatprep.subr.bf16.mxu0 %v10420_v53  ;;  %5653 = vmatprep.subr.bf16.mxu1 %v10421_v28  ;;  %v10429_v53 = vld [vmem:[#allocation10_spill] sm:$0xff]  ;;  %v10430_v28 = vld [vmem:[#allocation11_spill] sm:$0xff] }
 0x6c3   :  { %5591 = vmatpush1.bf16.msra.mxu0 %v10422_v14  ;;  %5655 = vmatpush1.bf16.msra.mxu1 %v10423_v13  ;;  %v10431_v14 = vld [vmem:[#allocation12_spill] sm:$0xff]  ;;  %v10432_v13 = vld [vmem:[#allocation13_spill] sm:$0xff] }
 0x6c4   :  { %5657 = vmatprep.subr.bf16.mxu0 %v10424_v37  ;;  %5721 = vmatprep.subr.bf16.mxu1 %v10425_v22  ;;  %v10433_v37 = vld [vmem:[#allocation14_spill] sm:$0xff]  ;;  %v10434_v22 = vld [vmem:[#allocation15_spill] sm:$0xff] }
 0x6c6   :  { %3024 = vmatmul.mubr.f32.vlgmr.msra.gmra.mrb[26].mxu0 %v9026_v31  ;;  %3095 = vmatmul.mubr.f32.vlgmr.msra.gmra.mrb[26].mxu1 %v9026_v31 }
 0x6c7   :  { %5659 = vmatpush1.bf16.msra.mxu0 %v10426_v39  ;;  %5723 = vmatpush1.bf16.msra.mxu1 %v10427_v50  ;;  %v10437_v39 = vld [vmem:[#allocation18_spill] sm:$0xff]  ;;  %v10438_v50 = vld [vmem:[#allocation19_spill] sm:$0xff] }
 0x6c8   :  { %5661 = vmatprep.subr.bf16.mxu0 %v10428_v60  ;;  %5725 = vmatprep.subr.bf16.mxu1 %v10429_v53  ;;  %v10439_v60 = vld [vmem:[#allocation20_spill] sm:$0xff]  ;;  %v10440_v53 = vld [vmem:[#allocation21_spill] sm:$0xff] }
 0x6cb   :  { %5663 = vmatpush1.bf16.msra.mxu0 %v10430_v28  ;;  %5727 = vmatpush1.bf16.msra.mxu1 %v10431_v14  ;;  %v10441_v28 = vld [vmem:[#allocation22_spill] sm:$0xff]  ;;  %v10442_v14 = vld [vmem:[#allocation23_spill] sm:$0xff] }
 0x6cc   :  { %5665 = vmatprep.subr.bf16.mxu0 %v10432_v13  ;;  %5729 = vmatprep.subr.bf16.mxu1 %v10433_v37  ;;  %v10443_v13 = vld [vmem:[#allocation24_spill] sm:$0xff]  ;;  %v10444_v37 = vld [vmem:[#allocation25_spill] sm:$0xff] }
 0x6cf   :  { %5667 = vmatpush1.bf16.msra.mxu0 %v10434_v22  ;;  %5731 = vmatpush1.bf16.msra.mxu1 %v10435_v62  ;;  %v10445_v22 = vld [vmem:[#allocation26_spill] sm:$0xff]  ;;  %v10446_v62 = vld [vmem:[#allocation27_spill] sm:$0xff] }
 0x6d0   :  { %5669 = vmatprep.subr.bf16.mxu0 %v10436_v33  ;;  %5733 = vmatprep.subr.bf16.mxu1 %v10437_v39  ;;  %v10447_v33 = vld [vmem:[#allocation28_spill] sm:$0xff]  ;;  %v10448_v39 = vld [vmem:[#allocation29_spill] sm:$0xff] }
 0x6d3   :  { %5671 = vmatpush1.bf16.msra.mxu0 %v10438_v50  ;;  %5735 = vmatpush1.bf16.msra.mxu1 %v10439_v60  ;;  %v10449_v50 = vld [vmem:[#allocation30_spill] sm:$0xff]  ;;  %v10450_v60 = vld [vmem:[#allocation31_spill] sm:$0xff] }
 0x6d4   :  { %5673 = vmatprep.subr.bf16.mxu0 %v10440_v53  ;;  %5737 = vmatprep.subr.bf16.mxu1 %v10441_v28  ;;  %v10451_v53 = vld [vmem:[#allocation32_spill] sm:$0xff]  ;;  %v10452_v28 = vld [vmem:[#allocation33_spill] sm:$0xff] }
 0x6d7   :  { %5675 = vmatpush1.bf16.msra.mxu0 %v10442_v14  ;;  %5739 = vmatpush1.bf16.msra.mxu1 %v10443_v13  ;;  %v10453_v14 = vld [vmem:[#allocation34_spill] sm:$0xff]  ;;  %v10454_v13 = vld [vmem:[#allocation35_spill] sm:$0xff] }
 0x6d8   :  { %5677 = vmatprep.subr.bf16.mxu0 %v10444_v37  ;;  %5741 = vmatprep.subr.bf16.mxu1 %v10445_v22  ;;  %v10455_v37 = vld [vmem:[#allocation36_spill] sm:$0xff]  ;;  %v10456_v22 = vld [vmem:[#allocation37_spill] sm:$0xff] }
 0x6db   :  { %5679 = vmatpush1.bf16.msra.mxu0 %v10446_v62  ;;  %5743 = vmatpush1.bf16.msra.mxu1 %v10447_v33  ;;  %v10457_v62 = vld [vmem:[#allocation38_spill] sm:$0xff]  ;;  %v10458_v33 = vld [vmem:[#allocation39_spill] sm:$0xff] }
 0x6dc   :  { %5681 = vmatprep.subr.bf16.mxu0 %v10448_v39  ;;  %5745 = vmatprep.subr.bf16.mxu1 %v10449_v50  ;;  %v10459_v39 = vld [vmem:[#allocation40_spill] sm:$0xff]  ;;  %v10460_v50 = vld [vmem:[#allocation41_spill] sm:$0xff] }
 0x6df   :  { %5683 = vmatpush1.bf16.msra.mxu0 %v10450_v60  ;;  %5747 = vmatpush1.bf16.msra.mxu1 %v10451_v53  ;;  %v10461_v60 = vld [vmem:[#allocation42_spill] sm:$0xff]  ;;  %v10462_v53 = vld [vmem:[#allocation43_spill] sm:$0xff] }
 0x6e0   :  { %5685 = vmatprep.subr.bf16.mxu0 %v10452_v28  ;;  %5749 = vmatprep.subr.bf16.mxu1 %v10453_v14  ;;  %v10463_v28 = vld [vmem:[#allocation44_spill] sm:$0xff]  ;;  %v10464_v14 = vld [vmem:[#allocation45_spill] sm:$0xff] }
 0x6e3   :  { %5687 = vmatpush1.bf16.msra.mxu0 %v10454_v13  ;;  %5751 = vmatpush1.bf16.msra.mxu1 %v10455_v37  ;;  %v10465_v13 = vld [vmem:[#allocation46_spill] sm:$0xff]  ;;  %v10466_v37 = vld [vmem:[#allocation47_spill] sm:$0xff] }
 0x6e4   :  { %5689 = vmatprep.subr.bf16.mxu0 %v10456_v22  ;;  %5753 = vmatprep.subr.bf16.mxu1 %v10457_v62  ;;  %v10467_v22 = vld [vmem:[#allocation48_spill] sm:$0xff]  ;;  %v10468_v62 = vld [vmem:[#allocation49_spill] sm:$0xff] }
 0x6e7   :  { %5691 = vmatpush1.bf16.msra.mxu0 %v10458_v33  ;;  %5755 = vmatpush1.bf16.msra.mxu1 %v10459_v39  ;;  %v10469_v33 = vld [vmem:[#allocation50_spill] sm:$0xff]  ;;  %v10470_v39 = vld [vmem:[#allocation51_spill] sm:$0xff] }
 0x6e8   :  { %5693 = vmatprep.subr.bf16.mxu0 %v10460_v50  ;;  %5757 = vmatprep.subr.bf16.mxu1 %v10461_v60  ;;  %v10471_v50 = vld [vmem:[#allocation52_spill] sm:$0xff]  ;;  %v10472_v60 = vld [vmem:[#allocation53_spill] sm:$0xff] }
 0x6eb   :  { %5695 = vmatpush1.bf16.msra.mxu0 %v10462_v53  ;;  %5759 = vmatpush1.bf16.msra.mxu1 %v10463_v28  ;;  %v10473_v53 = vld [vmem:[#allocation54_spill] sm:$0xff]  ;;  %v10474_v28 = vld [vmem:[#allocation55_spill] sm:$0xff] }
 0x6ec   :  { %5697 = vmatprep.subr.bf16.mxu0 %v10464_v14  ;;  %5761 = vmatprep.subr.bf16.mxu1 %v10465_v13  ;;  %v10475_v14 = vld [vmem:[#allocation56_spill] sm:$0xff]  ;;  %v10476_v13 = vld [vmem:[#allocation57_spill] sm:$0xff] }
 0x6ef   :  { %5699 = vmatpush1.bf16.msra.mxu0 %v10466_v37  ;;  %5763 = vmatpush1.bf16.msra.mxu1 %v10467_v22  ;;  %v10477_v37 = vld [vmem:[#allocation58_spill] sm:$0xff]  ;;  %v10478_v22 = vld [vmem:[#allocation59_spill] sm:$0xff] }
 0x6f0   :  { %5701 = vmatprep.subr.bf16.mxu0 %v10468_v62  ;;  %5765 = vmatprep.subr.bf16.mxu1 %v10469_v33  ;;  %v10479_v62 = vld [vmem:[#allocation60_spill] sm:$0xff]  ;;  %v10480_v33 = vld [vmem:[#allocation61_spill] sm:$0xff] }
 0x6f3   :  { %5703 = vmatpush1.bf16.msra.mxu0 %v10470_v39  ;;  %5767 = vmatpush1.bf16.msra.mxu1 %v10471_v50  ;;  %v10481_v39 = vld [vmem:[#allocation62_spill] sm:$0xff]  ;;  %v10482_v50 = vld [vmem:[#allocation63_spill] sm:$0xff] }
 0x6f4   :  { %5705 = vmatprep.subr.bf16.mxu0 %v10472_v60  ;;  %5769 = vmatprep.subr.bf16.mxu1 %v10473_v53  ;;  %v10483_v60 = vld [vmem:[#allocation64_spill] sm:$0xff]  ;;  %v10484_v53 = vld [vmem:[#allocation65_spill] sm:$0xff] }
 0x6f7   :  { %5707 = vmatpush1.bf16.msra.mxu0 %v10474_v28  ;;  %5771 = vmatpush1.bf16.msra.mxu1 %v10475_v14  ;;  %v10485_v28 = vld [vmem:[#allocation66_spill] sm:$0xff]  ;;  %v10486_v14 = vld [vmem:[#allocation67_spill] sm:$0xff] }
 0x6f8   :  { %5709 = vmatprep.subr.bf16.mxu0 %v10476_v13  ;;  %5773 = vmatprep.subr.bf16.mxu1 %v10477_v37  ;;  %v10487_v13 = vld [vmem:[#allocation68_spill] sm:$0xff]  ;;  %v10488_v37 = vld [vmem:[#allocation69_spill] sm:$0xff] }
 0x6fb   :  { %5711 = vmatpush1.bf16.msra.mxu0 %v10478_v22  ;;  %5775 = vmatpush1.bf16.msra.mxu1 %v10479_v62  ;;  %v10489_v22 = vld [vmem:[#allocation70_spill] sm:$0xff] }
 0x6fc   :  { %5713 = vmatprep.subr.bf16.mxu0 %v10480_v33  ;;  %5777 = vmatprep.subr.bf16.mxu1 %v10481_v39 }
 0x6ff   :  { %5715 = vmatpush1.bf16.msra.mxu0 %v10482_v50  ;;  %5779 = vmatpush1.bf16.msra.mxu1 %v10483_v60 }
 0x700   :  { %5717 = vmatprep.subr.bf16.mxu0 %v10484_v53  ;;  %5781 = vmatprep.subr.bf16.mxu1 %v10485_v28 }
 0x703   :  { %5719 = vmatpush1.bf16.msra.mxu0 %v10486_v14  ;;  %5783 = vmatpush1.bf16.msra.mxu1 %v10487_v13 }
 0x704   :  { %5785 = vmatprep.subr.bf16.mxu0 %v10488_v37  ;;  %5849 = vmatprep.subr.bf16.mxu1 %v10489_v22 }
 0x759   :  { %v2883_v62 = vpop.f32.mrb[10].mxu0  ;;  %v2954_v33 = vpop.f32.mrb[10].mxu1 }
 0x75a   :  { %v6194_v39 = vadd.f32 %v2954_v33, %v10490_v30  ;;  %v2885_v45 = vpop.f32.mrb[11].mxu0  ;;  %v2956_v50 = vpop.f32.mrb[11].mxu1  ;;  %v6178_v30 = vadd.f32 %v2883_v62, %v10084_v9 }
 0x75b   :  { %v6195_v60 = vadd.f32 %v2956_v50, %v10491_v17  ;;  %v6179_v50 = vadd.f32 %v2885_v45, %v10085_v16 }
 0x75c   :  { %v4026_v4 = vmul.f32 -1.442695, %v6194_v39  ;;  %v4024_v39 = vmul.f32 -1.442695, %v6178_v30 }
 0x75d   :  { %v4027_v53 = vmul.f32 -1.442695, %v6195_v60  ;;  %v4025_v60 = vmul.f32 -1.442695, %v6179_v50 }
 0x75e   :  { %6457 = vpow2.f32 %v4026_v4 }
 0x75f   :  { %6459 = vpow2.f32 %v4027_v53 }
 0x768   :  { %v6458_v28 = vpop.eup %6457 }
 0x769   :  { %v3138_v14 = vadd.f32 1.0, %v6458_v28  ;;  %v6460_v46 = vpop.eup %6459 }
 0x76a   :  { %v3139_v13 = vadd.f32 1.0, %v6460_v46 }
 0x76b   :  { %6461 = vrcp.f32 %v3138_v14 }
 0x76c   :  { %6463 = vrcp.f32 %v3139_v13 }
 0x76d   :  { %6465 = vpow2.f32 %v4024_v39 }
 0x76e   :  { %6467 = vpow2.f32 %v4025_v60 }
 0x775   :  { %v6462_v37 = vpop.eup %6461 }
 0x776   :  { %v3158_v22 = vmul.f32 %v6462_v37, %v8999_v54  ;;  %v6464_v32 = vpop.eup %6463 }
 0x777   :  { %v3159_v33 = vmul.f32 %v6464_v32, %v9004_v15  ;;  %v6466_v4 = vpop.eup %6465 }
 0x778   :  { %v6468_v53 = vpop.eup %6467  ;;  %v3126_v28 = vadd.f32 1.0, %v6466_v4 }
 0x779   :  { %v3127_v14 = vadd.f32 1.0, %v6468_v53 }
 0x77a   :  { %6469 = vrcp.f32 %v3126_v28 }
 0x77b   :  { %6471 = vrcp.f32 %v3127_v14 }
 0x784   :  { %v6470_v39 = vpop.eup %6469 }
 0x785   :  { %v6472_v60 = vpop.eup %6471 }
 0x799   :  { %v3025_v46 = vpop.f32.mrb[26].mxu0  ;;  %v3096_v13 = vpop.f32.mrb[26].mxu1 }
 0x79a   :  { %v6210_v37 = vadd.f32 %v3025_v46, %v8171_v27  ;;  %v6226_v17 = vadd.f32 %v3096_v13, %v8173_v5  ;;  %v3027_v32 = vpop.f32.mrb[27].mxu0  ;;  %v3098_v35 = vpop.f32.mrb[27].mxu1 }
 0x79b   :  { %v6211_v45 = vadd.f32 %v3027_v32, %v8175_v59  ;;  %v6227_v30 = vadd.f32 %v3098_v35, %v8177_v36 }
 0x79c   :  { %6473 = vtanh.f32 %v6210_v37  ;;  %v4028_v62 = vmul.f32 -1.442695, %v6226_v17  ;;  %v10503_v17 = vld [vmem:[#allocation110_spill] sm:$0xff] }
 0x79d   :  { %6475 = vtanh.f32 %v6211_v45  ;;  %v4029_v50 = vmul.f32 -1.442695, %v6227_v30 }
 0x79e   :  { %6477 = vpow2.f32 %v4028_v62 }
 0x79f   :  { %6479 = vpow2.f32 %v4029_v50 }
 0x7a6   :  { %v6474_v4 = vpop.eup %6473 }
 0x7a7   :  { %v6476_v53 = vpop.eup %6475  ;;  %v3160_v28 = vmul.f32 %v6474_v4, %v6470_v39  ;;  %v10498_v4 = vld [vmem:[#allocation105_spill] sm:$0xff] }
 0x7a8   :  { %v6478_v35 = vpop.eup %6477  ;;  %v3161_v14 = vmul.f32 %v6476_v53, %v6472_v60  ;;  %v10499_v53 = vld [vmem:[#allocation106_spill] sm:$0xff] }
 0x7a9   :  { %v6480_v46 = vpop.eup %6479  ;;  %v3162_v13 = vadd.f32 %v3160_v28, %v3158_v22  ;;  %v3152_v37 = vadd.f32 1.0, %v6478_v35  ;;  %v10500_v28 = vld [vmem:[#allocation107_spill] sm:$0xff]  ;;  %v10501_v35 = vld [vmem:[#allocation108_spill] sm:$0xff] }
 0x7aa   :  { %v3163_v51 = vadd.f32 %v3161_v14, %v3159_v33  ;;  %v3153_v32 = vadd.f32 1.0, %v6480_v46  ;;  %v10502_v14 = vld [vmem:[#allocation109_spill] sm:$0xff]  ;;  %v10504_v46 = vld [vmem:[#allocation111_spill] sm:$0xff] }
 0x7ab   :  { %6481 = vtanh.f32 %v3162_v13  ;;  %v9187_v41 = vsel %vm9176_vm3, %v3162_v13, %v8999_v54  ;;  %v10505_v13 = vld [vmem:[#allocation112_spill] sm:$0xff] }
 0x7ac   :  { %6483 = vrcp.f32 %v3152_v37  ;;  %v9192_v29 = vsel %vm9180_vm4, %v3163_v51, %v9004_v15  ;;  %v10506_v37 = vld [vmem:[#allocation113_spill] sm:$0xff] }
 0x7ad   :  { %6485 = vtanh.f32 %v3163_v51  ;;  %v10508_v51 = vld [vmem:[#allocation115_spill] sm:$0xff] }
 0x7ae   :  { %6487 = vrcp.f32 %v3153_v32  ;;  %v10509_v32 = vld [vmem:[#allocation116_spill] sm:$0xff] }
 0x7b5   :  { %v6482_v22 = vpop.eup %6481 }
 0x7b6   :  { %v6484_v45 = vpop.eup %6483 }
 0x7b7   :  { %v6486_v30 = vpop.eup %6485  ;;  %v3166_v62 = vmul.f32 %v6484_v45, %v6482_v22  ;;  %v10510_v22 = vld [vmem:[#allocation117_spill] sm:$0xff]  ;;  %v10511_v45 = vld [vmem:[#allocation118_spill] sm:$0xff] }
 0x7b8   :  { %v6488_v33 = vpop.eup %6487 }
 0x7b9   :  { %v3167_v50 = vmul.f32 %v6488_v33, %v6486_v30  ;;  %v3182_v39 = vsel %vm9176_vm3, %v3166_v62, 0.0  ;;  %v9214_v60 = vsel %vm9176_vm3, %v3166_v62, %v9026_v31  ;;  %v10497_v31 = vld [vmem:[#allocation104_spill] sm:$0xff]  ;;  %v10512_v30 = vld [vmem:[#allocation119_spill] sm:$0xff]  ;;  %v10514_v33 = vld [vmem:[#allocation121_spill] sm:$0xff] }
 0x7ba   :  { %4030 = vst [vmem:[%s9538_s6 + $0x50] sm:$0xff] %v3182_v39  ;;  %v10513_v62 = vld [vmem:[#allocation120_spill] sm:$0xff]  ;;  %v10516_v39 = vld [vmem:[#allocation123_spill] sm:$0xff] }
 0x7bb   :  { %v9202_v54 = vsel %vm9180_vm4, %v3167_v50, %v9014_v26  ;;  %v3183_v15 = vsel %vm9180_vm4, %v3167_v50, 0.0  ;;  %v10496_v26 = vld [vmem:[#allocation103_spill] sm:$0xff]  ;;  %v10515_v50 = vld [vmem:[#allocation122_spill] sm:$0xff] }
 0x7bc   :  { %4031 = vst [vmem:[%s9538_s6 + $0x58] sm:$0xff] %v3183_v15  ;;  %3255 = vmatprep.mubr.f32.mxu0 %v9202_v54  ;;  %3326 = vmatprep.mubr.f32.mxu1 %v9202_v54  ;;  %v10517_v15 = vld [vmem:[#allocation124_spill] sm:$0xff] }
 0x7bd   :  { %3256 = vmatmul.mubr.f32.vlgmr.msra.gmra.mrb[12].mxu0 %v9214_v60  ;;  %3327 = vmatmul.mubr.f32.vlgmr.msra.gmra.mrb[12].mxu1 %v9214_v60 }
 0x7be   :  { %5787 = vmatpush1.bf16.msra.mxu0 %v10093_v40  ;;  %5851 = vmatpush1.bf16.msra.mxu1 %v10094_v49 }
 0x7bf   :  { %3397 = vmatprep.mubr.f32.mxu0 %v9202_v54  ;;  %3468 = vmatprep.mubr.f32.mxu1 %v9202_v54 }
 0x7c0   :  { %5789 = vmatprep.subr.bf16.mxu0 %v10095_v0  ;;  %5853 = vmatprep.subr.bf16.mxu1 %v10096_v11 }
 0x7c2   :  { %5791 = vmatpush1.bf16.msra.mxu0 %v10192_v34  ;;  %5855 = vmatpush1.bf16.msra.mxu1 %v10193_v55 }
 0x7c3   :  { %5793 = vmatprep.subr.bf16.mxu0 %v10194_v63  ;;  %5857 = vmatprep.subr.bf16.mxu1 %v10195_v6 }
 0x7c6   :  { %5795 = vmatpush1.bf16.msra.mxu0 %v10196_v44  ;;  %5859 = vmatpush1.bf16.msra.mxu1 %v10197_v61 }
 0x7c7   :  { %5797 = vmatprep.subr.bf16.mxu0 %v10198_v7  ;;  %5861 = vmatprep.subr.bf16.mxu1 %v10199_v42 }
 0x7ca   :  { %5799 = vmatpush1.bf16.msra.mxu0 %v10200_v10  ;;  %5863 = vmatpush1.bf16.msra.mxu1 %v10201_v8 }
 0x7cb   :  { %5801 = vmatprep.subr.bf16.mxu0 %v10202_v12  ;;  %5865 = vmatprep.subr.bf16.mxu1 %v10296_v2 }
 0x7ce   :  { %5803 = vmatpush1.bf16.msra.mxu0 %v10297_v58  ;;  %5867 = vmatpush1.bf16.msra.mxu1 %v10298_v21 }
 0x7cf   :  { %5805 = vmatprep.subr.bf16.mxu0 %v10299_v24  ;;  %5869 = vmatprep.subr.bf16.mxu1 %v10207_v43 }
 0x7d2   :  { %5807 = vmatpush1.bf16.msra.mxu0 %v10208_v56  ;;  %5871 = vmatpush1.bf16.msra.mxu1 %v10209_v19 }
 0x7d3   :  { %5809 = vmatprep.subr.bf16.mxu0 %v10210_v20  ;;  %5873 = vmatprep.subr.bf16.mxu1 %v10211_v57 }
 0x7d6   :  { %5811 = vmatpush1.bf16.msra.mxu0 %v10212_v23  ;;  %5875 = vmatpush1.bf16.msra.mxu1 %v10213_v48 }
 0x7d7   :  { %5813 = vmatprep.subr.bf16.mxu0 %v10214_v38  ;;  %5877 = vmatprep.subr.bf16.mxu1 %v10215_v52 }
 0x7da   :  { %5815 = vmatpush1.bf16.msra.mxu0 %v10216_v47  ;;  %5879 = vmatpush1.bf16.msra.mxu1 %v10217_v18 }
 0x7db   :  { %5817 = vmatprep.subr.bf16.mxu0 %v10123_v25  ;;  %5881 = vmatprep.subr.bf16.mxu1 %v10124_v1 }
 0x7de   :  { %5819 = vmatpush1.bf16.msra.mxu0 %v10496_v26  ;;  %5883 = vmatpush1.bf16.msra.mxu1 %v10497_v31 }
 0x7df   :  { %5821 = vmatprep.subr.bf16.mxu0 %v10498_v4  ;;  %5885 = vmatprep.subr.bf16.mxu1 %v10499_v53 }
 0x7e2   :  { %5823 = vmatpush1.bf16.msra.mxu0 %v10500_v28  ;;  %5887 = vmatpush1.bf16.msra.mxu1 %v10501_v35 }
 0x7e3   :  { %5825 = vmatprep.subr.bf16.mxu0 %v10502_v14  ;;  %5889 = vmatprep.subr.bf16.mxu1 %v10503_v17 }
 0x7e6   :  { %5827 = vmatpush1.bf16.msra.mxu0 %v10504_v46  ;;  %5891 = vmatpush1.bf16.msra.mxu1 %v10505_v13  ;;  %v10593_v46 = vld [vmem:[#allocation136_spill] sm:$0xff] }
 0x7e7   :  { %5829 = vmatprep.subr.bf16.mxu0 %v10506_v37  ;;  %5893 = vmatprep.subr.bf16.mxu1 %v10507_v3  ;;  %v10518_v3 = vld [vmem:[#allocation125_spill] sm:$0xff]  ;;  %v10592_v37 = vld [vmem:[#allocation134_spill] sm:$0xff] }
 0x7ea   :  { %5831 = vmatpush1.bf16.msra.mxu0 %v10508_v51  ;;  %5895 = vmatpush1.bf16.msra.mxu1 %v10509_v32  ;;  %v10519_v51 = vld [vmem:[#allocation126_spill] sm:$0xff]  ;;  %v10520_v32 = vld [vmem:[#allocation127_spill] sm:$0xff] }
 0x7eb   :  { %5833 = vmatprep.subr.bf16.mxu0 %v10510_v22  ;;  %5897 = vmatprep.subr.bf16.mxu1 %v10511_v45  ;;  %v10521_v22 = vld [vmem:[#allocation128_spill] sm:$0xff]  ;;  %v10522_v45 = vld [vmem:[#allocation129_spill] sm:$0xff] }
 0x7ee   :  { %5835 = vmatpush1.bf16.msra.mxu0 %v10512_v30  ;;  %5899 = vmatpush1.bf16.msra.mxu1 %v10513_v62  ;;  %v10523_v30 = vld [vmem:[#allocation130_spill] sm:$0xff]  ;;  %v10524_v62 = vld [vmem:[#allocation131_spill] sm:$0xff] }
 0x7ef   :  { %5837 = vmatprep.subr.bf16.mxu0 %v10514_v33  ;;  %5901 = vmatprep.subr.bf16.mxu1 %v10515_v50  ;;  %v10525_v33 = vld [vmem:[#allocation132_spill] sm:$0xff]  ;;  %v10526_v50 = vld [vmem:[#allocation5_spill] sm:$0xff] }
 0x7f2   :  { %5839 = vmatpush1.bf16.msra.mxu0 %v10516_v39  ;;  %5903 = vmatpush1.bf16.msra.mxu1 %v10517_v15  ;;  %v10527_v39 = vld [vmem:[#allocation6_spill] sm:$0xff]  ;;  %v10538_v15 = vld [vmem:[#allocation17_spill] sm:$0xff] }
 0x7f3   :  { %5841 = vmatprep.subr.bf16.mxu0 %v10518_v3  ;;  %5905 = vmatprep.subr.bf16.mxu1 %v10519_v51  ;;  %v10528_v51 = vld [vmem:[#allocation7_spill] sm:$0xff]  ;;  %v10537_v3 = vld [vmem:[#allocation16_spill] sm:$0xff] }
 0x7f6   :  { %5843 = vmatpush1.bf16.msra.mxu0 %v10520_v32  ;;  %5907 = vmatpush1.bf16.msra.mxu1 %v10521_v22  ;;  %v10529_v32 = vld [vmem:[#allocation8_spill] sm:$0xff]  ;;  %v10530_v22 = vld [vmem:[#allocation9_spill] sm:$0xff] }
 0x7f7   :  { %5845 = vmatprep.subr.bf16.mxu0 %v10522_v45  ;;  %5909 = vmatprep.subr.bf16.mxu1 %v10523_v30  ;;  %v10531_v45 = vld [vmem:[#allocation10_spill] sm:$0xff]  ;;  %v10532_v30 = vld [vmem:[#allocation11_spill] sm:$0xff] }
 0x7fa   :  { %5847 = vmatpush1.bf16.msra.mxu0 %v10524_v62  ;;  %5911 = vmatpush1.bf16.msra.mxu1 %v10525_v33  ;;  %v10533_v62 = vld [vmem:[#allocation12_spill] sm:$0xff]  ;;  %v10534_v33 = vld [vmem:[#allocation13_spill] sm:$0xff] }
 0x7fb   :  { %5913 = vmatprep.subr.bf16.mxu0 %v10526_v50  ;;  %5977 = vmatprep.subr.bf16.mxu1 %v10527_v39  ;;  %v10535_v50 = vld [vmem:[#allocation14_spill] sm:$0xff]  ;;  %v10536_v39 = vld [vmem:[#allocation15_spill] sm:$0xff] }
 0x7fd   :  { %3398 = vmatmul.mubr.f32.vlgmr.msra.gmra.mrb[28].mxu0 %v9214_v60  ;;  %3469 = vmatmul.mubr.f32.vlgmr.msra.gmra.mrb[28].mxu1 %v9214_v60 }
 0x7fe   :  { %5915 = vmatpush1.bf16.msra.mxu0 %v10528_v51  ;;  %5979 = vmatpush1.bf16.msra.mxu1 %v10529_v32  ;;  %v10539_v51 = vld [vmem:[#allocation18_spill] sm:$0xff]  ;;  %v10540_v32 = vld [vmem:[#allocation19_spill] sm:$0xff] }
 0x7ff   :  { %5917 = vmatprep.subr.bf16.mxu0 %v10530_v22  ;;  %5981 = vmatprep.subr.bf16.mxu1 %v10531_v45  ;;  %v10541_v22 = vld [vmem:[#allocation20_spill] sm:$0xff]  ;;  %v10542_v45 = vld [vmem:[#allocation21_spill] sm:$0xff] }
 0x802   :  { %5919 = vmatpush1.bf16.msra.mxu0 %v10532_v30  ;;  %5983 = vmatpush1.bf16.msra.mxu1 %v10533_v62  ;;  %v10543_v30 = vld [vmem:[#allocation22_spill] sm:$0xff]  ;;  %v10544_v62 = vld [vmem:[#allocation23_spill] sm:$0xff] }
 0x803   :  { %5921 = vmatprep.subr.bf16.mxu0 %v10534_v33  ;;  %5985 = vmatprep.subr.bf16.mxu1 %v10535_v50  ;;  %v10545_v33 = vld [vmem:[#allocation24_spill] sm:$0xff]  ;;  %v10546_v50 = vld [vmem:[#allocation25_spill] sm:$0xff] }
 0x806   :  { %5923 = vmatpush1.bf16.msra.mxu0 %v10536_v39  ;;  %5987 = vmatpush1.bf16.msra.mxu1 %v10537_v3  ;;  %v10547_v39 = vld [vmem:[#allocation26_spill] sm:$0xff]  ;;  %v10548_v3 = vld [vmem:[#allocation27_spill] sm:$0xff] }
 0x807   :  { %5925 = vmatprep.subr.bf16.mxu0 %v10538_v15  ;;  %5989 = vmatprep.subr.bf16.mxu1 %v10539_v51  ;;  %v10549_v15 = vld [vmem:[#allocation28_spill] sm:$0xff]  ;;  %v10550_v51 = vld [vmem:[#allocation29_spill] sm:$0xff] }
 0x80a   :  { %5927 = vmatpush1.bf16.msra.mxu0 %v10540_v32  ;;  %5991 = vmatpush1.bf16.msra.mxu1 %v10541_v22  ;;  %v10551_v32 = vld [vmem:[#allocation30_spill] sm:$0xff]  ;;  %v10552_v22 = vld [vmem:[#allocation31_spill] sm:$0xff] }
 0x80b   :  { %5929 = vmatprep.subr.bf16.mxu0 %v10542_v45  ;;  %5993 = vmatprep.subr.bf16.mxu1 %v10543_v30  ;;  %v10553_v45 = vld [vmem:[#allocation32_spill] sm:$0xff]  ;;  %v10554_v30 = vld [vmem:[#allocation33_spill] sm:$0xff] }
 0x80e   :  { %5931 = vmatpush1.bf16.msra.mxu0 %v10544_v62  ;;  %5995 = vmatpush1.bf16.msra.mxu1 %v10545_v33  ;;  %v10555_v62 = vld [vmem:[#allocation34_spill] sm:$0xff]  ;;  %v10556_v33 = vld [vmem:[#allocation35_spill] sm:$0xff] }
 0x80f   :  { %5933 = vmatprep.subr.bf16.mxu0 %v10546_v50  ;;  %5997 = vmatprep.subr.bf16.mxu1 %v10547_v39  ;;  %v10557_v50 = vld [vmem:[#allocation36_spill] sm:$0xff]  ;;  %v10558_v39 = vld [vmem:[#allocation37_spill] sm:$0xff] }
 0x812   :  { %5935 = vmatpush1.bf16.msra.mxu0 %v10548_v3  ;;  %5999 = vmatpush1.bf16.msra.mxu1 %v10549_v15  ;;  %v10559_v3 = vld [vmem:[#allocation38_spill] sm:$0xff]  ;;  %v10560_v15 = vld [vmem:[#allocation39_spill] sm:$0xff] }
 0x813   :  { %5937 = vmatprep.subr.bf16.mxu0 %v10550_v51  ;;  %6001 = vmatprep.subr.bf16.mxu1 %v10551_v32  ;;  %v10561_v51 = vld [vmem:[#allocation40_spill] sm:$0xff]  ;;  %v10562_v32 = vld [vmem:[#allocation41_spill] sm:$0xff] }
 0x816   :  { %5939 = vmatpush1.bf16.msra.mxu0 %v10552_v22  ;;  %6003 = vmatpush1.bf16.msra.mxu1 %v10553_v45  ;;  %v10563_v22 = vld [vmem:[#allocation42_spill] sm:$0xff]  ;;  %v10564_v45 = vld [vmem:[#allocation43_spill] sm:$0xff] }
 0x817   :  { %5941 = vmatprep.subr.bf16.mxu0 %v10554_v30  ;;  %6005 = vmatprep.subr.bf16.mxu1 %v10555_v62  ;;  %v10565_v30 = vld [vmem:[#allocation44_spill] sm:$0xff]  ;;  %v10566_v62 = vld [vmem:[#allocation45_spill] sm:$0xff] }
 0x81a   :  { %5943 = vmatpush1.bf16.msra.mxu0 %v10556_v33  ;;  %6007 = vmatpush1.bf16.msra.mxu1 %v10557_v50  ;;  %v10567_v33 = vld [vmem:[#allocation46_spill] sm:$0xff]  ;;  %v10568_v50 = vld [vmem:[#allocation47_spill] sm:$0xff] }
 0x81b   :  { %5945 = vmatprep.subr.bf16.mxu0 %v10558_v39  ;;  %6009 = vmatprep.subr.bf16.mxu1 %v10559_v3  ;;  %v10569_v39 = vld [vmem:[#allocation48_spill] sm:$0xff]  ;;  %v10570_v3 = vld [vmem:[#allocation49_spill] sm:$0xff] }
 0x81e   :  { %5947 = vmatpush1.bf16.msra.mxu0 %v10560_v15  ;;  %6011 = vmatpush1.bf16.msra.mxu1 %v10561_v51  ;;  %v10571_v15 = vld [vmem:[#allocation50_spill] sm:$0xff]  ;;  %v10572_v51 = vld [vmem:[#allocation51_spill] sm:$0xff] }
 0x81f   :  { %5949 = vmatprep.subr.bf16.mxu0 %v10562_v32  ;;  %6013 = vmatprep.subr.bf16.mxu1 %v10563_v22  ;;  %v10573_v32 = vld [vmem:[#allocation52_spill] sm:$0xff]  ;;  %v10574_v22 = vld [vmem:[#allocation53_spill] sm:$0xff] }
 0x822   :  { %5951 = vmatpush1.bf16.msra.mxu0 %v10564_v45  ;;  %6015 = vmatpush1.bf16.msra.mxu1 %v10565_v30  ;;  %v10575_v45 = vld [vmem:[#allocation54_spill] sm:$0xff]  ;;  %v10576_v30 = vld [vmem:[#allocation55_spill] sm:$0xff] }
 0x823   :  { %5953 = vmatprep.subr.bf16.mxu0 %v10566_v62  ;;  %6017 = vmatprep.subr.bf16.mxu1 %v10567_v33  ;;  %v10577_v62 = vld [vmem:[#allocation56_spill] sm:$0xff]  ;;  %v10578_v33 = vld [vmem:[#allocation57_spill] sm:$0xff] }
 0x826   :  { %5955 = vmatpush1.bf16.msra.mxu0 %v10568_v50  ;;  %6019 = vmatpush1.bf16.msra.mxu1 %v10569_v39  ;;  %v10579_v50 = vld [vmem:[#allocation58_spill] sm:$0xff]  ;;  %v10580_v39 = vld [vmem:[#allocation59_spill] sm:$0xff] }
 0x827   :  { %5957 = vmatprep.subr.bf16.mxu0 %v10570_v3  ;;  %6021 = vmatprep.subr.bf16.mxu1 %v10571_v15  ;;  %v10581_v3 = vld [vmem:[#allocation60_spill] sm:$0xff]  ;;  %v10582_v15 = vld [vmem:[#allocation61_spill] sm:$0xff] }
 0x82a   :  { %5959 = vmatpush1.bf16.msra.mxu0 %v10572_v51  ;;  %6023 = vmatpush1.bf16.msra.mxu1 %v10573_v32  ;;  %v10583_v51 = vld [vmem:[#allocation62_spill] sm:$0xff]  ;;  %v10584_v32 = vld [vmem:[#allocation63_spill] sm:$0xff] }
 0x82b   :  { %5961 = vmatprep.subr.bf16.mxu0 %v10574_v22  ;;  %6025 = vmatprep.subr.bf16.mxu1 %v10575_v45  ;;  %v10585_v22 = vld [vmem:[#allocation64_spill] sm:$0xff]  ;;  %v10586_v45 = vld [vmem:[#allocation65_spill] sm:$0xff] }
 0x82e   :  { %5963 = vmatpush1.bf16.msra.mxu0 %v10576_v30  ;;  %6027 = vmatpush1.bf16.msra.mxu1 %v10577_v62  ;;  %v10587_v30 = vld [vmem:[#allocation66_spill] sm:$0xff]  ;;  %v10588_v62 = vld [vmem:[#allocation67_spill] sm:$0xff] }
 0x82f   :  { %5965 = vmatprep.subr.bf16.mxu0 %v10578_v33  ;;  %6029 = vmatprep.subr.bf16.mxu1 %v10579_v50  ;;  %v10589_v33 = vld [vmem:[#allocation68_spill] sm:$0xff]  ;;  %v10590_v50 = vld [vmem:[#allocation69_spill] sm:$0xff] }
 0x832   :  { %5967 = vmatpush1.bf16.msra.mxu0 %v10580_v39  ;;  %6031 = vmatpush1.bf16.msra.mxu1 %v10581_v3  ;;  %v10591_v39 = vld [vmem:[#allocation70_spill] sm:$0xff] }
 0x833   :  { %5969 = vmatprep.subr.bf16.mxu0 %v10582_v15  ;;  %6033 = vmatprep.subr.bf16.mxu1 %v10583_v51 }
 0x836   :  { %5971 = vmatpush1.bf16.msra.mxu0 %v10584_v32  ;;  %6035 = vmatpush1.bf16.msra.mxu1 %v10585_v22 }
 0x837   :  { %5973 = vmatprep.subr.bf16.mxu0 %v10586_v45  ;;  %6037 = vmatprep.subr.bf16.mxu1 %v10587_v30 }
 0x83a   :  { %5975 = vmatpush1.bf16.msra.mxu0 %v10588_v62  ;;  %6039 = vmatpush1.bf16.msra.mxu1 %v10589_v33 }
 0x83b   :  { %6041 = vmatprep.subr.bf16.mxu0 %v10590_v50  ;;  %6105 = vmatprep.subr.bf16.mxu1 %v10591_v39 }
 0x890   :  { %v3257_v3 = vpop.f32.mrb[12].mxu0  ;;  %v3328_v15 = vpop.f32.mrb[12].mxu1 }
 0x891   :  { %v6196_v51 = vadd.f32 %v3328_v15, %v10592_v37  ;;  %v3259_v13 = vpop.f32.mrb[13].mxu0  ;;  %v3330_v32 = vpop.f32.mrb[13].mxu1  ;;  %v6180_v37 = vadd.f32 %v3257_v3, %v10084_v9 }
 0x892   :  { %v6197_v22 = vadd.f32 %v3330_v32, %v10593_v46  ;;  %v6181_v32 = vadd.f32 %v3259_v13, %v10085_v16 }
 0x893   :  { %v4034_v17 = vmul.f32 -1.442695, %v6196_v51  ;;  %v4032_v51 = vmul.f32 -1.442695, %v6180_v37 }
 0x894   :  { %v4035_v45 = vmul.f32 -1.442695, %v6197_v22  ;;  %v4033_v22 = vmul.f32 -1.442695, %v6181_v32 }
 0x895   :  { %6489 = vpow2.f32 %v4034_v17 }
 0x896   :  { %6491 = vpow2.f32 %v4035_v45 }
 0x89f   :  { %v6490_v30 = vpop.eup %6489 }
 0x8a0   :  { %v3512_v62 = vadd.f32 1.0, %v6490_v30  ;;  %v6492_v14 = vpop.eup %6491 }
 0x8a1   :  { %v3513_v33 = vadd.f32 1.0, %v6492_v14 }
 0x8a2   :  { %6493 = vrcp.f32 %v3512_v62 }
 0x8a3   :  { %6495 = vrcp.f32 %v3513_v33 }
 0x8a4   :  { %6497 = vpow2.f32 %v4032_v51 }
 0x8a5   :  { %6499 = vpow2.f32 %v4033_v22 }
 0x8ac   :  { %v6494_v50 = vpop.eup %6493 }
 0x8ad   :  { %v3532_v39 = vmul.f32 %v6494_v50, %v9187_v41  ;;  %v6496_v35 = vpop.eup %6495 }
 0x8ae   :  { %v3533_v15 = vmul.f32 %v6496_v35, %v9192_v29  ;;  %v6498_v17 = vpop.eup %6497 }
 0x8af   :  { %v6500_v45 = vpop.eup %6499  ;;  %v3500_v30 = vadd.f32 1.0, %v6498_v17  ;;  %v9363_v17 = vld [vmem:[%s9536_s4] sm:$0xff] }
 0x8b0   :  { %v3501_v62 = vadd.f32 1.0, %v6500_v45  ;;  %vm3542_vm5 = vcmp.le.s32.totalorder %v9363_v17, 6  ;;  %v9369_v45 = vld [vmem:[%s9537_s5] sm:$0xff]  ;;  %vm3916_vm11 = vcmp.le.s32.totalorder %v9363_v17, 7 }
 0x8b1   :  { %6501 = vrcp.f32 %v3500_v30  ;;  %10594 = vst [vmem:[#allocation137_spill] sm:$0xff] %v9369_v45  ;;  %vm3544_vm6 = vcmp.gt.s32.totalorder %v9369_v45, 6  ;;  %v9381_v30 = vld [vmem:[%s9537_s5 + $0x8] sm:$0xff] }
 0x8b2   :  { %6503 = vrcp.f32 %v3501_v62  ;;  %vm3545_vm8 = vcmp.gt.s32.totalorder %v9381_v30, 6  ;;  %vm9384_vm9 = vmand %vm3542_vm5, %vm3544_vm6  ;;  %vm3919_vm14 = vcmp.gt.s32.totalorder %v9381_v30, 7 }
 0x8bb   :  { %v6502_v51 = vpop.eup %6501 }
 0x8bc   :  { %v6504_v22 = vpop.eup %6503 }
 0x8d0   :  { %v3399_v14 = vpop.f32.mrb[28].mxu0  ;;  %v3470_v33 = vpop.f32.mrb[28].mxu1 }
 0x8d1   :  { %v6212_v50 = vadd.f32 %v3399_v14, %v8171_v27  ;;  %v6228_v46 = vadd.f32 %v3470_v33, %v8173_v5  ;;  %v3401_v35 = vpop.f32.mrb[29].mxu0  ;;  %v3472_v28 = vpop.f32.mrb[29].mxu1 }
 0x8d2   :  { %v6213_v13 = vadd.f32 %v3401_v35, %v8175_v59  ;;  %v6229_v37 = vadd.f32 %v3472_v28, %v8177_v36 }
 0x8d3   :  { %6505 = vtanh.f32 %v6212_v50  ;;  %v4036_v3 = vmul.f32 -1.442695, %v6228_v46  ;;  %v9375_v46 = vld [vmem:[%s9536_s4 + $0x8] sm:$0xff] }
 0x8d4   :  { %6507 = vtanh.f32 %v6213_v13  ;;  %v4037_v32 = vmul.f32 -1.442695, %v6229_v37  ;;  %10595 = vst [vmem:[#allocation139_spill] sm:$0xff] %v9375_v46  ;;  %vm3543_vm7 = vcmp.le.s32.totalorder %v9375_v46, 6 }
 0x8d5   :  { %6509 = vpow2.f32 %v4036_v3  ;;  %vm9390_vm10 = vmand %vm3543_vm7, %vm3545_vm8 }
 0x8d6   :  { %6511 = vpow2.f32 %v4037_v32 }
 0x8dd   :  { %v6506_v28 = vpop.eup %6505 }
 0x8de   :  { %v6508_v62 = vpop.eup %6507  ;;  %v3534_v14 = vmul.f32 %v6506_v28, %v6502_v51 }
 0x8df   :  { %v6510_v33 = vpop.eup %6509  ;;  %v3535_v50 = vmul.f32 %v6508_v62, %v6504_v22 }
 0x8e0   :  { %v6512_v13 = vpop.eup %6511  ;;  %v9388_v37 = vadd.f32 %v3534_v14, %v3532_v39  ;;  %v3526_v3 = vadd.f32 1.0, %v6510_v33 }
 0x8e1   :  { %v9394_v46 = vadd.f32 %v3535_v50, %v3533_v15  ;;  %v3527_v45 = vadd.f32 1.0, %v6512_v13 }
 0x8e2   :  { %6513 = vtanh.f32 %v9388_v37  ;;  %v3552_v51 = vsel %vm9384_vm9, %v9388_v37, %v9187_v41 }
 0x8e3   :  { %6515 = vrcp.f32 %v3526_v3  ;;  %v3553_v39 = vsel %vm9390_vm10, %v9394_v46, %v9192_v29 }
 0x8e4   :  { %6517 = vtanh.f32 %v9394_v46 }
 0x8e5   :  { %6519 = vrcp.f32 %v3527_v45 }
 0x8ec   :  { %v6514_v22 = vpop.eup %6513 }
 0x8ed   :  { %v6516_v15 = vpop.eup %6515 }
 0x8ee   :  { %v6518_v28 = vpop.eup %6517  ;;  %v3540_v62 = vmul.f32 %v6516_v15, %v6514_v22 }
 0x8ef   :  { %v6520_v14 = vpop.eup %6519 }
 0x8f0   :  { %v3541_v33 = vmul.f32 %v6520_v14, %v6518_v28  ;;  %v3556_v50 = vsel %vm9384_vm9, %v3540_v62, 0.0  ;;  %v9426_v3 = vsel %vm9384_vm9, %v3540_v62, %v9214_v60 }
 0x8f1   :  { %4038 = vst [vmem:[%s9538_s6 + $0x60] sm:$0xff] %v3556_v50 }
 0x8f2   :  { %v9414_v13 = vsel %vm9390_vm10, %v3541_v33, %v9202_v54  ;;  %v3557_v45 = vsel %vm9390_vm10, %v3541_v33, 0.0  ;;  %v10627_v54 = vld [vmem:[#allocation136_spill] sm:$0xff] }
 0x8f3   :  { %4039 = vst [vmem:[%s9538_s6 + $0x68] sm:$0xff] %v3557_v45  ;;  %3629 = vmatprep.mubr.f32.mxu0 %v9414_v13  ;;  %3700 = vmatprep.mubr.f32.mxu1 %v9414_v13 }
 0x8f4   :  { %3630 = vmatmul.mubr.f32.vlgmr.msra.gmra.mrb[14].mxu0 %v9426_v3  ;;  %3701 = vmatmul.mubr.f32.vlgmr.msra.gmra.mrb[14].mxu1 %v9426_v3 }
 0x8f5   :  { %6043 = vmatpush1.bf16.msra.mxu0 %v10093_v40  ;;  %6107 = vmatpush1.bf16.msra.mxu1 %v10094_v49  ;;  %v10600_v40 = vld [vmem:[#allocation107_spill] sm:$0xff]  ;;  %v10601_v49 = vld [vmem:[#allocation108_spill] sm:$0xff] }
 0x8f6   :  { %3771 = vmatprep.mubr.f32.mxu0 %v9414_v13  ;;  %3842 = vmatprep.mubr.f32.mxu1 %v9414_v13 }
 0x8f7   :  { %6045 = vmatprep.subr.bf16.mxu0 %v10095_v0  ;;  %6109 = vmatprep.subr.bf16.mxu1 %v10096_v11  ;;  %v10602_v0 = vld [vmem:[#allocation109_spill] sm:$0xff]  ;;  %v10603_v11 = vld [vmem:[#allocation110_spill] sm:$0xff] }
 0x8f9   :  { %6047 = vmatpush1.bf16.msra.mxu0 %v10192_v34  ;;  %6111 = vmatpush1.bf16.msra.mxu1 %v10193_v55  ;;  %v10604_v34 = vld [vmem:[#allocation111_spill] sm:$0xff]  ;;  %v10607_v55 = vld [vmem:[#allocation114_spill] sm:$0xff] }
 0x8fa   :  { %6049 = vmatprep.subr.bf16.mxu0 %v10194_v63  ;;  %6113 = vmatprep.subr.bf16.mxu1 %v10195_v6  ;;  %v10608_v63 = vld [vmem:[#allocation115_spill] sm:$0xff]  ;;  %v10609_v6 = vld [vmem:[#allocation116_spill] sm:$0xff] }
 0x8fd   :  { %6051 = vmatpush1.bf16.msra.mxu0 %v10196_v44  ;;  %6115 = vmatpush1.bf16.msra.mxu1 %v10197_v61  ;;  %v10610_v44 = vld [vmem:[#allocation117_spill] sm:$0xff]  ;;  %v10611_v61 = vld [vmem:[#allocation118_spill] sm:$0xff] }
 0x8fe   :  { %6053 = vmatprep.subr.bf16.mxu0 %v10198_v7  ;;  %6117 = vmatprep.subr.bf16.mxu1 %v10199_v42  ;;  %v10612_v7 = vld [vmem:[#allocation119_spill] sm:$0xff]  ;;  %v10613_v42 = vld [vmem:[#allocation120_spill] sm:$0xff] }
 0x901   :  { %6055 = vmatpush1.bf16.msra.mxu0 %v10200_v10  ;;  %6119 = vmatpush1.bf16.msra.mxu1 %v10201_v8  ;;  %v10614_v10 = vld [vmem:[#allocation121_spill] sm:$0xff]  ;;  %v10615_v8 = vld [vmem:[#allocation122_spill] sm:$0xff] }
 0x902   :  { %6057 = vmatprep.subr.bf16.mxu0 %v10202_v12  ;;  %6121 = vmatprep.subr.bf16.mxu1 %v10296_v2  ;;  %v10616_v12 = vld [vmem:[#allocation123_spill] sm:$0xff]  ;;  %v10626_v2 = vld [vmem:[#allocation134_spill] sm:$0xff] }
 0x905   :  { %6059 = vmatpush1.bf16.msra.mxu0 %v10297_v58  ;;  %6123 = vmatpush1.bf16.msra.mxu1 %v10298_v21 }
 0x906   :  { %6061 = vmatprep.subr.bf16.mxu0 %v10299_v24  ;;  %6125 = vmatprep.subr.bf16.mxu1 %v10207_v43  ;;  %v10621_v43 = vld [vmem:[#allocation128_spill] sm:$0xff] }
 0x909   :  { %6063 = vmatpush1.bf16.msra.mxu0 %v10208_v56  ;;  %6127 = vmatpush1.bf16.msra.mxu1 %v10209_v19  ;;  %v10622_v56 = vld [vmem:[#allocation129_spill] sm:$0xff]  ;;  %v10623_v19 = vld [vmem:[#allocation130_spill] sm:$0xff] }
 0x90a   :  { %6065 = vmatprep.subr.bf16.mxu0 %v10210_v20  ;;  %6129 = vmatprep.subr.bf16.mxu1 %v10211_v57  ;;  %v10624_v20 = vld [vmem:[#allocation131_spill] sm:$0xff]  ;;  %v10625_v57 = vld [vmem:[#allocation132_spill] sm:$0xff] }
 0x90d   :  { %6067 = vmatpush1.bf16.msra.mxu0 %v10212_v23  ;;  %6131 = vmatpush1.bf16.msra.mxu1 %v10213_v48 }
 0x90e   :  { %6069 = vmatprep.subr.bf16.mxu0 %v10214_v38  ;;  %6133 = vmatprep.subr.bf16.mxu1 %v10215_v52  ;;  %v10617_v38 = vld [vmem:[#allocation124_spill] sm:$0xff]  ;;  %v10618_v52 = vld [vmem:[#allocation125_spill] sm:$0xff] }
 0x911   :  { %6071 = vmatpush1.bf16.msra.mxu0 %v10216_v47  ;;  %6135 = vmatpush1.bf16.msra.mxu1 %v10217_v18  ;;  %v10619_v47 = vld [vmem:[#allocation126_spill] sm:$0xff]  ;;  %v10620_v18 = vld [vmem:[#allocation127_spill] sm:$0xff] }
 0x912   :  { %6073 = vmatprep.subr.bf16.mxu0 %v10123_v25  ;;  %6137 = vmatprep.subr.bf16.mxu1 %v10124_v1  ;;  %v10605_v25 = vld [vmem:[#allocation112_spill] sm:$0xff]  ;;  %v10606_v1 = vld [vmem:[#allocation113_spill] sm:$0xff] }
 0x915   :  { %6075 = vmatpush1.bf16.msra.mxu0 %v10496_v26  ;;  %6139 = vmatpush1.bf16.msra.mxu1 %v10497_v31 }
 0x916   :  { %6077 = vmatprep.subr.bf16.mxu0 %v10498_v4  ;;  %6141 = vmatprep.subr.bf16.mxu1 %v10499_v53 }
 0x919   :  { %6079 = vmatpush1.bf16.msra.mxu0 %v10600_v40  ;;  %6143 = vmatpush1.bf16.msra.mxu1 %v10601_v49 }
 0x91a   :  { %6081 = vmatprep.subr.bf16.mxu0 %v10602_v0  ;;  %6145 = vmatprep.subr.bf16.mxu1 %v10603_v11 }
 0x91d   :  { %6083 = vmatpush1.bf16.msra.mxu0 %v10604_v34  ;;  %6147 = vmatpush1.bf16.msra.mxu1 %v10605_v25 }
 0x91e   :  { %6085 = vmatprep.subr.bf16.mxu0 %v10606_v1  ;;  %6149 = vmatprep.subr.bf16.mxu1 %v10607_v55 }
 0x921   :  { %6087 = vmatpush1.bf16.msra.mxu0 %v10608_v63  ;;  %6151 = vmatpush1.bf16.msra.mxu1 %v10609_v6 }
 0x922   :  { %6089 = vmatprep.subr.bf16.mxu0 %v10610_v44  ;;  %6153 = vmatprep.subr.bf16.mxu1 %v10611_v61 }
 0x925   :  { %6091 = vmatpush1.bf16.msra.mxu0 %v10612_v7  ;;  %6155 = vmatpush1.bf16.msra.mxu1 %v10613_v42 }
 0x926   :  { %6093 = vmatprep.subr.bf16.mxu0 %v10614_v10  ;;  %6157 = vmatprep.subr.bf16.mxu1 %v10615_v8 }
 0x929   :  { %6095 = vmatpush1.bf16.msra.mxu0 %v10616_v12  ;;  %6159 = vmatpush1.bf16.msra.mxu1 %v10617_v38  ;;  %v10629_v12 = vld [vmem:[#allocation139_spill] sm:$0xff] }
 0x92a   :  { %6097 = vmatprep.subr.bf16.mxu0 %v10618_v52  ;;  %6161 = vmatprep.subr.bf16.mxu1 %v10619_v47  ;;  %vm3917_vm13 = vcmp.le.s32.totalorder %v10629_v12, 7 }
 0x92b   :  { %vm3921_vm0 = vmand %vm3917_vm13, %vm3919_vm14 }
 0x92d   :  { %6099 = vmatpush1.bf16.msra.mxu0 %v10620_v18  ;;  %6163 = vmatpush1.bf16.msra.mxu1 %v10621_v43 }
 0x92e   :  { %6101 = vmatprep.subr.bf16.mxu0 %v10622_v56  ;;  %6165 = vmatprep.subr.bf16.mxu1 %v10623_v19 }
 0x931   :  { %6103 = vmatpush1.bf16.msra.mxu0 %v10624_v20  ;;  %6167 = vmatpush1.bf16.msra.mxu1 %v10625_v57 }
 0x934   :  { %3772 = vmatmul.mubr.f32.vlgmr.msra.gmra.mrb[30].mxu0 %v9426_v3  ;;  %3843 = vmatmul.mubr.f32.vlgmr.msra.gmra.mrb[30].mxu1 %v9426_v3 }
 0x9c7   :  { %v3631_v23 = vpop.f32.mrb[14].mxu0  ;;  %v3702_v48 = vpop.f32.mrb[14].mxu1 }
 0x9c8   :  { %v6198_v58 = vadd.f32 %v3702_v48, %v10626_v2  ;;  %v3633_v21 = vpop.f32.mrb[15].mxu0  ;;  %v3704_v24 = vpop.f32.mrb[15].mxu1  ;;  %v6182_v50 = vadd.f32 %v3631_v23, %v10084_v9 }
 0x9c9   :  { %v6199_v60 = vadd.f32 %v3704_v24, %v10627_v54  ;;  %v6183_v45 = vadd.f32 %v3633_v21, %v10085_v16 }
 0x9ca   :  { %v4042_v26 = vmul.f32 -1.442695, %v6198_v58  ;;  %v4040_v40 = vmul.f32 -1.442695, %v6182_v50 }
 0x9cb   :  { %v4043_v31 = vmul.f32 -1.442695, %v6199_v60  ;;  %v4041_v49 = vmul.f32 -1.442695, %v6183_v45 }
 0x9cc   :  { %6521 = vpow2.f32 %v4042_v26 }
 0x9cd   :  { %6523 = vpow2.f32 %v4043_v31 }
 0x9d6   :  { %v6522_v4 = vpop.eup %6521 }
 0x9d7   :  { %v3886_v53 = vadd.f32 1.0, %v6522_v4  ;;  %v6524_v22 = vpop.eup %6523 }
 0x9d8   :  { %v3887_v15 = vadd.f32 1.0, %v6524_v22 }
 0x9d9   :  { %6525 = vrcp.f32 %v3886_v53 }
 0x9da   :  { %6527 = vrcp.f32 %v3887_v15 }
 0x9db   :  { %6529 = vpow2.f32 %v4040_v40 }
 0x9dc   :  { %6531 = vpow2.f32 %v4041_v49 }
 0x9e3   :  { %v6526_v28 = vpop.eup %6525 }
 0x9e4   :  { %v3906_v62 = vmul.f32 %v6526_v28, %v3552_v51  ;;  %v6528_v14 = vpop.eup %6527 }
 0x9e5   :  { %v3907_v33 = vmul.f32 %v6528_v14, %v3553_v39  ;;  %v6530_v35 = vpop.eup %6529 }
 0x9e6   :  { %v6532_v0 = vpop.eup %6531  ;;  %v3874_v11 = vadd.f32 1.0, %v6530_v35 }
 0x9e7   :  { %v3875_v41 = vadd.f32 1.0, %v6532_v0 }
 0x9e8   :  { %6533 = vrcp.f32 %v3874_v11 }
 0x9e9   :  { %6535 = vrcp.f32 %v3875_v41 }
 0x9f2   :  { %v6534_v1 = vpop.eup %6533 }
 0x9f3   :  { %v6536_v55 = vpop.eup %6535 }
 0xa07   :  { %v3773_v37 = vpop.f32.mrb[30].mxu0  ;;  %v3844_v51 = vpop.f32.mrb[30].mxu1 }
 0xa08   :  { %v6214_v32 = vadd.f32 %v3773_v37, %v8171_v27  ;;  %v6230_v29 = vadd.f32 %v3844_v51, %v8173_v5  ;;  %v3775_v46 = vpop.f32.mrb[31].mxu0  ;;  %v3846_v39 = vpop.f32.mrb[31].mxu1 }
 0xa09   :  { %v6215_v9 = vadd.f32 %v3775_v46, %v8175_v59  ;;  %v6231_v16 = vadd.f32 %v3846_v39, %v8177_v36  ;;  %v10628_v36 = vld [vmem:[#allocation137_spill] sm:$0xff] }
 0xa0a   :  { %6537 = vtanh.f32 %v6214_v32  ;;  %v4044_v34 = vmul.f32 -1.442695, %v6230_v29  ;;  %vm3918_vm12 = vcmp.gt.s32.totalorder %v10628_v36, 7 }
 0xa0b   :  { %6539 = vtanh.f32 %v6215_v9  ;;  %v4045_v25 = vmul.f32 -1.442695, %v6231_v16  ;;  %vm3920_vm15 = vmand %vm3916_vm11, %vm3918_vm12 }
 0xa0c   :  { %6541 = vpow2.f32 %v4044_v34 }
 0xa0d   :  { %6543 = vpow2.f32 %v4045_v25 }
 0xa14   :  { %v6538_v63 = vpop.eup %6537 }
 0xa15   :  { %v6540_v6 = vpop.eup %6539  ;;  %v3908_v27 = vmul.f32 %v6538_v63, %v6534_v1 }
 0xa16   :  { %v6542_v44 = vpop.eup %6541  ;;  %v3909_v5 = vmul.f32 %v6540_v6, %v6536_v55 }
 0xa17   :  { %v6544_v61 = vpop.eup %6543  ;;  %v3910_v7 = vadd.f32 %v3908_v27, %v3906_v62  ;;  %v3900_v42 = vadd.f32 1.0, %v6542_v44 }
 0xa18   :  { %v3911_v10 = vadd.f32 %v3909_v5, %v3907_v33  ;;  %v3901_v59 = vadd.f32 1.0, %v6544_v61 }
 0xa19   :  { %6545 = vtanh.f32 %v3910_v7 }
 0xa1a   :  { %6547 = vrcp.f32 %v3900_v42 }
 0xa1b   :  { %6549 = vtanh.f32 %v3911_v10 }
 0xa1c   :  { %6551 = vrcp.f32 %v3901_v59 }
 0xa23   :  { %v6546_v8 = vpop.eup %6545 }
 0xa24   :  { %v6548_v38 = vpop.eup %6547 }
 0xa25   :  { %v6550_v52 = vpop.eup %6549  ;;  %v3914_v47 = vmul.f32 %v6548_v38, %v6546_v8 }
 0xa26   :  { %v6552_v18 = vpop.eup %6551 }
 0xa27   :  { %v3922_v43 = vsel %vm3920_vm15, %v3914_v47, %v9426_v3  ;;  %v3930_v56 = vsel %vm3920_vm15, %v3914_v47, 0.0  ;;  %v3915_v19 = vmul.f32 %v6552_v18, %v6550_v52 }
 0xa28   :  { %4046 = vst [vmem:[%s9538_s6 + $0x70] sm:$0xff] %v3930_v56  ;;  %3937 = vst [vmem:[%s9539_s7] sm:$0xff] %v3922_v43 }
 0xa29   :  { %v3923_v17 = vsel %vm3921_vm0, %v3915_v19, %v9414_v13  ;;  %v3931_v30 = vsel %vm3921_vm0, %v3915_v19, 0.0 }
 0xa2a   :  { %4047 = vst [vmem:[%s9538_s6 + $0x78] sm:$0xff] %v3931_v30  ;;  %3938 = vst [vmem:[%s9539_s7 + $0x8] sm:$0xff] %v3923_v17 }

</bundles_post_ra>
